<compile_context>
chip_gen: v5e
topology: v5e:2x2
jax: 0.10.0
libtpu: 0.0.40
codegen_flags: <defaults>
</compile_context>

<pallas_src>
import math

import jax
import jax.numpy as jnp
from jax.experimental import pallas as pl
from jax.experimental.pallas import tpu as pltpu

# ----- module-consistent hyperparameters -----
INPUT_DIM = 16
D_MODEL = 32
NHEAD = 4
HEAD_DIM = D_MODEL // NHEAD
NUM_LAYERS = 2
DIM_FF = 64
NUM_CLASSES = 5
SEQ = 8
BATCH = 2
LN_EPS = 1e-5

# ----- static layout of the two packed weight slabs (shared by packer & kernel) -----
# weight slab: (W_ROWS, 128) f32; every weight occupies a row block starting at lane 0
W_EMB_R = 0                           # (INPUT_DIM, D_MODEL)
W_FC_R = W_EMB_R + INPUT_DIM          # (D_MODEL, D_MODEL)
LAYER_R0 = W_FC_R + D_MODEL
QK_OFF = 0                            # (D_MODEL, 2*D_MODEL)      [Wq | Wk]
FF1_OFF = QK_OFF + D_MODEL            # (D_MODEL, DIM_FF)
FF2_OFF = FF1_OFF + D_MODEL           # (DIM_FF, D_MODEL)
VO_OFF = FF2_OFF + DIM_FF             # (D_MODEL, NHEAD*D_MODEL)  per-head folded Wv@Wo
LAYER_W_ROWS = VO_OFF + D_MODEL
W_ROWS = LAYER_R0 + NUM_LAYERS * LAYER_W_ROWS   # 368 (multiple of 8)
W_COLS = 128

# bias/vector slab: (B_ROWS, 128) f32; one vector per row, starting at lane 0
B_EMB_I = 0
B_FC_I = 1
LAYER_B0 = 2
BQK_I, BATT_I, LN1G_I, LN1B_I, BFF1_I, BFF2_I, LN2G_I, LN2B_I = range(8)
LAYER_B_VECS = 8
B_ROWS = LAYER_B0 + NUM_LAYERS * LAYER_B_VECS   # 18
B_COLS = 128


# ---------------- in-kernel math helpers ----------------
def _erf(x):
    # Abramowitz & Stegun 7.1.26 rational approximation (|err| < 1.5e-7),
    # built only from ops Mosaic is guaranteed to lower.
    sign = jnp.where(x >= 0.0, 1.0, -1.0)
    ax = jnp.abs(x)
    t = 1.0 / (1.0 + 0.3275911 * ax)
    poly = t * (0.254829592
                + t * (-0.284496736
                       + t * (1.421413741
                              + t * (-1.453152027
                                     + t * 1.061405429))))
    return sign * (1.0 - poly * jnp.exp(-ax * ax))


def _gelu_exact(x):
    return 0.5 * x * (1.0 + _erf(x * (1.0 / math.sqrt(2.0))))


def _layernorm(x, gamma, beta):
    mu = jnp.mean(x, axis=-1, keepdims=True)
    var = jnp.mean((x - mu) ** 2, axis=-1, keepdims=True)
    return (x - mu) * jax.lax.rsqrt(var + LN_EPS) * gamma + beta


# ---------------- the Pallas kernel ----------------
def _make_encoder_kernel(b_blk, seq):
    rows = b_blk * seq
    scale = 1.0 / math.sqrt(HEAD_DIM)

    def kernel(x_ref, w_ref, b_ref, out_ref):
        bias = b_ref[...]                                  # (B_ROWS, 128), tiny

        def wmat(r0, nr, nc):                              # static weight-slab slice
            return w_ref[r0:r0 + nr, 0:nc]

        def bvec(i, nc):                                   # (1, nc) bias / LN vector
            return bias[i:i + 1, 0:nc]

        # Block-diagonal additive mask: row r may only attend to columns of its own
        # batch element.  Built once from iotas (no integer division needed).
        row_blk = jax.lax.broadcasted_iota(
            jnp.int32, (b_blk, seq, rows), 0).reshape(rows, rows)   # [r, c] = r // seq
        col = jax.lax.broadcasted_iota(jnp.int32, (rows, rows), 1)  # [r, c] = c
        lo = row_blk * seq
        neg = jnp.where((col >= lo) & (col < lo + seq),
                        0.0, -1e30).astype(jnp.float32)

        # embedding: Linear(input_dim, d_model)
        h = jnp.dot(x_ref[...], wmat(W_EMB_R, INPUT_DIM, D_MODEL),
                    preferred_element_type=jnp.float32) + bvec(B_EMB_I, D_MODEL)

        for l in range(NUM_LAYERS):
            wb = LAYER_R0 + l * LAYER_W_ROWS
            bb = LAYER_B0 + l * LAYER_B_VECS

            # ---- multi-head self-attention (post-norm, dropout = identity) ----
            qk = jnp.dot(h, wmat(wb + QK_OFF, D_MODEL, 2 * D_MODEL),
                         preferred_element_type=jnp.float32) \
                 + bvec(bb + BQK_I, 2 * D_MODEL)                      # (rows, 64)
            vo = jnp.dot(h, wmat(wb + VO_OFF, D_MODEL, NHEAD * D_MODEL),
                         preferred_element_type=jnp.float32)          # (rows, 128)

            attn = None
            for hh in range(NHEAD):
                q_h = qk[:, hh * HEAD_DIM:(hh + 1) * HEAD_DIM]                       # (rows, 8)
                k_h = qk[:, D_MODEL + hh * HEAD_DIM:D_MODEL + (hh + 1) * HEAD_DIM]   # (rows, 8)
                v_h = vo[:, hh * D_MODEL:(hh + 1) * D_MODEL]                         # (rows, 32)

                s = jax.lax.dot_general(q_h, k_h, (((1,), (1,)), ((), ())),
                                        preferred_element_type=jnp.float32)
                s = s * scale + neg
                s = s - jnp.max(s, axis=-1, keepdims=True)
                p = jnp.exp(s)
                p = p / jnp.sum(p, axis=-1, keepdims=True)    # exact softmax normalization
                ctx = jnp.dot(p, v_h, preferred_element_type=jnp.float32)  # (rows, 32)
                attn = ctx if attn is None else attn + ctx

            attn = attn + bvec(bb + BATT_I, D_MODEL)          # folded bv@Wo + bo
            h = _layernorm(h + attn,
                           bvec(bb + LN1G_I, D_MODEL), bvec(bb + LN1B_I, D_MODEL))

            # ---- feed-forward (exact erf GELU) ----
            ff = jnp.dot(h, wmat(wb + FF1_OFF, D_MODEL, DIM_FF),
                         preferred_element_type=jnp.float32) + bvec(bb + BFF1_I, DIM_FF)
            ff = _gelu_exact(ff)
            ff = jnp.dot(ff, wmat(wb + FF2_OFF, DIM_FF, D_MODEL),
                         preferred_element_type=jnp.float32) + bvec(bb + BFF2_I, D_MODEL)
            h = _layernorm(h + ff,
                           bvec(bb + LN2G_I, D_MODEL), bvec(bb + LN2B_I, D_MODEL))

        # final fc: Linear(d_model, d_model); trailing dropout = identity at inference
        out_ref[...] = jnp.dot(h, wmat(W_FC_R, D_MODEL, D_MODEL),
                               preferred_element_type=jnp.float32) + bvec(B_FC_I, D_MODEL)

    return kernel


# ---------------- one-time weight packing (runs ONCE, outside the per-call path) ----
def prepare_weights(params):
    D, HD = D_MODEL, HEAD_DIM
    w = jnp.zeros((W_ROWS, W_COLS), jnp.float32)
    b = jnp.zeros((B_ROWS, B_COLS), jnp.float32)

    w = w.at[W_EMB_R:W_EMB_R + INPUT_DIM, :D].set(params["w_emb"])
    w = w.at[W_FC_R:W_FC_R + D, :D].set(params["w_fc"])
    b = b.at[B_EMB_I, :D].set(params["b_emb"][0])
    b = b.at[B_FC_I, :D].set(params["b_fc"][0])

    for l in range(NUM_LAYERS):
        wb = LAYER_R0 + l * LAYER_W_ROWS
        bb = LAYER_B0 + l * LAYER_B_VECS

        w_qkv, b_qkv = params["w_qkv"][l], params["b_qkv"][l][0]
        w_o = params["w_o"][l]
        wq, wk, wv = w_qkv[:, 0:D], w_qkv[:, D:2 * D], w_qkv[:, 2 * D:3 * D]
        bq, bk, bv = b_qkv[0:D], b_qkv[D:2 * D], b_qkv[2 * D:3 * D]

        # fold each head's value projection with its slice of the output projection
        wvo = jnp.concatenate(
            [wv[:, h * HD:(h + 1) * HD] @ w_o[h * HD:(h + 1) * HD, :]
             for h in range(NHEAD)], axis=1)                    # (D, NHEAD*D)
        attn_bias = bv @ w_o + params["b_o"][l][0]              # bv@Wo + bo

        w = w.at[wb + QK_OFF:wb + QK_OFF + D, :2 * D].set(
            jnp.concatenate([wq, wk], axis=1))
        w = w.at[wb + FF1_OFF:wb + FF1_OFF + D, :DIM_FF].set(params["w_ff1"][l])
        w = w.at[wb + FF2_OFF:wb + FF2_OFF + DIM_FF, :D].set(params["w_ff2"][l])
        w = w.at[wb + VO_OFF:wb + VO_OFF + D, :NHEAD * D].set(wvo)

        b = b.at[bb + BQK_I, :2 * D].set(jnp.concatenate([bq, bk]))
        b = b.at[bb + BATT_I, :D].set(attn_bias)
        b = b.at[bb + LN1G_I, :D].set(params["ln1_g"][l][0])
        b = b.at[bb + LN1B_I, :D].set(params["ln1_b"][l][0])
        b = b.at[bb + BFF1_I, :DIM_FF].set(params["b_ff1"][l][0])
        b = b.at[bb + BFF2_I, :D].set(params["b_ff2"][l][0])
        b = b.at[bb + LN2G_I, :D].set(params["ln2_g"][l][0])
        b = b.at[bb + LN2B_I, :D].set(params["ln2_b"][l][0])

    return w, b


# ---------------- pallas_call wrapper ----------------
def _encoder_pallas(x2d, w_slab, b_slab, b_blk, seq):
    rows = b_blk * seq
    return pl.pallas_call(
        _make_encoder_kernel(b_blk, seq),
        out_shape=jax.ShapeDtypeStruct((rows, D_MODEL), jnp.float32),
        grid_spec=pltpu.PrefetchScalarGridSpec(
            num_scalar_prefetch=0,
            grid=(1,),   # single step: all rows + all weights resident at once
            in_specs=[pl.BlockSpec((rows, INPUT_DIM), lambda i: (0, 0)),
                      pl.BlockSpec((W_ROWS, W_COLS), lambda i: (0, 0)),
                      pl.BlockSpec((B_ROWS, B_COLS), lambda i: (0, 0))],
            out_specs=pl.BlockSpec((rows, D_MODEL), lambda i: (0, 0)),
        ),
        compiler_params=pltpu.CompilerParams(
            dimension_semantics=("arbitrary",)),
    )(x2d, w_slab, b_slab)


def _encode(w_slab, b_slab, x):
    B, S, _ = x.shape
    z = _encoder_pallas(x.reshape(B * S, INPUT_DIM), w_slab, b_slab, B, S)
    return z.reshape(B, S, D_MODEL)


@jax.jit
def _forward_pair(w_slab, b_slab, x1, x2):
    B = x1.shape[0]
    z = _encode(w_slab, b_slab, jnp.concatenate([x1, x2], axis=0))
    return z[:B], z[B:]


@jax.jit
def _forward_single(w_slab, b_slab, x):
    return _encode(w_slab, b_slab, x)


@jax.jit
def _classify_impl(w_slab, b_slab, w_cls, b_cls, x):
    z = _encode(w_slab, b_slab, x)
    return z @ w_cls + b_cls


def contrastive_forward(packed, x1, x2=None):
    """Mirrors ContrastiveModel.forward — both branches fused into ONE pallas_call."""
    w_slab, b_slab = packed
    if x2 is None:
        return _forward_single(w_slab, b_slab, x1)
    return _forward_pair(w_slab, b_slab, x1, x2)


def classify(packed, params, x):
    """Mirrors ContrastiveModel.classify (classifier head fused into the same jit)."""
    return _classify_impl(packed[0], packed[1], params["w_cls"], params["b_cls"], x)


# ---------------- deterministic parameter init ----------------
def init_params(key):
    def nrm(k, shape, scale=0.05):
        return scale * jax.random.normal(k, shape, jnp.float32)

    keys = jax.random.split(key, 16)
    return {
        "w_emb": nrm(keys[0], (INPUT_DIM, D_MODEL)),
        "b_emb": nrm(keys[1], (1, D_MODEL)),
        "w_qkv": nrm(keys[2], (NUM_LAYERS, D_MODEL, 3 * D_MODEL)),
        "b_qkv": nrm(keys[3], (NUM_LAYERS, 1, 3 * D_MODEL)),
        "w_o": nrm(keys[4], (NUM_LAYERS, D_MODEL, D_MODEL)),
        "b_o": nrm(keys[5], (NUM_LAYERS, 1, D_MODEL)),
        "ln1_g": jnp.ones((NUM_LAYERS, 1, D_MODEL), jnp.float32),
        "ln1_b": jnp.zeros((NUM_LAYERS, 1, D_MODEL), jnp.float32),
        "w_ff1": nrm(keys[6], (NUM_LAYERS, D_MODEL, DIM_FF)),
        "b_ff1": nrm(keys[7], (NUM_LAYERS, 1, DIM_FF)),
        "w_ff2": nrm(keys[8], (NUM_LAYERS, DIM_FF, D_MODEL)),
        "b_ff2": nrm(keys[9], (NUM_LAYERS, 1, D_MODEL)),
        "ln2_g": jnp.ones((NUM_LAYERS, 1, D_MODEL), jnp.float32),
        "ln2_b": jnp.zeros((NUM_LAYERS, 1, D_MODEL), jnp.float32),
        "w_fc": nrm(keys[10], (D_MODEL, D_MODEL)),
        "b_fc": nrm(keys[11], (1, D_MODEL)),
        # classifier head (used only by classify(), not forward())
        "w_cls": nrm(keys[12], (D_MODEL, NUM_CLASSES)),
        "b_cls": nrm(keys[13], (1, NUM_CLASSES)),
    }


# ---------------- pure-JAX reference (for correctness check) ----------------
def _layernorm_ref(x, g, b):
    mu = jnp.mean(x, axis=-1, keepdims=True)
    var = jnp.mean((x - mu) ** 2, axis=-1, keepdims=True)
    return (x - mu) / jnp.sqrt(var + LN_EPS) * g + b


def encoder_ref(x, p):
    h = x @ p["w_emb"] + p["b_emb"]
    for l in range(NUM_LAYERS):
        qkv = h @ p["w_qkv"][l] + p["b_qkv"][l]
        q, k, v = jnp.split(qkv, 3, axis=-1)
        B, S, _ = q.shape
        qh = q.reshape(B, S, NHEAD, HEAD_DIM).transpose(0, 2, 1, 3)
        kh = k.reshape(B, S, NHEAD, HEAD_DIM).transpose(0, 2, 1, 3)
        vh = v.reshape(B, S, NHEAD, HEAD_DIM).transpose(0, 2, 1, 3)
        s = jnp.einsum("bhqd,bhkd->bhqk", qh, kh) / math.sqrt(HEAD_DIM)
        attn = jnp.einsum("bhqk,bhkd->bhqd", jax.nn.softmax(s, axis=-1), vh)
        attn = attn.transpose(0, 2, 1, 3).reshape(B, S, D_MODEL)
        attn = attn @ p["w_o"][l] + p["b_o"][l]
        h = _layernorm_ref(h + attn, p["ln1_g"][l], p["ln1_b"][l])
        ff = jax.nn.gelu(h @ p["w_ff1"][l] + p["b_ff1"][l], approximate=False)
        ff = ff @ p["w_ff2"][l] + p["b_ff2"][l]
        h = _layernorm_ref(h + ff, p["ln2_g"][l], p["ln2_b"][l])
    return h @ p["w_fc"] + p["b_fc"]


if __name__ == "__main__":
    root = jax.random.PRNGKey(0)
    kp, k1, k2 = jax.random.split(root, 3)
    params = init_params(kp)
    packed = prepare_weights(params)     # packed ONCE, outside the per-call path

    x1 = jax.random.normal(k1, (BATCH, SEQ, INPUT_DIM), jnp.float32)
    x2 = jax.random.normal(k2, (BATCH, SEQ, INPUT_DIM), jnp.float32)

    # forward(x1, x2) — the two branches share one fused pallas_call
    z1, z2 = contrastive_forward(packed, x1, x2)
    # forward(x1) and classify(x1) paths
    z_single = contrastive_forward(packed, x1)
    logits = classify(packed, params, x1)
    jax.block_until_ready((z1, z2, z_single, logits))

    r1 = encoder_ref(x1, params)
    r2 = encoder_ref(x2, params)
    assert jnp.allclose(z1, r1, atol=2e-3, rtol=2e-3), "z1 mismatch vs reference"
    assert jnp.allclose(z2, r2, atol=2e-3, rtol=2e-3), "z2 mismatch vs reference"
    assert jnp.allclose(z_single, r1, atol=2e-3, rtol=2e-3), "single-branch mismatch"
    logits_ref = r1 @ params["w_cls"] + params["b_cls"]
    assert jnp.allclose(logits, logits_ref, atol=2e-3, rtol=2e-3), "classify mismatch"

    print("KERNEL_OK")
</pallas_src>

<mosaic_0001>
module attributes {stable_mosaic.version = 11 : i64} {
  func.func @kernel(%arg0: i32, %arg1: memref<32x16xf32, #tpu.memory_space<vmem>>, %arg2: memref<368x128xf32, #tpu.memory_space<vmem>>, %arg3: memref<18x128xf32, #tpu.memory_space<vmem>>, %arg4: memref<32x32xf32, #tpu.memory_space<vmem>>) attributes {dimension_semantics = [#tpu.dimension_semantics<arbitrary>], iteration_bounds = array<i64: 1>, scalar_prefetch = 0 : i64, scratch_operands = 0 : i64, tpu.core_type = #tpu.core_type<tc>, window_params = [{pipeline_mode = #tpu.pipeline_mode<synchronous>, transform_indices = @transform_0, window_bounds = array<i64: 32, 16>}, {pipeline_mode = #tpu.pipeline_mode<synchronous>, transform_indices = @transform_1, window_bounds = array<i64: 368, 128>}, {pipeline_mode = #tpu.pipeline_mode<synchronous>, transform_indices = @transform_2, window_bounds = array<i64: 18, 128>}, {pipeline_mode = #tpu.pipeline_mode<synchronous>, transform_indices = @transform_3, window_bounds = array<i64: 32, 32>}]} {
    %c0 = arith.constant 0 : index
    %c0_0 = arith.constant 0 : index
    %0 = vector.load %arg3[%c0, %c0_0] : memref<18x128xf32, #tpu.memory_space<vmem>>, vector<18x128xf32>
    %1 = tpu.iota {dimensions = array<i32: 0>} : vector<4x8x32xi32>
    %2 = vector.shape_cast %1 : vector<4x8x32xi32> to vector<32x32xi32>
    %3 = tpu.iota {dimensions = array<i32: 1>} : vector<32x32xi32>
    %c8_i32 = arith.constant 8 : i32
    %4 = vector.broadcast %c8_i32 : i32 to vector<32x32xi32>
    %5 = arith.muli %2, %4 : vector<32x32xi32>
    %6 = arith.cmpi sge, %3, %5 : vector<32x32xi32>
    %c8_i32_1 = arith.constant 8 : i32
    %7 = vector.broadcast %c8_i32_1 : i32 to vector<32x32xi32>
    %8 = arith.addi %5, %7 : vector<32x32xi32>
    %9 = arith.cmpi slt, %3, %8 : vector<32x32xi32>
    %10 = arith.andi %6, %9 : vector<32x32xi1>
    %cst = arith.constant 0.000000e+00 : f32
    %cst_2 = arith.constant -1.000000e+30 : f32
    %11 = vector.broadcast %cst : f32 to vector<32x32xf32>
    %12 = vector.broadcast %cst_2 : f32 to vector<32x32xf32>
    %13 = arith.select %10, %11, %12 : vector<32x32xi1>, vector<32x32xf32>
    %c0_3 = arith.constant 0 : index
    %c0_4 = arith.constant 0 : index
    %14 = vector.load %arg1[%c0_3, %c0_4] : memref<32x16xf32, #tpu.memory_space<vmem>>, vector<32x16xf32>
    %c0_5 = arith.constant 0 : index
    %c0_6 = arith.constant 0 : index
    %15 = vector.load %arg2[%c0_5, %c0_6] : memref<368x128xf32, #tpu.memory_space<vmem>>, vector<16x32xf32>
    %cst_7 = arith.constant dense<0.000000e+00> : vector<32x32xf32>
    %16 = tpu.matmul %14, %15, %cst_7 {dimension_numbers = #tpu.dot_dimension_numbers<[1], [0], [0], [1], [0, 0, 1, 1], [], []>} : vector<32x16xf32>, vector<16x32xf32>, vector<32x32xf32> -> vector<32x32xf32>
    %17 = vector.extract_strided_slice %0 {offsets = [0, 0], sizes = [1, 32], strides = [1, 1]} : vector<18x128xf32> to vector<1x32xf32>
    %18 = vector.broadcast %17 : vector<1x32xf32> to vector<32x32xf32>
    %19 = arith.addf %16, %18 : vector<32x32xf32>
    %c48 = arith.constant 48 : index
    %c0_8 = arith.constant 0 : index
    %20 = vector.load %arg2[%c48, %c0_8] : memref<368x128xf32, #tpu.memory_space<vmem>>, vector<32x64xf32>
    %cst_9 = arith.constant dense<0.000000e+00> : vector<32x64xf32>
    %21 = tpu.matmul %19, %20, %cst_9 {dimension_numbers = #tpu.dot_dimension_numbers<[1], [0], [0], [1], [0, 0, 1, 1], [], []>} : vector<32x32xf32>, vector<32x64xf32>, vector<32x64xf32> -> vector<32x64xf32>
    %22 = vector.extract_strided_slice %0 {offsets = [2, 0], sizes = [1, 64], strides = [1, 1]} : vector<18x128xf32> to vector<1x64xf32>
    %23 = vector.broadcast %22 : vector<1x64xf32> to vector<32x64xf32>
    %24 = arith.addf %21, %23 : vector<32x64xf32>
    %c176 = arith.constant 176 : index
    %c0_10 = arith.constant 0 : index
    %25 = vector.load %arg2[%c176, %c0_10] : memref<368x128xf32, #tpu.memory_space<vmem>>, vector<32x128xf32>
    %cst_11 = arith.constant dense<0.000000e+00> : vector<32x128xf32>
    %26 = tpu.matmul %19, %25, %cst_11 {dimension_numbers = #tpu.dot_dimension_numbers<[1], [0], [0], [1], [0, 0, 1, 1], [], []>} : vector<32x32xf32>, vector<32x128xf32>, vector<32x128xf32> -> vector<32x128xf32>
    %27 = vector.extract_strided_slice %24 {offsets = [0, 0], sizes = [32, 8], strides = [1, 1]} : vector<32x64xf32> to vector<32x8xf32>
    %28 = vector.extract_strided_slice %24 {offsets = [0, 32], sizes = [32, 8], strides = [1, 1]} : vector<32x64xf32> to vector<32x8xf32>
    %29 = vector.extract_strided_slice %26 {offsets = [0, 0], sizes = [32, 32], strides = [1, 1]} : vector<32x128xf32> to vector<32x32xf32>
    %cst_12 = arith.constant dense<0.000000e+00> : vector<32x32xf32>
    %30 = tpu.matmul %27, %28, %cst_12 {dimension_numbers = #tpu.dot_dimension_numbers<[1], [1], [0], [0], [0, 0, 1, 0], [], []>} : vector<32x8xf32>, vector<32x8xf32>, vector<32x32xf32> -> vector<32x32xf32>
    %cst_13 = arith.constant 0.353553385 : f32
    %31 = vector.broadcast %cst_13 : f32 to vector<32x32xf32>
    %32 = arith.mulf %30, %31 : vector<32x32xf32>
    %33 = arith.addf %32, %13 : vector<32x32xf32>
    %cst_14 = arith.constant dense<0xFF800000> : vector<32xf32>
    %34 = vector.multi_reduction <maximumf>, %33, %cst_14 [1] : vector<32x32xf32> to vector<32xf32>
    %35 = vector.shape_cast %34 : vector<32xf32> to vector<32x1xf32>
    %36 = vector.broadcast %35 : vector<32x1xf32> to vector<32x32xf32>
    %37 = arith.subf %33, %36 : vector<32x32xf32>
    %38 = math.exp %37 : vector<32x32xf32>
    %cst_15 = arith.constant dense<0.000000e+00> : vector<32xf32>
    %39 = vector.multi_reduction <add>, %38, %cst_15 [1] : vector<32x32xf32> to vector<32xf32>
    %40 = vector.shape_cast %39 : vector<32xf32> to vector<32x1xf32>
    %41 = vector.broadcast %40 : vector<32x1xf32> to vector<32x32xf32>
    %42 = arith.divf %38, %41 : vector<32x32xf32>
    %cst_16 = arith.constant dense<0.000000e+00> : vector<32x32xf32>
    %43 = tpu.matmul %42, %29, %cst_16 {dimension_numbers = #tpu.dot_dimension_numbers<[1], [0], [0], [1], [0, 0, 1, 1], [], []>} : vector<32x32xf32>, vector<32x32xf32>, vector<32x32xf32> -> vector<32x32xf32>
    %44 = vector.extract_strided_slice %24 {offsets = [0, 8], sizes = [32, 8], strides = [1, 1]} : vector<32x64xf32> to vector<32x8xf32>
    %45 = vector.extract_strided_slice %24 {offsets = [0, 40], sizes = [32, 8], strides = [1, 1]} : vector<32x64xf32> to vector<32x8xf32>
    %46 = vector.extract_strided_slice %26 {offsets = [0, 32], sizes = [32, 32], strides = [1, 1]} : vector<32x128xf32> to vector<32x32xf32>
    %cst_17 = arith.constant dense<0.000000e+00> : vector<32x32xf32>
    %47 = tpu.matmul %44, %45, %cst_17 {dimension_numbers = #tpu.dot_dimension_numbers<[1], [1], [0], [0], [0, 0, 1, 0], [], []>} : vector<32x8xf32>, vector<32x8xf32>, vector<32x32xf32> -> vector<32x32xf32>
    %cst_18 = arith.constant 0.353553385 : f32
    %48 = vector.broadcast %cst_18 : f32 to vector<32x32xf32>
    %49 = arith.mulf %47, %48 : vector<32x32xf32>
    %50 = arith.addf %49, %13 : vector<32x32xf32>
    %cst_19 = arith.constant dense<0xFF800000> : vector<32xf32>
    %51 = vector.multi_reduction <maximumf>, %50, %cst_19 [1] : vector<32x32xf32> to vector<32xf32>
    %52 = vector.shape_cast %51 : vector<32xf32> to vector<32x1xf32>
    %53 = vector.broadcast %52 : vector<32x1xf32> to vector<32x32xf32>
    %54 = arith.subf %50, %53 : vector<32x32xf32>
    %55 = math.exp %54 : vector<32x32xf32>
    %cst_20 = arith.constant dense<0.000000e+00> : vector<32xf32>
    %56 = vector.multi_reduction <add>, %55, %cst_20 [1] : vector<32x32xf32> to vector<32xf32>
    %57 = vector.shape_cast %56 : vector<32xf32> to vector<32x1xf32>
    %58 = vector.broadcast %57 : vector<32x1xf32> to vector<32x32xf32>
    %59 = arith.divf %55, %58 : vector<32x32xf32>
    %cst_21 = arith.constant dense<0.000000e+00> : vector<32x32xf32>
    %60 = tpu.matmul %59, %46, %cst_21 {dimension_numbers = #tpu.dot_dimension_numbers<[1], [0], [0], [1], [0, 0, 1, 1], [], []>} : vector<32x32xf32>, vector<32x32xf32>, vector<32x32xf32> -> vector<32x32xf32>
    %61 = arith.addf %43, %60 : vector<32x32xf32>
    %62 = vector.extract_strided_slice %24 {offsets = [0, 16], sizes = [32, 8], strides = [1, 1]} : vector<32x64xf32> to vector<32x8xf32>
    %63 = vector.extract_strided_slice %24 {offsets = [0, 48], sizes = [32, 8], strides = [1, 1]} : vector<32x64xf32> to vector<32x8xf32>
    %64 = vector.extract_strided_slice %26 {offsets = [0, 64], sizes = [32, 32], strides = [1, 1]} : vector<32x128xf32> to vector<32x32xf32>
    %cst_22 = arith.constant dense<0.000000e+00> : vector<32x32xf32>
    %65 = tpu.matmul %62, %63, %cst_22 {dimension_numbers = #tpu.dot_dimension_numbers<[1], [1], [0], [0], [0, 0, 1, 0], [], []>} : vector<32x8xf32>, vector<32x8xf32>, vector<32x32xf32> -> vector<32x32xf32>
    %cst_23 = arith.constant 0.353553385 : f32
    %66 = vector.broadcast %cst_23 : f32 to vector<32x32xf32>
    %67 = arith.mulf %65, %66 : vector<32x32xf32>
    %68 = arith.addf %67, %13 : vector<32x32xf32>
    %cst_24 = arith.constant dense<0xFF800000> : vector<32xf32>
    %69 = vector.multi_reduction <maximumf>, %68, %cst_24 [1] : vector<32x32xf32> to vector<32xf32>
    %70 = vector.shape_cast %69 : vector<32xf32> to vector<32x1xf32>
    %71 = vector.broadcast %70 : vector<32x1xf32> to vector<32x32xf32>
    %72 = arith.subf %68, %71 : vector<32x32xf32>
    %73 = math.exp %72 : vector<32x32xf32>
    %cst_25 = arith.constant dense<0.000000e+00> : vector<32xf32>
    %74 = vector.multi_reduction <add>, %73, %cst_25 [1] : vector<32x32xf32> to vector<32xf32>
    %75 = vector.shape_cast %74 : vector<32xf32> to vector<32x1xf32>
    %76 = vector.broadcast %75 : vector<32x1xf32> to vector<32x32xf32>
    %77 = arith.divf %73, %76 : vector<32x32xf32>
    %cst_26 = arith.constant dense<0.000000e+00> : vector<32x32xf32>
    %78 = tpu.matmul %77, %64, %cst_26 {dimension_numbers = #tpu.dot_dimension_numbers<[1], [0], [0], [1], [0, 0, 1, 1], [], []>} : vector<32x32xf32>, vector<32x32xf32>, vector<32x32xf32> -> vector<32x32xf32>
    %79 = arith.addf %61, %78 : vector<32x32xf32>
    %80 = vector.extract_strided_slice %24 {offsets = [0, 24], sizes = [32, 8], strides = [1, 1]} : vector<32x64xf32> to vector<32x8xf32>
    %81 = vector.extract_strided_slice %24 {offsets = [0, 56], sizes = [32, 8], strides = [1, 1]} : vector<32x64xf32> to vector<32x8xf32>
    %82 = vector.extract_strided_slice %26 {offsets = [0, 96], sizes = [32, 32], strides = [1, 1]} : vector<32x128xf32> to vector<32x32xf32>
    %cst_27 = arith.constant dense<0.000000e+00> : vector<32x32xf32>
    %83 = tpu.matmul %80, %81, %cst_27 {dimension_numbers = #tpu.dot_dimension_numbers<[1], [1], [0], [0], [0, 0, 1, 0], [], []>} : vector<32x8xf32>, vector<32x8xf32>, vector<32x32xf32> -> vector<32x32xf32>
    %cst_28 = arith.constant 0.353553385 : f32
    %84 = vector.broadcast %cst_28 : f32 to vector<32x32xf32>
    %85 = arith.mulf %83, %84 : vector<32x32xf32>
    %86 = arith.addf %85, %13 : vector<32x32xf32>
    %cst_29 = arith.constant dense<0xFF800000> : vector<32xf32>
    %87 = vector.multi_reduction <maximumf>, %86, %cst_29 [1] : vector<32x32xf32> to vector<32xf32>
    %88 = vector.shape_cast %87 : vector<32xf32> to vector<32x1xf32>
    %89 = vector.broadcast %88 : vector<32x1xf32> to vector<32x32xf32>
    %90 = arith.subf %86, %89 : vector<32x32xf32>
    %91 = math.exp %90 : vector<32x32xf32>
    %cst_30 = arith.constant dense<0.000000e+00> : vector<32xf32>
    %92 = vector.multi_reduction <add>, %91, %cst_30 [1] : vector<32x32xf32> to vector<32xf32>
    %93 = vector.shape_cast %92 : vector<32xf32> to vector<32x1xf32>
    %94 = vector.broadcast %93 : vector<32x1xf32> to vector<32x32xf32>
    %95 = arith.divf %91, %94 : vector<32x32xf32>
    %cst_31 = arith.constant dense<0.000000e+00> : vector<32x32xf32>
    %96 = tpu.matmul %95, %82, %cst_31 {dimension_numbers = #tpu.dot_dimension_numbers<[1], [0], [0], [1], [0, 0, 1, 1], [], []>} : vector<32x32xf32>, vector<32x32xf32>, vector<32x32xf32> -> vector<32x32xf32>
    %97 = arith.addf %79, %96 : vector<32x32xf32>
    %98 = vector.extract_strided_slice %0 {offsets = [3, 0], sizes = [1, 32], strides = [1, 1]} : vector<18x128xf32> to vector<1x32xf32>
    %99 = vector.broadcast %98 : vector<1x32xf32> to vector<32x32xf32>
    %100 = arith.addf %97, %99 : vector<32x32xf32>
    %101 = arith.addf %19, %100 : vector<32x32xf32>
    %102 = vector.extract_strided_slice %0 {offsets = [4, 0], sizes = [1, 32], strides = [1, 1]} : vector<18x128xf32> to vector<1x32xf32>
    %103 = vector.extract_strided_slice %0 {offsets = [5, 0], sizes = [1, 32], strides = [1, 1]} : vector<18x128xf32> to vector<1x32xf32>
    %cst_32 = arith.constant dense<0.000000e+00> : vector<32xf32>
    %104 = vector.multi_reduction <add>, %101, %cst_32 [1] : vector<32x32xf32> to vector<32xf32>
    %105 = vector.shape_cast %104 : vector<32xf32> to vector<32x1xf32>
    %cst_33 = arith.constant 3.200000e+01 : f32
    %106 = vector.broadcast %cst_33 : f32 to vector<32x1xf32>
    %107 = arith.divf %105, %106 : vector<32x1xf32>
    %108 = vector.broadcast %107 : vector<32x1xf32> to vector<32x32xf32>
    %109 = arith.subf %101, %108 : vector<32x32xf32>
    %110 = arith.mulf %109, %109 : vector<32x32xf32>
    %cst_34 = arith.constant dense<0.000000e+00> : vector<32xf32>
    %111 = vector.multi_reduction <add>, %110, %cst_34 [1] : vector<32x32xf32> to vector<32xf32>
    %112 = vector.shape_cast %111 : vector<32xf32> to vector<32x1xf32>
    %cst_35 = arith.constant 3.200000e+01 : f32
    %113 = vector.broadcast %cst_35 : f32 to vector<32x1xf32>
    %114 = arith.divf %112, %113 : vector<32x1xf32>
    %115 = vector.broadcast %107 : vector<32x1xf32> to vector<32x32xf32>
    %116 = arith.subf %101, %115 : vector<32x32xf32>
    %cst_36 = arith.constant 9.99999974E-6 : f32
    %117 = vector.broadcast %cst_36 : f32 to vector<32x1xf32>
    %118 = arith.addf %114, %117 : vector<32x1xf32>
    %119 = math.rsqrt %118 : vector<32x1xf32>
    %120 = vector.broadcast %119 : vector<32x1xf32> to vector<32x32xf32>
    %121 = arith.mulf %116, %120 : vector<32x32xf32>
    %122 = vector.broadcast %102 : vector<1x32xf32> to vector<32x32xf32>
    %123 = arith.mulf %121, %122 : vector<32x32xf32>
    %124 = vector.broadcast %103 : vector<1x32xf32> to vector<32x32xf32>
    %125 = arith.addf %123, %124 : vector<32x32xf32>
    %c80 = arith.constant 80 : index
    %c0_37 = arith.constant 0 : index
    %126 = vector.load %arg2[%c80, %c0_37] : memref<368x128xf32, #tpu.memory_space<vmem>>, vector<32x64xf32>
    %cst_38 = arith.constant dense<0.000000e+00> : vector<32x64xf32>
    %127 = tpu.matmul %125, %126, %cst_38 {dimension_numbers = #tpu.dot_dimension_numbers<[1], [0], [0], [1], [0, 0, 1, 1], [], []>} : vector<32x32xf32>, vector<32x64xf32>, vector<32x64xf32> -> vector<32x64xf32>
    %128 = vector.extract_strided_slice %0 {offsets = [6, 0], sizes = [1, 64], strides = [1, 1]} : vector<18x128xf32> to vector<1x64xf32>
    %129 = vector.broadcast %128 : vector<1x64xf32> to vector<32x64xf32>
    %130 = arith.addf %127, %129 : vector<32x64xf32>
    %cst_39 = arith.constant 5.000000e-01 : f32
    %131 = vector.broadcast %cst_39 : f32 to vector<32x64xf32>
    %132 = arith.mulf %131, %130 : vector<32x64xf32>
    %cst_40 = arith.constant 0.707106769 : f32
    %133 = vector.broadcast %cst_40 : f32 to vector<32x64xf32>
    %134 = arith.mulf %130, %133 : vector<32x64xf32>
    %cst_41 = arith.constant 0.000000e+00 : f32
    %135 = vector.broadcast %cst_41 : f32 to vector<32x64xf32>
    %136 = arith.cmpf oge, %134, %135 : vector<32x64xf32>
    %cst_42 = arith.constant 1.000000e+00 : f32
    %cst_43 = arith.constant -1.000000e+00 : f32
    %137 = vector.broadcast %cst_42 : f32 to vector<32x64xf32>
    %138 = vector.broadcast %cst_43 : f32 to vector<32x64xf32>
    %139 = arith.select %136, %137, %138 : vector<32x64xi1>, vector<32x64xf32>
    %140 = math.absf %134 : vector<32x64xf32>
    %cst_44 = arith.constant 0.327591091 : f32
    %141 = vector.broadcast %cst_44 : f32 to vector<32x64xf32>
    %142 = arith.mulf %141, %140 : vector<32x64xf32>
    %cst_45 = arith.constant 1.000000e+00 : f32
    %143 = vector.broadcast %cst_45 : f32 to vector<32x64xf32>
    %144 = arith.addf %143, %142 : vector<32x64xf32>
    %cst_46 = arith.constant 1.000000e+00 : f32
    %145 = vector.broadcast %cst_46 : f32 to vector<32x64xf32>
    %146 = arith.divf %145, %144 : vector<32x64xf32>
    %cst_47 = arith.constant 1.06140542 : f32
    %147 = vector.broadcast %cst_47 : f32 to vector<32x64xf32>
    %148 = arith.mulf %146, %147 : vector<32x64xf32>
    %cst_48 = arith.constant -1.45315206 : f32
    %149 = vector.broadcast %cst_48 : f32 to vector<32x64xf32>
    %150 = arith.addf %149, %148 : vector<32x64xf32>
    %151 = arith.mulf %146, %150 : vector<32x64xf32>
    %cst_49 = arith.constant 1.42141378 : f32
    %152 = vector.broadcast %cst_49 : f32 to vector<32x64xf32>
    %153 = arith.addf %152, %151 : vector<32x64xf32>
    %154 = arith.mulf %146, %153 : vector<32x64xf32>
    %cst_50 = arith.constant -0.284496725 : f32
    %155 = vector.broadcast %cst_50 : f32 to vector<32x64xf32>
    %156 = arith.addf %155, %154 : vector<32x64xf32>
    %157 = arith.mulf %146, %156 : vector<32x64xf32>
    %cst_51 = arith.constant 0.254829586 : f32
    %158 = vector.broadcast %cst_51 : f32 to vector<32x64xf32>
    %159 = arith.addf %158, %157 : vector<32x64xf32>
    %160 = arith.mulf %146, %159 : vector<32x64xf32>
    %cst_52 = arith.constant 0.000000e+00 : f32
    %161 = vector.broadcast %cst_52 : f32 to vector<32x64xf32>
    %162 = arith.subf %161, %140 : vector<32x64xf32>
    %163 = arith.mulf %162, %140 : vector<32x64xf32>
    %164 = math.exp %163 : vector<32x64xf32>
    %165 = arith.mulf %160, %164 : vector<32x64xf32>
    %cst_53 = arith.constant 1.000000e+00 : f32
    %166 = vector.broadcast %cst_53 : f32 to vector<32x64xf32>
    %167 = arith.subf %166, %165 : vector<32x64xf32>
    %168 = arith.mulf %139, %167 : vector<32x64xf32>
    %cst_54 = arith.constant 1.000000e+00 : f32
    %169 = vector.broadcast %cst_54 : f32 to vector<32x64xf32>
    %170 = arith.addf %169, %168 : vector<32x64xf32>
    %171 = arith.mulf %132, %170 : vector<32x64xf32>
    %c112 = arith.constant 112 : index
    %c0_55 = arith.constant 0 : index
    %172 = vector.load %arg2[%c112, %c0_55] : memref<368x128xf32, #tpu.memory_space<vmem>>, vector<64x32xf32>
    %cst_56 = arith.constant dense<0.000000e+00> : vector<32x32xf32>
    %173 = tpu.matmul %171, %172, %cst_56 {dimension_numbers = #tpu.dot_dimension_numbers<[1], [0], [0], [1], [0, 0, 1, 1], [], []>} : vector<32x64xf32>, vector<64x32xf32>, vector<32x32xf32> -> vector<32x32xf32>
    %174 = vector.extract_strided_slice %0 {offsets = [7, 0], sizes = [1, 32], strides = [1, 1]} : vector<18x128xf32> to vector<1x32xf32>
    %175 = vector.broadcast %174 : vector<1x32xf32> to vector<32x32xf32>
    %176 = arith.addf %173, %175 : vector<32x32xf32>
    %177 = arith.addf %125, %176 : vector<32x32xf32>
    %178 = vector.extract_strided_slice %0 {offsets = [8, 0], sizes = [1, 32], strides = [1, 1]} : vector<18x128xf32> to vector<1x32xf32>
    %179 = vector.extract_strided_slice %0 {offsets = [9, 0], sizes = [1, 32], strides = [1, 1]} : vector<18x128xf32> to vector<1x32xf32>
    %cst_57 = arith.constant dense<0.000000e+00> : vector<32xf32>
    %180 = vector.multi_reduction <add>, %177, %cst_57 [1] : vector<32x32xf32> to vector<32xf32>
    %181 = vector.shape_cast %180 : vector<32xf32> to vector<32x1xf32>
    %cst_58 = arith.constant 3.200000e+01 : f32
    %182 = vector.broadcast %cst_58 : f32 to vector<32x1xf32>
    %183 = arith.divf %181, %182 : vector<32x1xf32>
    %184 = vector.broadcast %183 : vector<32x1xf32> to vector<32x32xf32>
    %185 = arith.subf %177, %184 : vector<32x32xf32>
    %186 = arith.mulf %185, %185 : vector<32x32xf32>
    %cst_59 = arith.constant dense<0.000000e+00> : vector<32xf32>
    %187 = vector.multi_reduction <add>, %186, %cst_59 [1] : vector<32x32xf32> to vector<32xf32>
    %188 = vector.shape_cast %187 : vector<32xf32> to vector<32x1xf32>
    %cst_60 = arith.constant 3.200000e+01 : f32
    %189 = vector.broadcast %cst_60 : f32 to vector<32x1xf32>
    %190 = arith.divf %188, %189 : vector<32x1xf32>
    %191 = vector.broadcast %183 : vector<32x1xf32> to vector<32x32xf32>
    %192 = arith.subf %177, %191 : vector<32x32xf32>
    %cst_61 = arith.constant 9.99999974E-6 : f32
    %193 = vector.broadcast %cst_61 : f32 to vector<32x1xf32>
    %194 = arith.addf %190, %193 : vector<32x1xf32>
    %195 = math.rsqrt %194 : vector<32x1xf32>
    %196 = vector.broadcast %195 : vector<32x1xf32> to vector<32x32xf32>
    %197 = arith.mulf %192, %196 : vector<32x32xf32>
    %198 = vector.broadcast %178 : vector<1x32xf32> to vector<32x32xf32>
    %199 = arith.mulf %197, %198 : vector<32x32xf32>
    %200 = vector.broadcast %179 : vector<1x32xf32> to vector<32x32xf32>
    %201 = arith.addf %199, %200 : vector<32x32xf32>
    %c208 = arith.constant 208 : index
    %c0_62 = arith.constant 0 : index
    %202 = vector.load %arg2[%c208, %c0_62] : memref<368x128xf32, #tpu.memory_space<vmem>>, vector<32x64xf32>
    %cst_63 = arith.constant dense<0.000000e+00> : vector<32x64xf32>
    %203 = tpu.matmul %201, %202, %cst_63 {dimension_numbers = #tpu.dot_dimension_numbers<[1], [0], [0], [1], [0, 0, 1, 1], [], []>} : vector<32x32xf32>, vector<32x64xf32>, vector<32x64xf32> -> vector<32x64xf32>
    %204 = vector.extract_strided_slice %0 {offsets = [10, 0], sizes = [1, 64], strides = [1, 1]} : vector<18x128xf32> to vector<1x64xf32>
    %205 = vector.broadcast %204 : vector<1x64xf32> to vector<32x64xf32>
    %206 = arith.addf %203, %205 : vector<32x64xf32>
    %c336 = arith.constant 336 : index
    %c0_64 = arith.constant 0 : index
    %207 = vector.load %arg2[%c336, %c0_64] : memref<368x128xf32, #tpu.memory_space<vmem>>, vector<32x128xf32>
    %cst_65 = arith.constant dense<0.000000e+00> : vector<32x128xf32>
    %208 = tpu.matmul %201, %207, %cst_65 {dimension_numbers = #tpu.dot_dimension_numbers<[1], [0], [0], [1], [0, 0, 1, 1], [], []>} : vector<32x32xf32>, vector<32x128xf32>, vector<32x128xf32> -> vector<32x128xf32>
    %209 = vector.extract_strided_slice %206 {offsets = [0, 0], sizes = [32, 8], strides = [1, 1]} : vector<32x64xf32> to vector<32x8xf32>
    %210 = vector.extract_strided_slice %206 {offsets = [0, 32], sizes = [32, 8], strides = [1, 1]} : vector<32x64xf32> to vector<32x8xf32>
    %211 = vector.extract_strided_slice %208 {offsets = [0, 0], sizes = [32, 32], strides = [1, 1]} : vector<32x128xf32> to vector<32x32xf32>
    %cst_66 = arith.constant dense<0.000000e+00> : vector<32x32xf32>
    %212 = tpu.matmul %209, %210, %cst_66 {dimension_numbers = #tpu.dot_dimension_numbers<[1], [1], [0], [0], [0, 0, 1, 0], [], []>} : vector<32x8xf32>, vector<32x8xf32>, vector<32x32xf32> -> vector<32x32xf32>
    %cst_67 = arith.constant 0.353553385 : f32
    %213 = vector.broadcast %cst_67 : f32 to vector<32x32xf32>
    %214 = arith.mulf %212, %213 : vector<32x32xf32>
    %215 = arith.addf %214, %13 : vector<32x32xf32>
    %cst_68 = arith.constant dense<0xFF800000> : vector<32xf32>
    %216 = vector.multi_reduction <maximumf>, %215, %cst_68 [1] : vector<32x32xf32> to vector<32xf32>
    %217 = vector.shape_cast %216 : vector<32xf32> to vector<32x1xf32>
    %218 = vector.broadcast %217 : vector<32x1xf32> to vector<32x32xf32>
    %219 = arith.subf %215, %218 : vector<32x32xf32>
    %220 = math.exp %219 : vector<32x32xf32>
    %cst_69 = arith.constant dense<0.000000e+00> : vector<32xf32>
    %221 = vector.multi_reduction <add>, %220, %cst_69 [1] : vector<32x32xf32> to vector<32xf32>
    %222 = vector.shape_cast %221 : vector<32xf32> to vector<32x1xf32>
    %223 = vector.broadcast %222 : vector<32x1xf32> to vector<32x32xf32>
    %224 = arith.divf %220, %223 : vector<32x32xf32>
    %cst_70 = arith.constant dense<0.000000e+00> : vector<32x32xf32>
    %225 = tpu.matmul %224, %211, %cst_70 {dimension_numbers = #tpu.dot_dimension_numbers<[1], [0], [0], [1], [0, 0, 1, 1], [], []>} : vector<32x32xf32>, vector<32x32xf32>, vector<32x32xf32> -> vector<32x32xf32>
    %226 = vector.extract_strided_slice %206 {offsets = [0, 8], sizes = [32, 8], strides = [1, 1]} : vector<32x64xf32> to vector<32x8xf32>
    %227 = vector.extract_strided_slice %206 {offsets = [0, 40], sizes = [32, 8], strides = [1, 1]} : vector<32x64xf32> to vector<32x8xf32>
    %228 = vector.extract_strided_slice %208 {offsets = [0, 32], sizes = [32, 32], strides = [1, 1]} : vector<32x128xf32> to vector<32x32xf32>
    %cst_71 = arith.constant dense<0.000000e+00> : vector<32x32xf32>
    %229 = tpu.matmul %226, %227, %cst_71 {dimension_numbers = #tpu.dot_dimension_numbers<[1], [1], [0], [0], [0, 0, 1, 0], [], []>} : vector<32x8xf32>, vector<32x8xf32>, vector<32x32xf32> -> vector<32x32xf32>
    %cst_72 = arith.constant 0.353553385 : f32
    %230 = vector.broadcast %cst_72 : f32 to vector<32x32xf32>
    %231 = arith.mulf %229, %230 : vector<32x32xf32>
    %232 = arith.addf %231, %13 : vector<32x32xf32>
    %cst_73 = arith.constant dense<0xFF800000> : vector<32xf32>
    %233 = vector.multi_reduction <maximumf>, %232, %cst_73 [1] : vector<32x32xf32> to vector<32xf32>
    %234 = vector.shape_cast %233 : vector<32xf32> to vector<32x1xf32>
    %235 = vector.broadcast %234 : vector<32x1xf32> to vector<32x32xf32>
    %236 = arith.subf %232, %235 : vector<32x32xf32>
    %237 = math.exp %236 : vector<32x32xf32>
    %cst_74 = arith.constant dense<0.000000e+00> : vector<32xf32>
    %238 = vector.multi_reduction <add>, %237, %cst_74 [1] : vector<32x32xf32> to vector<32xf32>
    %239 = vector.shape_cast %238 : vector<32xf32> to vector<32x1xf32>
    %240 = vector.broadcast %239 : vector<32x1xf32> to vector<32x32xf32>
    %241 = arith.divf %237, %240 : vector<32x32xf32>
    %cst_75 = arith.constant dense<0.000000e+00> : vector<32x32xf32>
    %242 = tpu.matmul %241, %228, %cst_75 {dimension_numbers = #tpu.dot_dimension_numbers<[1], [0], [0], [1], [0, 0, 1, 1], [], []>} : vector<32x32xf32>, vector<32x32xf32>, vector<32x32xf32> -> vector<32x32xf32>
    %243 = arith.addf %225, %242 : vector<32x32xf32>
    %244 = vector.extract_strided_slice %206 {offsets = [0, 16], sizes = [32, 8], strides = [1, 1]} : vector<32x64xf32> to vector<32x8xf32>
    %245 = vector.extract_strided_slice %206 {offsets = [0, 48], sizes = [32, 8], strides = [1, 1]} : vector<32x64xf32> to vector<32x8xf32>
    %246 = vector.extract_strided_slice %208 {offsets = [0, 64], sizes = [32, 32], strides = [1, 1]} : vector<32x128xf32> to vector<32x32xf32>
    %cst_76 = arith.constant dense<0.000000e+00> : vector<32x32xf32>
    %247 = tpu.matmul %244, %245, %cst_76 {dimension_numbers = #tpu.dot_dimension_numbers<[1], [1], [0], [0], [0, 0, 1, 0], [], []>} : vector<32x8xf32>, vector<32x8xf32>, vector<32x32xf32> -> vector<32x32xf32>
    %cst_77 = arith.constant 0.353553385 : f32
    %248 = vector.broadcast %cst_77 : f32 to vector<32x32xf32>
    %249 = arith.mulf %247, %248 : vector<32x32xf32>
    %250 = arith.addf %249, %13 : vector<32x32xf32>
    %cst_78 = arith.constant dense<0xFF800000> : vector<32xf32>
    %251 = vector.multi_reduction <maximumf>, %250, %cst_78 [1] : vector<32x32xf32> to vector<32xf32>
    %252 = vector.shape_cast %251 : vector<32xf32> to vector<32x1xf32>
    %253 = vector.broadcast %252 : vector<32x1xf32> to vector<32x32xf32>
    %254 = arith.subf %250, %253 : vector<32x32xf32>
    %255 = math.exp %254 : vector<32x32xf32>
    %cst_79 = arith.constant dense<0.000000e+00> : vector<32xf32>
    %256 = vector.multi_reduction <add>, %255, %cst_79 [1] : vector<32x32xf32> to vector<32xf32>
    %257 = vector.shape_cast %256 : vector<32xf32> to vector<32x1xf32>
    %258 = vector.broadcast %257 : vector<32x1xf32> to vector<32x32xf32>
    %259 = arith.divf %255, %258 : vector<32x32xf32>
    %cst_80 = arith.constant dense<0.000000e+00> : vector<32x32xf32>
    %260 = tpu.matmul %259, %246, %cst_80 {dimension_numbers = #tpu.dot_dimension_numbers<[1], [0], [0], [1], [0, 0, 1, 1], [], []>} : vector<32x32xf32>, vector<32x32xf32>, vector<32x32xf32> -> vector<32x32xf32>
    %261 = arith.addf %243, %260 : vector<32x32xf32>
    %262 = vector.extract_strided_slice %206 {offsets = [0, 24], sizes = [32, 8], strides = [1, 1]} : vector<32x64xf32> to vector<32x8xf32>
    %263 = vector.extract_strided_slice %206 {offsets = [0, 56], sizes = [32, 8], strides = [1, 1]} : vector<32x64xf32> to vector<32x8xf32>
    %264 = vector.extract_strided_slice %208 {offsets = [0, 96], sizes = [32, 32], strides = [1, 1]} : vector<32x128xf32> to vector<32x32xf32>
    %cst_81 = arith.constant dense<0.000000e+00> : vector<32x32xf32>
    %265 = tpu.matmul %262, %263, %cst_81 {dimension_numbers = #tpu.dot_dimension_numbers<[1], [1], [0], [0], [0, 0, 1, 0], [], []>} : vector<32x8xf32>, vector<32x8xf32>, vector<32x32xf32> -> vector<32x32xf32>
    %cst_82 = arith.constant 0.353553385 : f32
    %266 = vector.broadcast %cst_82 : f32 to vector<32x32xf32>
    %267 = arith.mulf %265, %266 : vector<32x32xf32>
    %268 = arith.addf %267, %13 : vector<32x32xf32>
    %cst_83 = arith.constant dense<0xFF800000> : vector<32xf32>
    %269 = vector.multi_reduction <maximumf>, %268, %cst_83 [1] : vector<32x32xf32> to vector<32xf32>
    %270 = vector.shape_cast %269 : vector<32xf32> to vector<32x1xf32>
    %271 = vector.broadcast %270 : vector<32x1xf32> to vector<32x32xf32>
    %272 = arith.subf %268, %271 : vector<32x32xf32>
    %273 = math.exp %272 : vector<32x32xf32>
    %cst_84 = arith.constant dense<0.000000e+00> : vector<32xf32>
    %274 = vector.multi_reduction <add>, %273, %cst_84 [1] : vector<32x32xf32> to vector<32xf32>
    %275 = vector.shape_cast %274 : vector<32xf32> to vector<32x1xf32>
    %276 = vector.broadcast %275 : vector<32x1xf32> to vector<32x32xf32>
    %277 = arith.divf %273, %276 : vector<32x32xf32>
    %cst_85 = arith.constant dense<0.000000e+00> : vector<32x32xf32>
    %278 = tpu.matmul %277, %264, %cst_85 {dimension_numbers = #tpu.dot_dimension_numbers<[1], [0], [0], [1], [0, 0, 1, 1], [], []>} : vector<32x32xf32>, vector<32x32xf32>, vector<32x32xf32> -> vector<32x32xf32>
    %279 = arith.addf %261, %278 : vector<32x32xf32>
    %280 = vector.extract_strided_slice %0 {offsets = [11, 0], sizes = [1, 32], strides = [1, 1]} : vector<18x128xf32> to vector<1x32xf32>
    %281 = vector.broadcast %280 : vector<1x32xf32> to vector<32x32xf32>
    %282 = arith.addf %279, %281 : vector<32x32xf32>
    %283 = arith.addf %201, %282 : vector<32x32xf32>
    %284 = vector.extract_strided_slice %0 {offsets = [12, 0], sizes = [1, 32], strides = [1, 1]} : vector<18x128xf32> to vector<1x32xf32>
    %285 = vector.extract_strided_slice %0 {offsets = [13, 0], sizes = [1, 32], strides = [1, 1]} : vector<18x128xf32> to vector<1x32xf32>
    %cst_86 = arith.constant dense<0.000000e+00> : vector<32xf32>
    %286 = vector.multi_reduction <add>, %283, %cst_86 [1] : vector<32x32xf32> to vector<32xf32>
    %287 = vector.shape_cast %286 : vector<32xf32> to vector<32x1xf32>
    %cst_87 = arith.constant 3.200000e+01 : f32
    %288 = vector.broadcast %cst_87 : f32 to vector<32x1xf32>
    %289 = arith.divf %287, %288 : vector<32x1xf32>
    %290 = vector.broadcast %289 : vector<32x1xf32> to vector<32x32xf32>
    %291 = arith.subf %283, %290 : vector<32x32xf32>
    %292 = arith.mulf %291, %291 : vector<32x32xf32>
    %cst_88 = arith.constant dense<0.000000e+00> : vector<32xf32>
    %293 = vector.multi_reduction <add>, %292, %cst_88 [1] : vector<32x32xf32> to vector<32xf32>
    %294 = vector.shape_cast %293 : vector<32xf32> to vector<32x1xf32>
    %cst_89 = arith.constant 3.200000e+01 : f32
    %295 = vector.broadcast %cst_89 : f32 to vector<32x1xf32>
    %296 = arith.divf %294, %295 : vector<32x1xf32>
    %297 = vector.broadcast %289 : vector<32x1xf32> to vector<32x32xf32>
    %298 = arith.subf %283, %297 : vector<32x32xf32>
    %cst_90 = arith.constant 9.99999974E-6 : f32
    %299 = vector.broadcast %cst_90 : f32 to vector<32x1xf32>
    %300 = arith.addf %296, %299 : vector<32x1xf32>
    %301 = math.rsqrt %300 : vector<32x1xf32>
    %302 = vector.broadcast %301 : vector<32x1xf32> to vector<32x32xf32>
    %303 = arith.mulf %298, %302 : vector<32x32xf32>
    %304 = vector.broadcast %284 : vector<1x32xf32> to vector<32x32xf32>
    %305 = arith.mulf %303, %304 : vector<32x32xf32>
    %306 = vector.broadcast %285 : vector<1x32xf32> to vector<32x32xf32>
    %307 = arith.addf %305, %306 : vector<32x32xf32>
    %c240 = arith.constant 240 : index
    %c0_91 = arith.constant 0 : index
    %308 = vector.load %arg2[%c240, %c0_91] : memref<368x128xf32, #tpu.memory_space<vmem>>, vector<32x64xf32>
    %cst_92 = arith.constant dense<0.000000e+00> : vector<32x64xf32>
    %309 = tpu.matmul %307, %308, %cst_92 {dimension_numbers = #tpu.dot_dimension_numbers<[1], [0], [0], [1], [0, 0, 1, 1], [], []>} : vector<32x32xf32>, vector<32x64xf32>, vector<32x64xf32> -> vector<32x64xf32>
    %310 = vector.extract_strided_slice %0 {offsets = [14, 0], sizes = [1, 64], strides = [1, 1]} : vector<18x128xf32> to vector<1x64xf32>
    %311 = vector.broadcast %310 : vector<1x64xf32> to vector<32x64xf32>
    %312 = arith.addf %309, %311 : vector<32x64xf32>
    %cst_93 = arith.constant 5.000000e-01 : f32
    %313 = vector.broadcast %cst_93 : f32 to vector<32x64xf32>
    %314 = arith.mulf %313, %312 : vector<32x64xf32>
    %cst_94 = arith.constant 0.707106769 : f32
    %315 = vector.broadcast %cst_94 : f32 to vector<32x64xf32>
    %316 = arith.mulf %312, %315 : vector<32x64xf32>
    %cst_95 = arith.constant 0.000000e+00 : f32
    %317 = vector.broadcast %cst_95 : f32 to vector<32x64xf32>
    %318 = arith.cmpf oge, %316, %317 : vector<32x64xf32>
    %cst_96 = arith.constant 1.000000e+00 : f32
    %cst_97 = arith.constant -1.000000e+00 : f32
    %319 = vector.broadcast %cst_96 : f32 to vector<32x64xf32>
    %320 = vector.broadcast %cst_97 : f32 to vector<32x64xf32>
    %321 = arith.select %318, %319, %320 : vector<32x64xi1>, vector<32x64xf32>
    %322 = math.absf %316 : vector<32x64xf32>
    %cst_98 = arith.constant 0.327591091 : f32
    %323 = vector.broadcast %cst_98 : f32 to vector<32x64xf32>
    %324 = arith.mulf %323, %322 : vector<32x64xf32>
    %cst_99 = arith.constant 1.000000e+00 : f32
    %325 = vector.broadcast %cst_99 : f32 to vector<32x64xf32>
    %326 = arith.addf %325, %324 : vector<32x64xf32>
    %cst_100 = arith.constant 1.000000e+00 : f32
    %327 = vector.broadcast %cst_100 : f32 to vector<32x64xf32>
    %328 = arith.divf %327, %326 : vector<32x64xf32>
    %cst_101 = arith.constant 1.06140542 : f32
    %329 = vector.broadcast %cst_101 : f32 to vector<32x64xf32>
    %330 = arith.mulf %328, %329 : vector<32x64xf32>
    %cst_102 = arith.constant -1.45315206 : f32
    %331 = vector.broadcast %cst_102 : f32 to vector<32x64xf32>
    %332 = arith.addf %331, %330 : vector<32x64xf32>
    %333 = arith.mulf %328, %332 : vector<32x64xf32>
    %cst_103 = arith.constant 1.42141378 : f32
    %334 = vector.broadcast %cst_103 : f32 to vector<32x64xf32>
    %335 = arith.addf %334, %333 : vector<32x64xf32>
    %336 = arith.mulf %328, %335 : vector<32x64xf32>
    %cst_104 = arith.constant -0.284496725 : f32
    %337 = vector.broadcast %cst_104 : f32 to vector<32x64xf32>
    %338 = arith.addf %337, %336 : vector<32x64xf32>
    %339 = arith.mulf %328, %338 : vector<32x64xf32>
    %cst_105 = arith.constant 0.254829586 : f32
    %340 = vector.broadcast %cst_105 : f32 to vector<32x64xf32>
    %341 = arith.addf %340, %339 : vector<32x64xf32>
    %342 = arith.mulf %328, %341 : vector<32x64xf32>
    %cst_106 = arith.constant 0.000000e+00 : f32
    %343 = vector.broadcast %cst_106 : f32 to vector<32x64xf32>
    %344 = arith.subf %343, %322 : vector<32x64xf32>
    %345 = arith.mulf %344, %322 : vector<32x64xf32>
    %346 = math.exp %345 : vector<32x64xf32>
    %347 = arith.mulf %342, %346 : vector<32x64xf32>
    %cst_107 = arith.constant 1.000000e+00 : f32
    %348 = vector.broadcast %cst_107 : f32 to vector<32x64xf32>
    %349 = arith.subf %348, %347 : vector<32x64xf32>
    %350 = arith.mulf %321, %349 : vector<32x64xf32>
    %cst_108 = arith.constant 1.000000e+00 : f32
    %351 = vector.broadcast %cst_108 : f32 to vector<32x64xf32>
    %352 = arith.addf %351, %350 : vector<32x64xf32>
    %353 = arith.mulf %314, %352 : vector<32x64xf32>
    %c272 = arith.constant 272 : index
    %c0_109 = arith.constant 0 : index
    %354 = vector.load %arg2[%c272, %c0_109] : memref<368x128xf32, #tpu.memory_space<vmem>>, vector<64x32xf32>
    %cst_110 = arith.constant dense<0.000000e+00> : vector<32x32xf32>
    %355 = tpu.matmul %353, %354, %cst_110 {dimension_numbers = #tpu.dot_dimension_numbers<[1], [0], [0], [1], [0, 0, 1, 1], [], []>} : vector<32x64xf32>, vector<64x32xf32>, vector<32x32xf32> -> vector<32x32xf32>
    %356 = vector.extract_strided_slice %0 {offsets = [15, 0], sizes = [1, 32], strides = [1, 1]} : vector<18x128xf32> to vector<1x32xf32>
    %357 = vector.broadcast %356 : vector<1x32xf32> to vector<32x32xf32>
    %358 = arith.addf %355, %357 : vector<32x32xf32>
    %359 = arith.addf %307, %358 : vector<32x32xf32>
    %360 = vector.extract_strided_slice %0 {offsets = [16, 0], sizes = [1, 32], strides = [1, 1]} : vector<18x128xf32> to vector<1x32xf32>
    %361 = vector.extract_strided_slice %0 {offsets = [17, 0], sizes = [1, 32], strides = [1, 1]} : vector<18x128xf32> to vector<1x32xf32>
    %cst_111 = arith.constant dense<0.000000e+00> : vector<32xf32>
    %362 = vector.multi_reduction <add>, %359, %cst_111 [1] : vector<32x32xf32> to vector<32xf32>
    %363 = vector.shape_cast %362 : vector<32xf32> to vector<32x1xf32>
    %cst_112 = arith.constant 3.200000e+01 : f32
    %364 = vector.broadcast %cst_112 : f32 to vector<32x1xf32>
    %365 = arith.divf %363, %364 : vector<32x1xf32>
    %366 = vector.broadcast %365 : vector<32x1xf32> to vector<32x32xf32>
    %367 = arith.subf %359, %366 : vector<32x32xf32>
    %368 = arith.mulf %367, %367 : vector<32x32xf32>
    %cst_113 = arith.constant dense<0.000000e+00> : vector<32xf32>
    %369 = vector.multi_reduction <add>, %368, %cst_113 [1] : vector<32x32xf32> to vector<32xf32>
    %370 = vector.shape_cast %369 : vector<32xf32> to vector<32x1xf32>
    %cst_114 = arith.constant 3.200000e+01 : f32
    %371 = vector.broadcast %cst_114 : f32 to vector<32x1xf32>
    %372 = arith.divf %370, %371 : vector<32x1xf32>
    %373 = vector.broadcast %365 : vector<32x1xf32> to vector<32x32xf32>
    %374 = arith.subf %359, %373 : vector<32x32xf32>
    %cst_115 = arith.constant 9.99999974E-6 : f32
    %375 = vector.broadcast %cst_115 : f32 to vector<32x1xf32>
    %376 = arith.addf %372, %375 : vector<32x1xf32>
    %377 = math.rsqrt %376 : vector<32x1xf32>
    %378 = vector.broadcast %377 : vector<32x1xf32> to vector<32x32xf32>
    %379 = arith.mulf %374, %378 : vector<32x32xf32>
    %380 = vector.broadcast %360 : vector<1x32xf32> to vector<32x32xf32>
    %381 = arith.mulf %379, %380 : vector<32x32xf32>
    %382 = vector.broadcast %361 : vector<1x32xf32> to vector<32x32xf32>
    %383 = arith.addf %381, %382 : vector<32x32xf32>
    %c16 = arith.constant 16 : index
    %c0_116 = arith.constant 0 : index
    %384 = vector.load %arg2[%c16, %c0_116] : memref<368x128xf32, #tpu.memory_space<vmem>>, vector<32x32xf32>
    %cst_117 = arith.constant dense<0.000000e+00> : vector<32x32xf32>
    %385 = tpu.matmul %383, %384, %cst_117 {dimension_numbers = #tpu.dot_dimension_numbers<[1], [0], [0], [1], [0, 0, 1, 1], [], []>} : vector<32x32xf32>, vector<32x32xf32>, vector<32x32xf32> -> vector<32x32xf32>
    %386 = vector.extract_strided_slice %0 {offsets = [1, 0], sizes = [1, 32], strides = [1, 1]} : vector<18x128xf32> to vector<1x32xf32>
    %387 = vector.broadcast %386 : vector<1x32xf32> to vector<32x32xf32>
    %388 = arith.addf %385, %387 : vector<32x32xf32>
    %c0_118 = arith.constant 0 : index
    %c0_119 = arith.constant 0 : index
    %389 = vector.load %arg4[%c0_118, %c0_119] : memref<32x32xf32, #tpu.memory_space<vmem>>, vector<32x32xf32>
    tpu.vector_store %arg4[%c0_118, %c0_119], %388 {strides = array<i32>} : memref<32x32xf32, #tpu.memory_space<vmem>>, vector<32x32xf32>,
    return
  }
  func.func @transform_0(%arg0: i32) -> (i32, i32) {
    %c0_i32 = arith.constant 0 : i32
    %c0_i32_0 = arith.constant 0 : i32
    %c0_i32_1 = arith.constant 0 : i32
    return %c0_i32, %c0_i32_0 : i32, i32
  }
  func.func @transform_1(%arg0: i32) -> (i32, i32) {
    %c0_i32 = arith.constant 0 : i32
    %c0_i32_0 = arith.constant 0 : i32
    %c0_i32_1 = arith.constant 0 : i32
    return %c0_i32, %c0_i32_0 : i32, i32
  }
  func.func @transform_2(%arg0: i32) -> (i32, i32) {
    %c0_i32 = arith.constant 0 : i32
    %c0_i32_0 = arith.constant 0 : i32
    %c0_i32_1 = arith.constant 0 : i32
    return %c0_i32, %c0_i32_0 : i32, i32
  }
  func.func @transform_3(%arg0: i32) -> (i32, i32) {
    %c0_i32 = arith.constant 0 : i32
    %c0_i32_0 = arith.constant 0 : i32
    %c0_i32_1 = arith.constant 0 : i32
    return %c0_i32, %c0_i32_0 : i32, i32
  }
}

</mosaic_0001>

<bundles_post_ra>
// kernel: _forward_pair.1
= control target key start
LH: loop header
LB: loop body
LE: loop exit
PB: predicated region body
PF: predicated region fallthrough
CT: control target
= control target key end

     0   :  { %8 = vsyncpa [#allocation3], 0  ;;  %s3429_s15 = smov [#allocation2]   ;;  %s3430_s17 = smov 128   ;;  %s4621_s0 = inlined_call_operand.vmem [shape: f32[32,16], index: 0, kind: input, shape index: {}]   ;;  %s4622_s1 = inlined_call_operand.hbm [shape: f32[368,128], index: 1, kind: input, shape index: {}]   ;;  %s4623_s2 = inlined_call_operand.vmem [shape: f32[18,128], index: 2, kind: input, shape index: {}]   ;;  %s4624_s3 = inlined_call_operand.vmem [shape: f32[32,32], index: 3, kind: output, shape index: {}]  }
   0x1   :  { %s15_s14 = sshll.u32 %s4622_s1, 4  ;;  %s17_s16 = sshll.u32 %s3429_s15, 4  ;;  %s16_s14 = int_to_ptr.hbm [resolvable:$true] %s15_s14  ;;  %s18_s16 = int_to_ptr.vmem [resolvable:$true] %s17_s16 }
   0x2   :  { %s3431_s18 = smov 8  }
   0x3   :  { %23 = dma.hbm_to_vmem [thread:$0]  %s16_s14, 5888, %s18_s16, [#allocation3], %s3430_s17, %s3430_s17, %s3431_s18  }
   0x4   :  { %3427 = dma.done.wait [#allocation3], 5888  }
   0x5   :  { %3428 = vsyncadd [#allocation3], 4294961408  ;;  %v56_v0 = vld [vmem:[#allocation2 + $0x8] sm:$0xff]  ;;  %v55_v1 = vld [vmem:[#allocation2] sm:$0xff]  ;;  %vm58_vm0 = vcmask 130048   ;;  %vm105_vm1 = vcmask 261120  }
   0x6   :  { %85 = vmatpush.msra.mxu0 %v56_v0  ;;  %v51_v2 = vld [vmem:[%s4621_s0] sm:$0xff]  ;;  %3125 = vmatpush.msra.mxu3 %v56_v0  ;;  %v53_v3 = vld [vmem:[%s4621_s0 + $0x10] sm:$0xff]  ;;  %v103_v4 = vld [vmem:[#allocation2 + $0x48] sm:$0xff]  ;;  %s3433_s28 = smov 88   ;;  %s3434_s29 = smov 96   ;;  %vm192_vm2 = vcmask 64512   ;;  %v33_v0 = vlaneseq }
   0x7   :  { %v150_v5 = vld [vmem:[#allocation2 + $0xc8] sm:$0xff]  ;;  %v102_v6 = vld [vmem:[#allocation2 + $0x40] sm:$0xff]  ;;  %130 = vmatpush.msra.mxu1 %v103_v4  ;;  %v54_v9 = vld [vmem:[%s4621_s0 + $0x18] sm:$0xff]  ;;  %s3435_s30 = smov 80   ;;  %s3436_s4 = smov 72  }
   0x8   :  { %86 = vmatpush.msra.mxu0 %v55_v1  ;;  %3126 = vmatpush.msra.mxu3 %v55_v1  ;;  %v149_v7 = vld [vmem:[#allocation2 + $0xc0] sm:$0xff]  ;;  %v52_v8 = vld [vmem:[%s4621_s0 + $0x8] sm:$0xff]  ;;  %v101_v10 = vld [vmem:[#allocation2 + $0x38] sm:$0xff]  ;;  %s3432_s0 = smov 120   ;;  %s3437_s5 = smov 112   ;;  %v34_v1 = vand.u32 127, %v33_v0 }
   0x9   :  { %2989 = vmatmul.msk.f32.vlgmr.msra.gmra.mxu0 %vm58_vm0, %v51_v2  ;;  %2991 = vmatmul.msk.f32.vlgmr.msra.gmra.mxu3 %vm58_vm0, %v53_v3  ;;  %v148_v11 = vld [vmem:[#allocation2 + $0xb8] sm:$0xff]  ;;  %v100_v12 = vld [vmem:[#allocation2 + $0x30] sm:$0xff]  ;;  %v30_v14 = vld [vmem:[%s4623_s2] sm:$0xff]  ;;  %s3438_s6 = smov 104   ;;  %v3439_v2 = vmov -1e+30  }
   0xa   :  { %163 = vmatpush.msra.mxu2 %v150_v5  ;;  %131 = vmatpush.msra.mxu1 %v102_v6  ;;  %v147_v13 = vld [vmem:[#allocation2 + $0xb0] sm:$0xff]  ;;  %v57_v15 = vperm.slane %v30_v14, 0  ;;  %v104_v24 = vperm.slane %v30_v14, 2  ;;  %vm38_vm3 = vcmp.ge.s32.totalorder %v34_v1, 24  ;;  %vm42_vm4 = vcmp.lt.s32.totalorder %v34_v1, 32  ;;  %s3440_s7 = smov 64  }
   0xb   :  { %vm46_vm5 = vmand %vm38_vm3, %vm42_vm4  ;;  %vm39_vm6 = vcmp.lt.s32.totalorder %v34_v1, 8  ;;  %vm36_vm7 = vcmp.ge.s32.totalorder %v34_v1, 8  ;;  %vm40_vm8 = vcmp.lt.s32.totalorder %v34_v1, 16  ;;  %vm37_vm10 = vcmp.ge.s32.totalorder %v34_v1, 16  ;;  %s3441_s8 = smov 32  }
   0xc   :  { %164 = vmatpush.msra.mxu2 %v149_v7  ;;  %132 = vmatpush.msra.mxu1 %v101_v10  ;;  %v3603_v3 = vsel %vm46_vm5, 0.0, %v3439_v2  ;;  %v3605_v6 = vsel %vm39_vm6, 0.0, %v3439_v2  ;;  %vm44_vm9 = vmand %vm36_vm7, %vm40_vm8  ;;  %vm41_vm11 = vcmp.lt.s32.totalorder %v34_v1, 24 }
   0xd   :  { %vm45_vm12 = vmand %vm37_vm10, %vm41_vm11 }
   0xe   :  { %165 = vmatpush.msra.mxu2 %v148_v11  ;;  %133 = vmatpush.msra.mxu1 %v100_v12  ;;  %v3609_v12 = vsel %vm44_vm9, 0.0, %v3439_v2 }
  0x10   :  { %166 = vmatpush.msra.mxu2 %v147_v13 }
  0x11   :  { %2990 = vmatmul.msk.f32.gmra.mxu0 %vm58_vm0, %v52_v8  ;;  %2992 = vmatmul.msk.f32.gmra.mxu3 %vm58_vm0, %v54_v9 }
  0x86   :  { %v88_v16 = vpop.f32.mrf.mxu0 }
  0x87   :  { %v3486_v17 = vadd.f32 %v88_v16, %v57_v15 }
  0x89   :  { %2993 = vmatmul.msk.f32.vlgmr.msra.gmra.mxu1 %vm105_vm1, %v3486_v17  ;;  %2997 = vmatmul.msk.f32.vlgmr.msra.gmra.mxu2 %vm105_vm1, %v3486_v17 }
  0x8c   :  { %v94_v20 = vpop.f32.mrf.mxu3 }
  0x8d   :  { %v3498_v21 = vadd.f32 %v94_v20, %v57_v15  ;;  %v3613_v20 = vsel %vm45_vm12, 0.0, %v3439_v2 }
  0x8e   :  { %v91_v18 = vpop.f32.mrf.mxu0 }
  0x8f   :  { %v3492_v19 = vadd.f32 %v91_v18, %v57_v15 }
  0x91   :  { %2994 = vmatmul.msk.f32.gmra.mxu1 %vm105_vm1, %v3492_v19  ;;  %2998 = vmatmul.msk.f32.gmra.mxu2 %vm105_vm1, %v3492_v19 }
  0x94   :  { %v97_v22 = vpop.f32.mrf.mxu3 }
  0x95   :  { %v3504_v23 = vadd.f32 %v97_v22, %v57_v15 }
  0x99   :  { %2995 = vmatmul.msk.f32.gmra.mxu1 %vm105_vm1, %v3498_v21  ;;  %2999 = vmatmul.msk.f32.gmra.mxu2 %vm105_vm1, %v3498_v21 }
  0xa1   :  { %2996 = vmatmul.msk.f32.gmra.mxu1 %vm105_vm1, %v3504_v23  ;;  %3000 = vmatmul.msk.f32.gmra.mxu2 %vm105_vm1, %v3504_v23 }
 0x106   :  { %v135_v25 = vpop.f32.mrf.mxu1 }
 0x107   :  { %v3510_v26 = vadd.f32 %v135_v25, %v104_v24 }
 0x109   :  { %342 = vrot.lane.b32.xlu2 %v3510_v26, %s3432_s0 }
 0x10c   :  { %v3532_v33 = vpop.f32.mrf.mxu2 }
 0x10e   :  { %v138_v27 = vpop.f32.mrf.mxu1 }
 0x10f   :  { %v3514_v28 = vadd.f32 %v138_v27, %v104_v24 }
 0x111   :  { %352 = vrot.lane.b32.xlu1 %v3514_v28, %s3433_s28  ;;  %344 = vrot.lane.b32.xlu2 %v3514_v28, %s3432_s0 }
 0x114   :  { %v3542_v34 = vpop.f32.mrf.mxu2 }
 0x115   :  { %v3546_v35 = vpack.i.bf16 %v3532_v33, %v3542_v34 }
 0x116   :  { %v141_v29 = vpop.f32.mrf.mxu1 }
 0x117   :  { %v3520_v30 = vadd.f32 %v141_v29, %v104_v24 }
 0x119   :  { %188 = vrot.lane.b32.xlu2 %v3520_v30, %s3434_s29  ;;  %350 = vrot.lane.b32.xlu1 %v3510_v26, %s3433_s28 }
 0x11c   :  { %v174_v36 = vpop.f32.mrf.mxu2 }
 0x11e   :  { %v144_v31 = vpop.f32.mrf.mxu1 }
 0x11f   :  { %v3526_v32 = vadd.f32 %v144_v31, %v104_v24 }
 0x121   :  { %356 = vrot.lane.b32.xlu0 %v3526_v32, %s3433_s28  ;;  %346 = vrot.lane.b32.xlu2 %v3520_v30, %s3432_s0 }
 0x122   :  { %619 = vrot.lane.b32.xlu1 %v3526_v32, %s3435_s30 }
 0x124   :  { %v177_v37 = vpop.f32.mrf.mxu2 }
 0x125   :  { %v3560_v38 = vpack.i.bf16 %v174_v36, %v177_v37 }
 0x129   :  { %354 = vrot.lane.b32.xlu0 %v3520_v30, %s3433_s28  ;;  %186 = vrot.lane.b32.xlu2 %v3514_v28, %s3434_s29 }
 0x12a   :  { %837 = vrot.lane.b32.xlu1 %v3514_v28, %s3436_s4 }
 0x131   :  { %3147 = vrot.lane.b32.xlu0 %v3546_v35, %s3434_s29  ;;  %190 = vrot.lane.b32.xlu2 %v3526_v32, %s3434_s29 }
 0x139   :  { %839 = vrot.lane.b32.xlu0 %v3520_v30, %s3436_s4  ;;  %184 = vrot.lane.b32.xlu2 %v3510_v26, %s3434_s29 }
 0x141   :  { %348 = vrot.lane.b32.xlu2 %v3526_v32, %s3432_s0 }
 0x149   :  { %841 = vrot.lane.b32.xlu2 %v3526_v32, %s3436_s4 }
 0x151   :  { %3152 = vrot.lane.b32.xlu2 %v3560_v38, %s3434_s29 }
 0x159   :  { %617 = vrot.lane.b32.xlu2 %v3520_v30, %s3435_s30 }
 0x161   :  { %615 = vrot.lane.b32.xlu2 %v3514_v28, %s3435_s30 }
 0x163   :  { %v343_v39 = vpop.permute.xlu2 %342 }
 0x169   :  { %835 = vrot.lane.b32.xlu2 %v3510_v26, %s3436_s4 }
 0x16b   :  { %v345_v40 = vpop.permute.xlu2 %344 }
 0x171   :  { %607 = vrot.lane.b32.xlu2 %v3514_v28, %s3437_s5 }
 0x173   :  { %v189_v41 = vpop.permute.xlu2 %188 }
 0x179   :  { %831 = vrot.lane.b32.xlu2 %v3520_v30, %s3438_s6 }
 0x17b   :  { %v347_v42 = vpop.permute.xlu2 %346 }
 0x183   :  { %v187_v43 = vpop.permute.xlu2 %186  ;;  %v353_v44 = vpop.permute.xlu1 %352 }
 0x18b   :  { %v191_v45 = vpop.permute.xlu2 %190  ;;  %v351_v46 = vpop.permute.xlu1 %350 }
 0x18c   :  { %3001 = vmatpush.xpose.msk.msrb.mxu3 %vm192_vm2, %v191_v45 }
 0x190   :  { %3002 = vmatpush.xpose.msk.msrb.mxu3 %vm192_vm2, %v189_v41 }
 0x193   :  { %v357_v47 = vpop.permute.xlu0 %356  ;;  %v185_v48 = vpop.permute.xlu2 %184 }
 0x194   :  { %3003 = vmatpush.xpose.msk.msrb.mxu3 %vm192_vm2, %v187_v43  ;;  %3009 = vmatpush.xpose.msk.msrb.mxu0 %vm192_vm2, %v357_v47  ;;  %v620_v49 = vpop.permute.xlu1 %619 }
 0x198   :  { %3004 = vmatpush.xpose.msk.msrb.mxu3 %vm192_vm2, %v185_v48 }
 0x19b   :  { %v355_v50 = vpop.permute.xlu0 %354  ;;  %3005 = vmatmul.msk.f32.vlgmr.msrb.gmra.mxu3 %vm192_vm2, %v3510_v26  ;;  %v349_v51 = vpop.permute.xlu2 %348 }
 0x19c   :  { %3025 = vmatpush.xpose.msk.msra.mxu3 %vm192_vm2, %v620_v49  ;;  %3010 = vmatpush.xpose.msk.msrb.mxu0 %vm192_vm2, %v355_v50  ;;  %v838_v62 = vpop.permute.xlu1 %837 }
 0x1a0   :  { %3011 = vmatpush.xpose.msk.msrb.mxu0 %vm192_vm2, %v353_v44 }
 0x1a3   :  { %3006 = vmatmul.msk.f32.gmra.mxu3 %vm192_vm2, %v3514_v28  ;;  %v842_v52 = vpop.permute.xlu2 %841  ;;  %v3148_v55 = vpop.permute.xlu0 %3147 }
 0x1a4   :  { %3012 = vmatpush.xpose.msk.msrb.mxu0 %vm192_vm2, %v351_v46  ;;  %v3149_v57 = vunpack.i.l.bf16 %v3148_v55  ;;  %v3150_v58 = vunpack.i.h.bf16 %v3148_v55 }
 0x1a7   :  { %3013 = vmatmul.msk.f32.vlgmr.msrb.gmra.mxu0 %vm192_vm2, %v343_v39 }
 0x1ab   :  { %3007 = vmatmul.msk.f32.gmra.mxu3 %vm192_vm2, %v3520_v30  ;;  %v3153_v53 = vpop.permute.xlu2 %3152  ;;  %v840_v60 = vpop.permute.xlu0 %839 }
 0x1ac   :  { %v3154_v54 = vunpack.i.l.bf16 %v3153_v53  ;;  %v3155_v56 = vunpack.i.h.bf16 %v3153_v53 }
 0x1ae   :  { %547 = vmatpush.msrb.mxu1 %v3154_v54  ;;  %3127 = vmatpush.msrb.mxu2 %v3154_v54 }
 0x1af   :  { %3014 = vmatmul.msk.f32.gmra.mxu0 %vm192_vm2, %v345_v40 }
 0x1b0   :  { %548 = vmatpush.msrb.mxu1 %v3155_v56  ;;  %3128 = vmatpush.msrb.mxu2 %v3155_v56 }
 0x1b2   :  { %549 = vmatpush.msrb.mxu1 %v3149_v57  ;;  %3129 = vmatpush.msrb.mxu2 %v3149_v57 }
 0x1b3   :  { %3008 = vmatmul.msk.f32.gmra.mxu3 %vm192_vm2, %v3526_v32  ;;  %v618_v59 = vpop.permute.xlu2 %617 }
 0x1b4   :  { %550 = vmatpush.msrb.mxu1 %v3150_v58  ;;  %3130 = vmatpush.msrb.mxu2 %v3150_v58 }
 0x1b5   :  { %3026 = vmatpush.xpose.msk.msra.mxu3 %vm192_vm2, %v618_v59 }
 0x1b6   :  { %588 = vmatpush.msra.mxu2 %v177_v37  ;;  %3037 = vmatpush.xpose.msk.msra.mxu1 %vm192_vm2, %v842_v52 }
 0x1b7   :  { %3015 = vmatmul.msk.f32.gmra.mxu0 %vm192_vm2, %v347_v42 }
 0x1b8   :  { %589 = vmatpush.msra.mxu2 %v174_v36 }
 0x1ba   :  { %590 = vmatpush.msra.mxu2 %v3542_v34  ;;  %3038 = vmatpush.xpose.msk.msra.mxu1 %vm192_vm2, %v840_v60 }
 0x1bb   :  { %v616_v61 = vpop.permute.xlu2 %615 }
 0x1bc   :  { %591 = vmatpush.msra.mxu2 %v3532_v33  ;;  %3027 = vmatpush.xpose.msk.msra.mxu3 %vm192_vm2, %v616_v61 }
 0x1be   :  { %3039 = vmatpush.xpose.msk.msra.mxu1 %vm192_vm2, %v838_v62 }
 0x1bf   :  { %3016 = vmatmul.msk.f32.gmra.mxu0 %vm192_vm2, %v349_v51 }
 0x1c3   :  { %v836_v63 = vpop.permute.xlu2 %835 }
 0x1c4   :  { %3040 = vmatpush.xpose.msk.msra.mxu1 %vm192_vm2, %v836_v63 }
 0x1cb   :  { %v608_v46 = vpop.permute.xlu2 %607 }
 0x21e   :  { %v226_v9 = vpop.f32.mrf.mxu3 }
 0x21f   :  { %v238_v48 = vmul.f32 0.35355338, %v226_v9 }
 0x221   :  { %v3648_v49 = vadd.f32 %v238_v48, %v3605_v6 }
 0x223   :  { %v246_v52 = vsel %vm105_vm1, %v3648_v49, -inf }
 0x224   :  { %v391_v4 = vpop.f32.mrf.mxu0 }
 0x225   :  { %v403_v5 = vmul.f32 0.35355338, %v391_v4 }
 0x226   :  { %v229_v18 = vpop.f32.mrf.mxu3 }
 0x227   :  { %v407_v7 = vadd.f32 %v403_v5, %v3605_v6  ;;  %v239_v24 = vmul.f32 0.35355338, %v229_v18 }
 0x229   :  { %v411_v8 = vsel %vm105_vm1, %v407_v7, -inf  ;;  %v3621_v27 = vadd.f32 %v239_v24, %v3609_v12 }
 0x22a   :  { %412 = vmax.xlane.f32.xlu0 %v411_v8 }
 0x22b   :  { %v249_v29 = vsel %vm105_vm1, %v3621_v27, -inf }
 0x22c   :  { %v394_v10 = vpop.f32.mrf.mxu0 }
 0x22d   :  { %v404_v11 = vmul.f32 0.35355338, %v394_v10 }
 0x22e   :  { %v232_v47 = vpop.f32.mrf.mxu3 }
 0x22f   :  { %v408_v13 = vadd.f32 %v404_v11, %v3609_v12 }
 0x231   :  { %v414_v14 = vsel %vm105_vm1, %v408_v13, -inf }
 0x232   :  { %415 = vmax.xlane.f32.xlu1 %v414_v14 }
 0x234   :  { %v397_v15 = vpop.f32.mrf.mxu0 }
 0x235   :  { %v405_v16 = vmul.f32 0.35355338, %v397_v15 }
 0x236   :  { %v235_v50 = vpop.f32.mrf.mxu3 }
 0x237   :  { %v3616_v22 = vadd.f32 %v405_v16, %v3613_v20 }
 0x239   :  { %v417_v25 = vsel %vm105_vm1, %v3616_v22, -inf }
 0x23a   :  { %418 = vmax.xlane.f32.xlu2 %v417_v25 }
 0x23e   :  { %613 = vrot.lane.b32.xlu0 %v3510_v26, %s3435_s30 }
 0x242   :  { %250 = vmax.xlane.f32.xlu2 %v249_v29 }
 0x24b   :  { %605 = vrot.lane.b32.xlu1 %v3510_v26, %s3437_s5 }
 0x29d   :  { %v413_v31 = vpop.xlane.xlu0 %412 }
 0x29e   :  { %v423_v33 = vsub.f32 %v407_v7, %v413_v31 }
 0x2a0   :  { %v427_v34 = vmul.f32 1.442695, %v423_v33 }
 0x2a2   :  { %3206 = vpow2.f32 %v427_v34 }
 0x2a5   :  { %v416_v36 = vpop.xlane.xlu1 %415 }
 0x2a6   :  { %v424_v37 = vsub.f32 %v408_v13, %v416_v36 }
 0x2a8   :  { %v3207_v39 = vpop.eup %3206  ;;  %v429_v40 = vmul.f32 1.442695, %v424_v37 }
 0x2a9   :  { %v435_v41 = vsel %vm105_vm1, %v3207_v39, 0.0 }
 0x2aa   :  { %3208 = vpow2.f32 %v429_v40  ;;  %436 = vadd.xlane.f32.xlu0 %v435_v41 }
 0x2b0   :  { %v3630_v42 = vpop.eup %3208  ;;  %v614_v43 = vpop.permute.xlu0 %613 }
 0x2b1   :  { %3028 = vmatpush.xpose.msk.msra.mxu3 %vm192_vm2, %v614_v43  ;;  %v438_v44 = vsel %vm105_vm1, %v3630_v42, 0.0 }
 0x2b2   :  { %439 = vadd.xlane.f32.xlu1 %v438_v44 }
 0x2bd   :  { %v606_v45 = vpop.permute.xlu1 %605 }
 0x2be   :  { %827 = vrot.lane.b32.xlu0 %v3510_v26, %s3438_s6  ;;  %3029 = vmatmul.msk.f32.vlgmr.msra.gmra.mxu3 %vm192_vm2, %v606_v45  ;;  %v400_v26 = vpop.f32.mrf.mxu0 }
 0x2bf   :  { %v406_v51 = vmul.f32 0.35355338, %v400_v26 }
 0x2c6   :  { %609 = vrot.lane.b32.xlu0 %v3520_v30, %s3437_s5  ;;  %3030 = vmatmul.msk.f32.gmra.mxu3 %vm192_vm2, %v608_v46  ;;  %v241_v30 = vmul.f32 0.35355338, %v235_v50  ;;  %v832_v46 = vpop.permute.xlu2 %831 }
 0x2c8   :  { %v3656_v53 = vadd.f32 %v241_v30, %v3603_v3 }
 0x2ca   :  { %v255_v55 = vsel %vm105_vm1, %v3656_v53, -inf }
 0x2cb   :  { %829 = vrot.lane.b32.xlu1 %v3514_v28, %s3438_s6  ;;  %v3653_v28 = vadd.f32 %v406_v51, %v3603_v3 }
 0x2cd   :  { %v420_v54 = vsel %vm105_vm1, %v3653_v28, -inf }
 0x2ce   :  { %833 = vrot.lane.b32.xlu0 %v3526_v32, %s3438_s6  ;;  %v419_v48 = vpop.xlane.xlu2 %418 }
 0x2d3   :  { %611 = vrot.lane.b32.xlu1 %v3526_v32, %s3437_s5  ;;  %v240_v32 = vmul.f32 0.35355338, %v232_v47 }
 0x2d5   :  { %v3663_v56 = vadd.f32 %v240_v32, %v3613_v20 }
 0x2d6   :  { %v251_v26 = vpop.xlane.xlu2 %250 }
 0x2d7   :  { %v252_v57 = vsel %vm105_vm1, %v3663_v56, -inf  ;;  %v259_v30 = vsub.f32 %v3621_v27, %v251_v26 }
 0x2f8   :  { %247 = vmax.xlane.f32.xlu0 %v246_v52 }
 0x2fd   :  { %421 = vmax.xlane.f32.xlu1 %v420_v54  ;;  %v264_v54 = vmul.f32 1.442695, %v259_v30 }
 0x300   :  { %256 = vmax.xlane.f32.xlu0 %v255_v55 }
 0x305   :  { %253 = vmax.xlane.f32.xlu1 %v252_v57  ;;  %v425_v57 = vsub.f32 %v3616_v22, %v419_v48 }
 0x31d   :  { %v437_v58 = vpop.xlane.xlu0 %436 }
 0x31e   :  { %3210 = vrcp.f32 %v437_v58  ;;  %v458_v63 = vand.u32 2147483648, %v437_v58  ;;  %v456_v1 = vand.u32 2147483647, %v437_v58  ;;  %vm452_vm14 = vweird.f32 %v437_v58 }
 0x320   :  { %v459_v5 = vor.u32 1.1754944e-38, %v458_v63  ;;  %vm457_vm0 = vcmp.eq.f32.partialorder %v456_v1, 8.507059e+37 }
 0x324   :  { %v3211_v59 = vpop.eup %3210 }
 0x325   :  { %v448_v60 = vmul.f32 %v3211_v59, %v437_v58  ;;  %v440_v61 = vpop.xlane.xlu1 %439  ;;  %vm453_vm13 = vweird.f32 %v3211_v59 }
 0x326   :  { %3212 = vrcp.f32 %v440_v61  ;;  %vm454_vm15 = vmor %vm452_vm14, %vm453_vm13  ;;  %v473_v13 = vand.u32 2147483648, %v440_v61  ;;  %v471_v16 = vand.u32 2147483647, %v440_v61  ;;  %vm467_vm4 = vweird.f32 %v440_v61 }
 0x327   :  { %v449_v62 = vsub.f32 1.0, %v448_v60 }
 0x328   :  { %v474_v24 = vor.u32 1.1754944e-38, %v473_v13  ;;  %vm472_vm6 = vcmp.eq.f32.partialorder %v471_v16, 8.507059e+37 }
 0x329   :  { %v450_v0 = vmul.f32 %v3211_v59, %v449_v62 }
 0x32b   :  { %v451_v2 = vadd.f32 %v3211_v59, %v450_v0 }
 0x32c   :  { %v3213_v4 = vpop.eup %3212 }
 0x32d   :  { %v463_v7 = vmul.f32 %v3213_v4, %v440_v61  ;;  %v455_v8 = vsel %vm454_vm15, %v3211_v59, %v451_v2  ;;  %vm468_vm3 = vweird.f32 %v3213_v4  ;;  %v431_v61 = vmul.f32 1.442695, %v425_v57 }
 0x32e   :  { %v460_v9 = vsel %vm457_vm0, %v459_v5, %v455_v8  ;;  %vm469_vm5 = vmor %vm467_vm4, %vm468_vm3 }
 0x32f   :  { %v464_v10 = vsub.f32 1.0, %v463_v7  ;;  %v461_v11 = vmul.f32 %v3207_v39, %v460_v9 }
 0x330   :  { %v828_v14 = vpop.permute.xlu0 %827 }
 0x331   :  { %v465_v15 = vmul.f32 %v3213_v4, %v464_v10  ;;  %3017 = vmatmul.msk.f32.vlgmr.msrb.gmra.mxu1 %vm105_vm1, %v461_v11 }
 0x333   :  { %v466_v18 = vadd.f32 %v3213_v4, %v465_v15 }
 0x335   :  { %v470_v25 = vsel %vm469_vm5, %v3213_v4, %v466_v18 }
 0x336   :  { %v475_v29 = vsel %vm472_vm6, %v474_v24, %v470_v25 }
 0x337   :  { %v476_v31 = vmul.f32 %v3630_v42, %v475_v29 }
 0x338   :  { %v610_v33 = vpop.permute.xlu0 %609 }
 0x339   :  { %3018 = vmatmul.msk.f32.gmra.mxu1 %vm105_vm1, %v476_v31  ;;  %3031 = vmatmul.msk.f32.gmra.mxu3 %vm192_vm2, %v610_v33 }
 0x33d   :  { %v830_v34 = vpop.permute.xlu1 %829 }
 0x340   :  { %v834_v47 = vpop.permute.xlu0 %833 }
 0x341   :  { %v654_v36 = vpop.f32.mrf.mxu3  ;;  %3041 = vmatmul.msk.f32.vlgmr.msra.gmra.mxu1 %vm192_vm2, %v828_v14 }
 0x342   :  { %v666_v37 = vmul.f32 0.35355338, %v654_v36 }
 0x344   :  { %v670_v39 = vadd.f32 %v666_v37, %v3605_v6 }
 0x345   :  { %v612_v40 = vpop.permute.xlu1 %611 }
 0x346   :  { %3032 = vmatmul.msk.f32.gmra.mxu3 %vm192_vm2, %v612_v40  ;;  %v674_v41 = vsel %vm105_vm1, %v670_v39, -inf }
 0x347   :  { %675 = vmax.xlane.f32.xlu0 %v674_v41 }
 0x349   :  { %v657_v43 = vpop.f32.mrf.mxu3  ;;  %3042 = vmatmul.msk.f32.gmra.mxu1 %vm192_vm2, %v830_v34 }
 0x34a   :  { %v667_v42 = vmul.f32 0.35355338, %v657_v43 }
 0x34c   :  { %v3677_v44 = vadd.f32 %v667_v42, %v3609_v12 }
 0x34e   :  { %v677_v45 = vsel %vm105_vm1, %v3677_v44, -inf }
 0x34f   :  { %678 = vmax.xlane.f32.xlu0 %v677_v45 }
 0x351   :  { %3043 = vmatmul.msk.f32.gmra.mxu1 %vm192_vm2, %v832_v46 }
 0x359   :  { %3044 = vmatmul.msk.f32.gmra.mxu1 %vm192_vm2, %v834_v47 }
 0x36b   :  { %v248_v50 = vpop.xlane.xlu0 %247 }
 0x36c   :  { %v258_v51 = vsub.f32 %v3648_v49, %v248_v50 }
 0x36e   :  { %v262_v52 = vmul.f32 1.442695, %v258_v51 }
 0x370   :  { %3214 = vpow2.f32 %v262_v52  ;;  %v422_v32 = vpop.xlane.xlu1 %421 }
 0x371   :  { %3216 = vpow2.f32 %v264_v54  ;;  %v426_v27 = vsub.f32 %v3653_v28, %v422_v32 }
 0x373   :  { %v433_v22 = vmul.f32 1.442695, %v426_v27  ;;  %v257_v1 = vpop.xlane.xlu0 %256 }
 0x374   :  { %v261_v4 = vsub.f32 %v3656_v53, %v257_v1 }
 0x376   :  { %v3685_v55 = vpop.eup %3214  ;;  %v268_v5 = vmul.f32 1.442695, %v261_v4 }
 0x377   :  { %v270_v58 = vsel %vm105_vm1, %v3685_v55, 0.0  ;;  %v3691_v62 = vpop.eup %3216 }
 0x378   :  { %271 = vadd.xlane.f32.xlu1 %v270_v58  ;;  %v254_v59 = vpop.xlane.xlu1 %253  ;;  %v273_v63 = vsel %vm105_vm1, %v3691_v62, 0.0 }
 0x379   :  { %v260_v60 = vsub.f32 %v3663_v56, %v254_v59 }
 0x37b   :  { %v266_v49 = vmul.f32 1.442695, %v260_v60 }
 0x37d   :  { %3218 = vpow2.f32 %v266_v49 }
 0x37e   :  { %3220 = vpow2.f32 %v431_v61 }
 0x37f   :  { %3222 = vpow2.f32 %v433_v22 }
 0x380   :  { %274 = vadd.xlane.f32.xlu1 %v273_v63  ;;  %3224 = vpow2.f32 %v268_v5 }
 0x383   :  { %v3696_v0 = vpop.eup %3218 }
 0x384   :  { %v3698_v2 = vpop.eup %3220  ;;  %v276_v56 = vsel %vm105_vm1, %v3696_v0, 0.0 }
 0x385   :  { %277 = vadd.xlane.f32.xlu2 %v276_v56  ;;  %v441_v28 = vsel %vm105_vm1, %v3698_v2, 0.0  ;;  %v3705_v7 = vpop.eup %3222 }
 0x386   :  { %v444_v8 = vsel %vm105_vm1, %v3705_v7, 0.0  ;;  %v3709_v9 = vpop.eup %3224 }
 0x387   :  { %v279_v10 = vsel %vm105_vm1, %v3709_v9, 0.0 }
 0x388   :  { %442 = vadd.xlane.f32.xlu1 %v441_v28 }
 0x390   :  { %445 = vadd.xlane.f32.xlu1 %v444_v8 }
 0x398   :  { %280 = vadd.xlane.f32.xlu1 %v279_v10 }
 0x3ae   :  { %v3713_v11 = vpop.f32.mrf.mxu1 }
 0x3b6   :  { %v3715_v53 = vpop.f32.mrf.mxu1 }
 0x3ba   :  { %v676_v13 = vpop.xlane.xlu0 %675 }
 0x3bb   :  { %v686_v14 = vsub.f32 %v670_v39, %v676_v13 }
 0x3bc   :  { %v660_v15 = vpop.f32.mrf.mxu3 }
 0x3bd   :  { %v690_v16 = vmul.f32 1.442695, %v686_v14  ;;  %v668_v18 = vmul.f32 0.35355338, %v660_v15 }
 0x3be   :  { %v876_v24 = vpop.f32.mrf.mxu1 }
 0x3bf   :  { %3226 = vpow2.f32 %v690_v16  ;;  %v3718_v25 = vadd.f32 %v668_v18, %v3613_v20  ;;  %v888_v36 = vmul.f32 0.35355338, %v876_v24 }
 0x3c1   :  { %v680_v29 = vsel %vm105_vm1, %v3718_v25, -inf  ;;  %v3728_v42 = vadd.f32 %v888_v36, %v3605_v6 }
 0x3c2   :  { %v679_v31 = vpop.xlane.xlu0 %678  ;;  %681 = vmax.xlane.f32.xlu0 %v680_v29 }
 0x3c3   :  { %v687_v34 = vsub.f32 %v3677_v44, %v679_v31  ;;  %v896_v47 = vsel %vm105_vm1, %v3728_v42, -inf }
 0x3c5   :  { %v3722_v33 = vpop.eup %3226  ;;  %v692_v40 = vmul.f32 1.442695, %v687_v34 }
 0x3c6   :  { %v698_v37 = vsel %vm105_vm1, %v3722_v33, 0.0  ;;  %v879_v39 = vpop.f32.mrf.mxu1 }
 0x3c7   :  { %699 = vadd.xlane.f32.xlu2 %v698_v37  ;;  %3228 = vpow2.f32 %v692_v40  ;;  %v889_v46 = vmul.f32 0.35355338, %v879_v39 }
 0x3c9   :  { %v663_v41 = vpop.f32.mrf.mxu3  ;;  %v3738_v26 = vadd.f32 %v889_v46, %v3609_v12 }
 0x3ca   :  { %v669_v43 = vmul.f32 0.35355338, %v663_v41 }
 0x3cb   :  { %v899_v52 = vsel %vm105_vm1, %v3738_v26, -inf }
 0x3cc   :  { %v3731_v45 = vadd.f32 %v669_v43, %v3603_v3 }
 0x3cd   :  { %v3740_v50 = vpop.eup %3228 }
 0x3ce   :  { %v683_v44 = vsel %vm105_vm1, %v3731_v45, -inf  ;;  %v882_v48 = vpop.f32.mrf.mxu1  ;;  %v701_v30 = vsel %vm105_vm1, %v3740_v50, 0.0 }
 0x3cf   :  { %684 = vmax.xlane.f32.xlu0 %v683_v44  ;;  %897 = vmax.xlane.f32.xlu2 %v896_v47  ;;  %v890_v51 = vmul.f32 0.35355338, %v882_v48 }
 0x3d1   :  { %v3747_v32 = vadd.f32 %v890_v51, %v3613_v20 }
 0x3d3   :  { %v902_v58 = vsel %vm105_vm1, %v3747_v32, -inf }
 0x3d6   :  { %v885_v54 = vpop.f32.mrf.mxu1 }
 0x3d7   :  { %702 = vadd.xlane.f32.xlu0 %v701_v30  ;;  %900 = vmax.xlane.f32.xlu2 %v899_v52  ;;  %v891_v57 = vmul.f32 0.35355338, %v885_v54 }
 0x3d9   :  { %v3752_v59 = vadd.f32 %v891_v57, %v3603_v3 }
 0x3db   :  { %v905_v60 = vsel %vm105_vm1, %v3752_v59, -inf }
 0x3df   :  { %903 = vmax.xlane.f32.xlu2 %v902_v58 }
 0x3e7   :  { %906 = vmax.xlane.f32.xlu2 %v905_v60 }
 0x3eb   :  { %3162 = vrot.lane.b32.xlu0 %v3560_v38, %s3440_s7  ;;  %v3758_v61 = vpop.xlane.xlu1 %271 }
 0x3ec   :  { %v293_v52 = vand.u32 2147483648, %v3758_v61  ;;  %vm287_vm0 = vweird.f32 %v3758_v61  ;;  %v291_v57 = vand.u32 2147483647, %v3758_v61 }
 0x3ee   :  { %vm292_vm4 = vcmp.eq.f32.partialorder %v291_v57, 8.507059e+37 }
 0x3f3   :  { %v3760_v49 = vpop.xlane.xlu1 %274 }
 0x3f4   :  { %vm302_vm6 = vweird.f32 %v3760_v49 }
 0x3f8   :  { %v3767_v16 = vpop.xlane.xlu2 %277 }
 0x3fb   :  { %v443_v27 = vpop.xlane.xlu1 %442 }
 0x3fc   :  { %3230 = vrcp.f32 %v443_v27  ;;  %v488_v5 = vand.u32 2147483648, %v443_v27  ;;  %v486_v10 = vand.u32 2147483647, %v443_v27  ;;  %vm482_vm8 = vweird.f32 %v443_v27 }
 0x3fd   :  { %3232 = vrcp.f32 %v3758_v61 }
 0x3fe   :  { %vm487_vm10 = vcmp.eq.f32.partialorder %v486_v10, 8.507059e+37 }
 0x3ff   :  { %3157 = vrot.lane.b32.xlu2 %v3560_v38, %s3441_s8  ;;  %v489_v38 = vor.u32 1.1754944e-38, %v488_v5 }
 0x402   :  { %v3231_v63 = vpop.eup %3230 }
 0x403   :  { %v3233_v22 = vpop.eup %3232  ;;  %v478_v1 = vmul.f32 %v3231_v63, %v443_v27  ;;  %v446_v56 = vpop.xlane.xlu1 %445  ;;  %vm483_vm7 = vweird.f32 %v3231_v63 }
 0x404   :  { %3234 = vrcp.f32 %v446_v56  ;;  %v283_v28 = vmul.f32 %v3233_v22, %v3758_v61  ;;  %vm484_vm9 = vmor %vm482_vm8, %vm483_vm7  ;;  %v503_v39 = vand.u32 2147483648, %v446_v56  ;;  %v501_v43 = vand.u32 2147483647, %v446_v56 }
 0x405   :  { %v479_v4 = vsub.f32 1.0, %v478_v1  ;;  %3236 = vrcp.f32 %v3760_v49  ;;  %vm497_vm12 = vweird.f32 %v446_v56  ;;  %vm288_vm13 = vweird.f32 %v3233_v22 }
 0x406   :  { %v284_v15 = vsub.f32 1.0, %v283_v28  ;;  %3238 = vrcp.f32 %v3767_v16  ;;  %v504_v44 = vor.u32 1.1754944e-38, %v503_v39  ;;  %vm502_vm15 = vcmp.eq.f32.partialorder %v501_v43, 8.507059e+37  ;;  %vm289_vm3 = vmor %vm287_vm0, %vm288_vm13 }
 0x407   :  { %v480_v8 = vmul.f32 %v3231_v63, %v479_v4  ;;  %v294_v1 = vor.u32 1.1754944e-38, %v293_v52  ;;  %v306_v61 = vand.u32 2147483647, %v3760_v49 }
 0x408   :  { %v285_v37 = vmul.f32 %v3233_v22, %v284_v15 }
 0x409   :  { %v481_v13 = vadd.f32 %v3231_v63, %v480_v8  ;;  %v308_v8 = vand.u32 2147483648, %v3760_v49  ;;  %vm307_vm8 = vcmp.eq.f32.partialorder %v306_v61, 8.507059e+37 }
 0x40a   :  { %v3235_v14 = vpop.eup %3234  ;;  %v286_v47 = vadd.f32 %v3233_v22, %v285_v37 }
 0x40b   :  { %v493_v18 = vmul.f32 %v3235_v14, %v446_v56  ;;  %v485_v24 = vsel %vm484_vm9, %v3231_v63, %v481_v13  ;;  %v3237_v29 = vpop.eup %3236  ;;  %vm498_vm11 = vweird.f32 %v3235_v14  ;;  %v281_v51 = vpop.xlane.xlu1 %280 }
 0x40c   :  { %v490_v31 = vsel %vm487_vm10, %v489_v38, %v485_v24  ;;  %v298_v40 = vmul.f32 %v3237_v29, %v3760_v49  ;;  %vm499_vm14 = vmor %vm497_vm12, %vm498_vm11  ;;  %v3239_v30 = vpop.eup %3238  ;;  %3240 = vrcp.f32 %v281_v51  ;;  %v290_v60 = vsel %vm289_vm3, %v3233_v22, %v286_v47 }
 0x40d   :  { %v494_v34 = vsub.f32 1.0, %v493_v18  ;;  %v491_v36 = vmul.f32 %v3698_v2, %v490_v31  ;;  %v313_v63 = vmul.f32 %v3239_v30, %v3767_v16  ;;  %v295_v56 = vsel %vm292_vm4, %v294_v1, %v290_v60 }
 0x40e   :  { %v299_v48 = vsub.f32 1.0, %v298_v40  ;;  %vm303_vm5 = vweird.f32 %v3237_v29  ;;  %vm318_vm9 = vweird.f32 %v3239_v30  ;;  %v323_v24 = vand.u32 2147483648, %v3767_v16 }
 0x40f   :  { %v495_v41 = vmul.f32 %v3235_v14, %v494_v34  ;;  %3019 = vmatmul.msk.f32.vlgmr.msrb.gmra.mxu2 %vm105_vm1, %v491_v36  ;;  %v314_v4 = vsub.f32 1.0, %v313_v63  ;;  %vm304_vm7 = vmor %vm302_vm6, %vm303_vm5  ;;  %vm317_vm10 = vweird.f32 %v3767_v16  ;;  %v321_v49 = vand.u32 2147483647, %v3767_v16 }
 0x410   :  { %v300_v27 = vmul.f32 %v3237_v29, %v299_v48  ;;  %vm319_vm11 = vmor %vm317_vm10, %vm318_vm9  ;;  %v338_v39 = vand.u32 2147483648, %v281_v51 }
 0x411   :  { %v496_v46 = vadd.f32 %v3235_v14, %v495_v41  ;;  %v315_v22 = vmul.f32 %v3239_v30, %v314_v4  ;;  %vm322_vm12 = vcmp.eq.f32.partialorder %v321_v49, 8.507059e+37  ;;  %v336_v41 = vand.u32 2147483647, %v281_v51 }
 0x412   :  { %v301_v28 = vadd.f32 %v3237_v29, %v300_v27  ;;  %v3241_v5 = vpop.eup %3240  ;;  %v339_v16 = vor.u32 1.1754944e-38, %v338_v39 }
 0x413   :  { %v500_v2 = vsel %vm499_vm14, %v3235_v14, %v496_v46  ;;  %v328_v10 = vmul.f32 %v3241_v5, %v281_v51  ;;  %v309_v14 = vor.u32 1.1754944e-38, %v308_v8  ;;  %v316_v18 = vadd.f32 %v3239_v30, %v315_v22 }
 0x414   :  { %v505_v54 = vsel %vm502_vm15, %v504_v44, %v500_v2  ;;  %v305_v13 = vsel %vm304_vm7, %v3237_v29, %v301_v28  ;;  %v324_v29 = vor.u32 1.1754944e-38, %v323_v24  ;;  %vm333_vm13 = vweird.f32 %v3241_v5 }
 0x415   :  { %v506_v58 = vmul.f32 %v3705_v7, %v505_v54  ;;  %v296_v7 = vmul.f32 %v3685_v55, %v295_v56  ;;  %v310_v15 = vsel %vm307_vm8, %v309_v14, %v305_v13  ;;  %v329_v38 = vsub.f32 1.0, %v328_v10 }
 0x416   :  { %v311_v55 = vmul.f32 %v3691_v62, %v310_v15  ;;  %v320_v34 = vsel %vm319_vm11, %v3239_v30, %v316_v18  ;;  %vm332_vm14 = vweird.f32 %v281_v51  ;;  %vm337_vm0 = vcmp.eq.f32.partialorder %v336_v41, 8.507059e+37 }
 0x417   :  { %3020 = vmatmul.msk.f32.gmra.mxu2 %vm105_vm1, %v506_v58  ;;  %v330_v31 = vmul.f32 %v3241_v5, %v329_v38  ;;  %v325_v36 = vsel %vm322_vm12, %v324_v29, %v320_v34  ;;  %vm334_vm15 = vmor %vm332_vm14, %vm333_vm13 }
 0x418   :  { %v326_v40 = vmul.f32 %v3696_v0, %v325_v36 }
 0x419   :  { %v331_v37 = vadd.f32 %v3241_v5, %v330_v31 }
 0x41b   :  { %v335_v62 = vsel %vm334_vm15, %v3241_v5, %v331_v37 }
 0x41c   :  { %v340_v43 = vsel %vm337_vm0, %v339_v16, %v335_v62 }
 0x41d   :  { %v341_v44 = vmul.f32 %v3709_v9, %v340_v43 }
 0x41f   :  { %3021 = vmatmul.msk.f32.vlgmr.msra.gmra.mxu2 %vm105_vm1, %v296_v7 }
 0x427   :  { %3022 = vmatmul.msk.f32.gmra.mxu2 %vm105_vm1, %v311_v55 }
 0x42f   :  { %3023 = vmatmul.msk.f32.gmra.mxu2 %vm105_vm1, %v326_v40 }
 0x435   :  { %v682_v46 = vpop.xlane.xlu0 %681 }
 0x436   :  { %v688_v47 = vsub.f32 %v3718_v25, %v682_v46 }
 0x437   :  { %3024 = vmatmul.msk.f32.gmra.mxu2 %vm105_vm1, %v341_v44 }
 0x438   :  { %v694_v48 = vmul.f32 1.442695, %v688_v47 }
 0x43a   :  { %3242 = vpow2.f32 %v694_v48  ;;  %v3794_v2 = vpop.xlane.xlu2 %699 }
 0x43b   :  { %v721_v16 = vand.u32 2147483648, %v3794_v2  ;;  %vm715_vm4 = vweird.f32 %v3794_v2  ;;  %v719_v43 = vand.u32 2147483647, %v3794_v2 }
 0x43d   :  { %vm720_vm6 = vcmp.eq.f32.partialorder %v719_v43, 8.507059e+37 }
 0x440   :  { %v3796_v0 = vpop.eup %3242 }
 0x441   :  { %v704_v51 = vsel %vm105_vm1, %v3796_v0, 0.0 }
 0x442   :  { %705 = vadd.xlane.f32.xlu2 %v704_v51  ;;  %v898_v30 = vpop.xlane.xlu2 %897  ;;  %v685_v57 = vpop.xlane.xlu0 %684  ;;  %v722_v51 = vor.u32 1.1754944e-38, %v721_v16 }
 0x443   :  { %v908_v52 = vsub.f32 %v3728_v42, %v898_v30  ;;  %v689_v24 = vsub.f32 %v3731_v45, %v685_v57 }
 0x445   :  { %v912_v54 = vmul.f32 1.442695, %v908_v52  ;;  %v696_v55 = vmul.f32 1.442695, %v689_v24 }
 0x447   :  { %3244 = vpow2.f32 %v912_v54 }
 0x44a   :  { %v901_v9 = vpop.xlane.xlu2 %900  ;;  %v3807_v56 = vpop.xlane.xlu0 %702 }
 0x44b   :  { %v909_v25 = vsub.f32 %v3738_v26, %v901_v9  ;;  %vm730_vm8 = vweird.f32 %v3807_v56 }
 0x44d   :  { %v3802_v58 = vpop.eup %3244  ;;  %v914_v60 = vmul.f32 1.442695, %v909_v25 }
 0x44e   :  { %v920_v27 = vsel %vm105_vm1, %v3802_v58, 0.0 }
 0x44f   :  { %3246 = vpow2.f32 %v914_v60  ;;  %921 = vadd.xlane.f32.xlu0 %v920_v27 }
 0x452   :  { %v904_v63 = vpop.xlane.xlu2 %903 }
 0x453   :  { %v910_v1 = vsub.f32 %v3747_v32, %v904_v63 }
 0x455   :  { %v916_v42 = vmul.f32 1.442695, %v910_v1  ;;  %v3809_v4 = vpop.eup %3246  ;;  %v734_v1 = vand.u32 2147483647, %v3807_v56 }
 0x456   :  { %v923_v26 = vsel %vm105_vm1, %v3809_v4, 0.0 }
 0x457   :  { %3248 = vpow2.f32 %v916_v42  ;;  %924 = vadd.xlane.f32.xlu1 %v923_v26  ;;  %vm735_vm10 = vcmp.eq.f32.partialorder %v734_v1, 8.507059e+37 }
 0x45a   :  { %v907_v28 = vpop.xlane.xlu2 %906 }
 0x45b   :  { %v911_v14 = vsub.f32 %v3752_v59, %v907_v28 }
 0x45d   :  { %v3813_v5 = vpop.eup %3248  ;;  %v3163_v8 = vpop.permute.xlu0 %3162  ;;  %v918_v15 = vmul.f32 1.442695, %v911_v14 }
 0x45e   :  { %v3164_v7 = vunpack.i.l.bf16 %v3163_v8  ;;  %v926_v61 = vsel %vm105_vm1, %v3813_v5, 0.0  ;;  %v3165_v22 = vunpack.i.h.bf16 %v3163_v8 }
 0x45f   :  { %927 = vadd.xlane.f32.xlu1 %v926_v61  ;;  %3250 = vpow2.f32 %v918_v15 }
 0x460   :  { %806 = vmatpush.msra.mxu0 %v3164_v7  ;;  %3252 = vpow2.f32 %v696_v55 }
 0x461   :  { %3254 = vrcp.f32 %v3794_v2 }
 0x462   :  { %807 = vmatpush.msra.mxu0 %v3165_v22  ;;  %v3158_v32 = vpop.permute.xlu2 %3157  ;;  %3256 = vrcp.f32 %v3807_v56 }
 0x463   :  { %v3159_v10 = vunpack.i.l.bf16 %v3158_v32  ;;  %3172 = vrot.lane.b32.xlu0 %v3546_v35, %s3440_s7  ;;  %v3160_v13 = vunpack.i.h.bf16 %v3158_v32 }
 0x465   :  { %1028 = vmatpush.msrb.mxu2 %v3159_v10  ;;  %v3822_v38 = vpop.eup %3250 }
 0x466   :  { %v929_v18 = vsel %vm105_vm1, %v3822_v38, 0.0  ;;  %v3827_v49 = vpop.eup %3252 }
 0x467   :  { %1029 = vmatpush.msrb.mxu2 %v3160_v13  ;;  %v707_v31 = vsel %vm105_vm1, %v3827_v49, 0.0 }
 0x478   :  { %3167 = vrot.lane.b32.xlu1 %v3546_v35, %s3441_s8  ;;  %v3255_v35 = vpop.eup %3254 }
 0x479   :  { %v711_v59 = vmul.f32 %v3255_v35, %v3794_v2  ;;  %v3257_v36 = vpop.eup %3256  ;;  %vm716_vm3 = vweird.f32 %v3255_v35  ;;  %v736_v2 = vand.u32 2147483648, %v3807_v56 }
 0x47a   :  { %v726_v37 = vmul.f32 %v3257_v36, %v3807_v56  ;;  %vm717_vm5 = vmor %vm715_vm4, %vm716_vm3  ;;  %vm731_vm7 = vweird.f32 %v3257_v36 }
 0x47b   :  { %v712_v34 = vsub.f32 1.0, %v711_v59  ;;  %vm732_vm9 = vmor %vm730_vm8, %vm731_vm7  ;;  %v737_v28 = vor.u32 1.1754944e-38, %v736_v2 }
 0x47c   :  { %v727_v41 = vsub.f32 1.0, %v726_v37 }
 0x47d   :  { %v713_v45 = vmul.f32 %v3255_v35, %v712_v34 }
 0x47e   :  { %v728_v47 = vmul.f32 %v3257_v36, %v727_v41 }
 0x47f   :  { %v714_v40 = vadd.f32 %v3255_v35, %v713_v45 }
 0x480   :  { %v729_v25 = vadd.f32 %v3257_v36, %v728_v47 }
 0x481   :  { %v718_v44 = vsel %vm717_vm5, %v3255_v35, %v714_v40 }
 0x482   :  { %v723_v54 = vsel %vm720_vm6, %v722_v51, %v718_v44  ;;  %v733_v26 = vsel %vm732_vm9, %v3257_v36, %v729_v25 }
 0x483   :  { %v724_v63 = vmul.f32 %v3722_v33, %v723_v54  ;;  %v738_v22 = vsel %vm735_vm10, %v737_v28, %v733_v26 }
 0x484   :  { %v739_v13 = vmul.f32 %v3740_v50, %v738_v22 }
 0x48d   :  { %930 = vadd.xlane.f32.xlu0 %v929_v18 }
 0x4a2   :  { %708 = vadd.xlane.f32.xlu1 %v707_v31 }
 0x4b5   :  { %v3834_v29 = vpop.xlane.xlu2 %705 }
 0x4b6   :  { %3258 = vrcp.f32 %v3834_v29  ;;  %v751_v33 = vand.u32 2147483648, %v3834_v29  ;;  %vm745_vm12 = vweird.f32 %v3834_v29  ;;  %v749_v14 = vand.u32 2147483647, %v3834_v29 }
 0x4b8   :  { %v752_v18 = vor.u32 1.1754944e-38, %v751_v33  ;;  %vm750_vm15 = vcmp.eq.f32.partialorder %v749_v14, 8.507059e+37 }
 0x4bc   :  { %v3259_v62 = vpop.eup %3258 }
 0x4bd   :  { %v741_v48 = vmul.f32 %v3259_v62, %v3834_v29  ;;  %vm746_vm11 = vweird.f32 %v3259_v62 }
 0x4be   :  { %vm747_vm13 = vmor %vm745_vm12, %vm746_vm11 }
 0x4bf   :  { %v742_v57 = vsub.f32 1.0, %v741_v48 }
 0x4c1   :  { %v743_v42 = vmul.f32 %v3259_v62, %v742_v57 }
 0x4c2   :  { %v3838_v39 = vpop.xlane.xlu0 %921 }
 0x4c3   :  { %3260 = vrcp.f32 %v3838_v39  ;;  %v744_v32 = vadd.f32 %v3259_v62, %v743_v42  ;;  %v943_v35 = vand.u32 2147483648, %v3838_v39  ;;  %vm937_vm0 = vweird.f32 %v3838_v39 }
 0x4c4   :  { %v941_v59 = vand.u32 2147483647, %v3838_v39 }
 0x4c5   :  { %v748_v15 = vsel %vm747_vm13, %v3259_v62, %v744_v32  ;;  %v944_v45 = vor.u32 1.1754944e-38, %v943_v35  ;;  %v558_v35 = vpop.f32.mrf.mxu2 }
 0x4c6   :  { %v753_v34 = vsel %vm750_vm15, %v752_v18, %v748_v15  ;;  %vm942_vm4 = vcmp.eq.f32.partialorder %v941_v59, 8.507059e+37 }
 0x4c7   :  { %v754_v37 = vmul.f32 %v3796_v0, %v753_v34 }
 0x4c9   :  { %v3261_v30 = vpop.eup %3260 }
 0x4ca   :  { %v3844_v46 = vpop.xlane.xlu1 %924  ;;  %v933_v60 = vmul.f32 %v3261_v30, %v3838_v39  ;;  %vm938_vm14 = vweird.f32 %v3261_v30 }
 0x4cb   :  { %3262 = vrcp.f32 %v3844_v46  ;;  %vm939_vm3 = vmor %vm937_vm0, %vm938_vm14  ;;  %v958_v39 = vand.u32 2147483648, %v3844_v46  ;;  %vm952_vm6 = vweird.f32 %v3844_v46  ;;  %v956_v48 = vand.u32 2147483647, %v3844_v46 }
 0x4cc   :  { %v934_v8 = vsub.f32 1.0, %v933_v60 }
 0x4cd   :  { %vm957_vm8 = vcmp.eq.f32.partialorder %v956_v48, 8.507059e+37  ;;  %v561_v59 = vpop.f32.mrf.mxu2 }
 0x4ce   :  { %v935_v56 = vmul.f32 %v3261_v30, %v934_v8 }
 0x4d0   :  { %v936_v24 = vadd.f32 %v3261_v30, %v935_v56 }
 0x4d1   :  { %v3263_v61 = vpop.eup %3262 }
 0x4d2   :  { %v3854_v7 = vpop.xlane.xlu1 %927  ;;  %v948_v10 = vmul.f32 %v3263_v61, %v3844_v46  ;;  %v940_v50 = vsel %vm939_vm3, %v3261_v30, %v936_v24  ;;  %vm953_vm5 = vweird.f32 %v3263_v61  ;;  %v959_v30 = vor.u32 1.1754944e-38, %v958_v39 }
 0x4d3   :  { %3264 = vrcp.f32 %v3854_v7  ;;  %v945_v41 = vsel %vm942_vm4, %v944_v45, %v940_v50  ;;  %vm954_vm7 = vmor %vm952_vm6, %vm953_vm5  ;;  %vm967_vm10 = vweird.f32 %v3854_v7 }
 0x4d4   :  { %v949_v55 = vsub.f32 1.0, %v948_v10  ;;  %v946_v47 = vmul.f32 %v3802_v58, %v945_v41  ;;  %v971_v58 = vand.u32 2147483647, %v3854_v7  ;;  %v3889_v41 = vld [vmem:[%s4623_s2] sm:$0xff] }
 0x4d5   :  { %v3173_v52 = vpop.permute.xlu0 %3172  ;;  %v593_v34 = vpop.f32.mrf.mxu2 }
 0x4d6   :  { %v3174_v9 = vunpack.i.l.bf16 %v3173_v52  ;;  %v3175_v27 = vunpack.i.h.bf16 %v3173_v52  ;;  %v950_v29 = vmul.f32 %v3263_v61, %v949_v55  ;;  %vm972_vm12 = vcmp.eq.f32.partialorder %v971_v58, 8.507059e+37 }
 0x4d8   :  { %808 = vmatpush.msra.mxu0 %v3174_v9  ;;  %v951_v43 = vadd.f32 %v3263_v61, %v950_v29  ;;  %v973_v9 = vand.u32 2147483648, %v3854_v7 }
 0x4d9   :  { %v3265_v31 = vpop.eup %3264 }
 0x4da   :  { %809 = vmatpush.msra.mxu0 %v3175_v27  ;;  %v963_v36 = vmul.f32 %v3265_v31, %v3854_v7  ;;  %v955_v51 = vsel %vm954_vm7, %v3263_v61, %v951_v43  ;;  %vm968_vm9 = vweird.f32 %v3265_v31  ;;  %v974_v25 = vor.u32 1.1754944e-38, %v973_v9 }
 0x4db   :  { %3033 = vmatmul.msk.f32.vlgmr.msra.gmra.mxu0 %vm105_vm1, %v724_v63  ;;  %v960_v52 = vsel %vm957_vm8, %v959_v30, %v955_v51  ;;  %vm969_vm11 = vmor %vm967_vm10, %vm968_vm9 }
 0x4dc   :  { %v964_v16 = vsub.f32 1.0, %v963_v36  ;;  %v961_v57 = vmul.f32 %v3809_v4, %v960_v52 }
 0x4dd   :  { %v596_v50 = vpop.f32.mrf.mxu2 }
 0x4de   :  { %v965_v0 = vmul.f32 %v3265_v31, %v964_v16 }
 0x4e0   :  { %v966_v54 = vadd.f32 %v3265_v31, %v965_v0 }
 0x4e2   :  { %v970_v46 = vsel %vm969_vm11, %v3265_v31, %v966_v54 }
 0x4e3   :  { %3034 = vmatmul.msk.f32.gmra.mxu0 %vm105_vm1, %v739_v13  ;;  %v975_v2 = vsel %vm972_vm12, %v974_v25, %v970_v46 }
 0x4e4   :  { %v976_v60 = vmul.f32 %v3813_v5, %v975_v2 }
 0x4e5   :  { %v599_v29 = vpop.f32.mrf.mxu2 }
 0x4e6   :  { %v600_v54 = vadd.f32 %v599_v29, %v558_v35 }
 0x4ea   :  { %v3168_v40 = vpop.permute.xlu1 %3167 }
 0x4eb   :  { %v3169_v62 = vunpack.i.l.bf16 %v3168_v40  ;;  %3035 = vmatmul.msk.f32.gmra.mxu0 %vm105_vm1, %v754_v37  ;;  %v3170_v44 = vunpack.i.h.bf16 %v3168_v40  ;;  %v594_v37 = vadd.f32 %v593_v34, %v3713_v11 }
 0x4ed   :  { %1030 = vmatpush.msrb.mxu2 %v3169_v62  ;;  %v602_v36 = vpop.f32.mrf.mxu2  ;;  %v1049_v62 = vperm.slane %v3889_v41, 3 }
 0x4ef   :  { %1031 = vmatpush.msrb.mxu2 %v3170_v44  ;;  %v597_v44 = vadd.f32 %v596_v50, %v3715_v53 }
 0x4f0   :  { %3045 = vmatmul.msk.f32.vlgmr.msrb.gmra.mxu2 %vm105_vm1, %v946_v47 }
 0x4f8   :  { %3046 = vmatmul.msk.f32.gmra.mxu2 %vm105_vm1, %v961_v57 }
 0x500   :  { %v931_v27 = vpop.xlane.xlu0 %930  ;;  %3047 = vmatmul.msk.f32.gmra.mxu2 %vm105_vm1, %v976_v60  ;;  %v603_v60 = vadd.f32 %v602_v36, %v561_v59 }
 0x501   :  { %3266 = vrcp.f32 %v931_v27  ;;  %v988_v26 = vand.u32 2147483648, %v931_v27  ;;  %v986_v28 = vand.u32 2147483647, %v931_v27  ;;  %vm982_vm14 = vweird.f32 %v931_v27 }
 0x503   :  { %v989_v7 = vor.u32 1.1754944e-38, %v988_v26  ;;  %vm987_vm0 = vcmp.eq.f32.partialorder %v986_v28, 8.507059e+37  ;;  %v3442_v28 = vmov 32.0  }
 0x507   :  { %v3267_v63 = vpop.eup %3266 }
 0x508   :  { %v978_v1 = vmul.f32 %v3267_v63, %v931_v27  ;;  %vm983_vm13 = vweird.f32 %v3267_v63 }
 0x509   :  { %vm984_vm15 = vmor %vm982_vm14, %vm983_vm13 }
 0x50a   :  { %v979_v42 = vsub.f32 1.0, %v978_v1 }
 0x50c   :  { %v980_v4 = vmul.f32 %v3267_v63, %v979_v42 }
 0x50e   :  { %v981_v8 = vadd.f32 %v3267_v63, %v980_v4 }
 0x510   :  { %v985_v61 = vsel %vm984_vm15, %v3267_v63, %v981_v8 }
 0x511   :  { %v990_v22 = vsel %vm987_vm0, %v989_v7, %v985_v61 }
 0x512   :  { %v991_v5 = vmul.f32 %v3822_v38, %v990_v22 }
 0x514   :  { %3048 = vmatmul.msk.f32.gmra.mxu2 %vm105_vm1, %v991_v5 }
 0x515   :  { %v709_v32 = vpop.xlane.xlu1 %708 }
 0x516   :  { %3268 = vrcp.f32 %v709_v32  ;;  %v766_v13 = vand.u32 2147483648, %v709_v32  ;;  %v764_v15 = vand.u32 2147483647, %v709_v32  ;;  %vm760_vm4 = vweird.f32 %v709_v32 }
 0x517   :  { %3270 = vrcp.f32 %v3442_v28 }
 0x518   :  { %v767_v24 = vor.u32 1.1754944e-38, %v766_v13  ;;  %vm765_vm6 = vcmp.eq.f32.partialorder %v764_v15, 8.507059e+37 }
 0x51c   :  { %v3269_v33 = vpop.eup %3268 }
 0x51d   :  { %v756_v56 = vmul.f32 %v3269_v33, %v709_v32  ;;  %vm761_vm3 = vweird.f32 %v3269_v33  ;;  %v3271_v8 = vpop.eup %3270 }
 0x51e   :  { %vm762_vm5 = vmor %vm760_vm4, %vm761_vm3  ;;  %v1071_v7 = vmul.f32 32.0, %v3271_v8  ;;  %vm1075_vm7 = vweird.f32 %v3271_v8 }
 0x51f   :  { %v757_v10 = vsub.f32 1.0, %v756_v56 }
 0x520   :  { %v1072_v61 = vsub.f32 1.0, %v1071_v7 }
 0x521   :  { %v758_v14 = vmul.f32 %v3269_v33, %v757_v10 }
 0x523   :  { %v759_v18 = vadd.f32 %v3269_v33, %v758_v14 }
 0x525   :  { %v763_v55 = vsel %vm762_vm5, %v3269_v33, %v759_v18 }
 0x526   :  { %v768_v31 = vsel %vm765_vm6, %v767_v24, %v763_v55 }
 0x527   :  { %v769_v38 = vmul.f32 %v3827_v49, %v768_v31 }
 0x529   :  { %3036 = vmatmul.msk.f32.gmra.mxu0 %vm105_vm1, %v769_v38 }
 0x558   :  { %v811_v45 = vpop.f32.mrf.mxu0 }
 0x559   :  { %v823_v40 = vadd.f32 %v811_v45, %v594_v37  ;;  %v1166_v37 = vld [vmem:[#allocation2 + $0x68] sm:$0xff] }
 0x55a   :  { %1192 = vmatpush.msrb.mxu3 %v1166_v37 }
 0x560   :  { %v814_v43 = vpop.f32.mrf.mxu0 }
 0x561   :  { %v824_v48 = vadd.f32 %v814_v43, %v597_v44 }
 0x568   :  { %v817_v52 = vpop.f32.mrf.mxu0 }
 0x569   :  { %v825_v57 = vadd.f32 %v817_v52, %v600_v54 }
 0x573   :  { %v1033_v49 = vpop.f32.mrf.mxu2 }
 0x574   :  { %v1045_v16 = vadd.f32 %v1033_v49, %v823_v40  ;;  %v1165_v40 = vld [vmem:[#allocation2 + $0x60] sm:$0xff]  ;;  %v1163_v49 = vld [vmem:[#allocation2 + $0x50] sm:$0xff] }
 0x575   :  { %1193 = vmatpush.msrb.mxu3 %v1165_v40  ;;  %v3949_v40 = vperm.slane %v3889_v41, 6 }
 0x576   :  { %v1050_v39 = vadd.f32 %v1049_v62, %v1045_v16 }
 0x578   :  { %v1054_v47 = vadd.f32 %v1050_v39, %v3486_v17 }
 0x57a   :  { %v1058_v0 = vsel %vm105_vm1, %v1054_v47, 0.0 }
 0x57b   :  { %1059 = vadd.xlane.f32.xlu2 %v1058_v0  ;;  %v1036_v11 = vpop.f32.mrf.mxu2 }
 0x57c   :  { %v1046_v51 = vadd.f32 %v1036_v11, %v824_v48 }
 0x57e   :  { %v1051_v30 = vadd.f32 %v1049_v62, %v1046_v51 }
 0x580   :  { %v1055_v9 = vadd.f32 %v1051_v30, %v3492_v19 }
 0x582   :  { %v1061_v58 = vsel %vm105_vm1, %v1055_v9, 0.0 }
 0x583   :  { %1062 = vadd.xlane.f32.xlu2 %v1061_v58  ;;  %v1039_v46 = vpop.f32.mrf.mxu2 }
 0x584   :  { %v1047_v25 = vadd.f32 %v1039_v46, %v825_v57 }
 0x586   :  { %v1052_v53 = vadd.f32 %v1049_v62, %v1047_v25 }
 0x588   :  { %v1056_v17 = vadd.f32 %v1052_v53, %v3498_v21  ;;  %v1073_v21 = vmul.f32 %v3271_v8, %v1072_v61  ;;  %v1153_v53 = vperm.slane %v3889_v41, 4 }
 0x58a   :  { %v1064_v2 = vsel %vm105_vm1, %v1056_v17, 0.0  ;;  %v1074_v22 = vadd.f32 %v3271_v8, %v1073_v21 }
 0x58b   :  { %1065 = vadd.xlane.f32.xlu0 %v1064_v2 }
 0x58c   :  { %v3901_v5 = vsel %vm1075_vm7, %v3271_v8, %v1074_v22 }
 0x597   :  { %v1042_v1 = vpop.f32.mrf.mxu2 }
 0x5a6   :  { %v820_v27 = vpop.f32.mrf.mxu0 }
 0x5a7   :  { %v826_v63 = vadd.f32 %v820_v27, %v603_v60  ;;  %v1158_v27 = vperm.slane %v3889_v41, 5 }
 0x5a9   :  { %v1048_v42 = vadd.f32 %v1042_v1, %v826_v63 }
 0x5ab   :  { %v1053_v26 = vadd.f32 %v1049_v62, %v1048_v42  ;;  %v1164_v62 = vld [vmem:[#allocation2 + $0x58] sm:$0xff] }
 0x5ac   :  { %1194 = vmatpush.msrb.mxu3 %v1164_v62 }
 0x5ad   :  { %v1057_v19 = vadd.f32 %v1053_v26, %v3504_v23 }
 0x5ae   :  { %1195 = vmatpush.msrb.mxu3 %v1163_v49 }
 0x5af   :  { %v1067_v4 = vsel %vm105_vm1, %v1057_v19, 0.0 }
 0x5b0   :  { %1068 = vadd.xlane.f32.xlu1 %v1067_v4 }
 0x5ee   :  { %v1060_v32 = vpop.xlane.xlu2 %1059 }
 0x5ef   :  { %v1077_v33 = vmul.f32 %v3901_v5, %v1060_v32 }
 0x5f1   :  { %v1081_v56 = vsub.f32 %v1054_v47, %v1077_v33 }
 0x5f3   :  { %v1085_v10 = vmul.f32 %v1081_v56, %v1081_v56 }
 0x5f5   :  { %v1089_v23 = vsel %vm105_vm1, %v1085_v10, 0.0 }
 0x5f6   :  { %1090 = vadd.xlane.f32.xlu2 %v1089_v23  ;;  %v1063_v13 = vpop.xlane.xlu2 %1062 }
 0x5f7   :  { %v1078_v14 = vmul.f32 %v3901_v5, %v1063_v13 }
 0x5f9   :  { %v3906_v15 = vsub.f32 %v1055_v9, %v1078_v14 }
 0x5fb   :  { %v1086_v18 = vmul.f32 %v3906_v15, %v3906_v15 }
 0x5fd   :  { %v1092_v24 = vsel %vm105_vm1, %v1086_v18, 0.0 }
 0x5fe   :  { %1093 = vadd.xlane.f32.xlu0 %v1092_v24  ;;  %v1066_v55 = vpop.xlane.xlu0 %1065 }
 0x5ff   :  { %v1079_v31 = vmul.f32 %v3901_v5, %v1066_v55 }
 0x601   :  { %v3912_v38 = vsub.f32 %v1056_v17, %v1079_v31 }
 0x603   :  { %v1087_v35 = vmul.f32 %v3912_v38, %v3912_v38 }
 0x605   :  { %v1095_v59 = vsel %vm105_vm1, %v1087_v35, 0.0 }
 0x606   :  { %1096 = vadd.xlane.f32.xlu1 %v1095_v59 }
 0x623   :  { %v1069_v34 = vpop.xlane.xlu1 %1068 }
 0x624   :  { %v1080_v50 = vmul.f32 %v3901_v5, %v1069_v34 }
 0x626   :  { %v3918_v29 = vsub.f32 %v1057_v19, %v1080_v50 }
 0x628   :  { %v1088_v36 = vmul.f32 %v3918_v29, %v3918_v29 }
 0x62a   :  { %v1098_v45 = vsel %vm105_vm1, %v1088_v36, 0.0 }
 0x62b   :  { %1099 = vadd.xlane.f32.xlu2 %v1098_v45 }
 0x669   :  { %v1091_v16 = vpop.xlane.xlu2 %1090 }
 0x66a   :  { %v1101_v43 = vmul.f32 %v1091_v16, %v3901_v5 }
 0x66c   :  { %v1105_v39 = vadd.f32 1e-05, %v1101_v43 }
 0x66e   :  { %3272 = vrsqrt.f32 %v1105_v39  ;;  %vm1115_vm9 = vweird.f32 %v1105_v39 }
 0x671   :  { %v1094_v44 = vpop.xlane.xlu0 %1093 }
 0x672   :  { %v1102_v47 = vmul.f32 %v1094_v44, %v3901_v5 }
 0x674   :  { %v3273_v48 = vpop.eup %3272  ;;  %v1106_v0 = vadd.f32 1e-05, %v1102_v47 }
 0x675   :  { %v1110_v11 = vmul.f32 %v3273_v48, %v1105_v39  ;;  %vm1116_vm8 = vweird.f32 %v3273_v48 }
 0x676   :  { %3274 = vrsqrt.f32 %v1106_v0  ;;  %vm1117_vm10 = vmor %vm1115_vm9, %vm1116_vm8  ;;  %vm1125_vm12 = vweird.f32 %v1106_v0 }
 0x677   :  { %v1111_v51 = vmul.f32 %v3273_v48, %v1110_v11  ;;  %v1375_v11 = vld [vmem:[#allocation2 + $0xa0] sm:$0xff] }
 0x679   :  { %v1112_v30 = vmul.f32 0.5, %v1111_v51  ;;  %v1097_v52 = vpop.xlane.xlu1 %1096 }
 0x67a   :  { %v1103_v54 = vmul.f32 %v1097_v52, %v3901_v5 }
 0x67b   :  { %v1113_v9 = vsub.f32 1.5, %v1112_v30  ;;  %v1374_v30 = vld [vmem:[#allocation2 + $0x98] sm:$0xff] }
 0x67c   :  { %v3275_v57 = vpop.eup %3274  ;;  %v1107_v58 = vadd.f32 1e-05, %v1103_v54 }
 0x67d   :  { %v1114_v46 = vmul.f32 %v3273_v48, %v1113_v9  ;;  %v1120_v25 = vmul.f32 %v3275_v57, %v1106_v0  ;;  %vm1126_vm11 = vweird.f32 %v3275_v57  ;;  %v1373_v9 = vld [vmem:[#allocation2 + $0x90] sm:$0xff] }
 0x67e   :  { %3276 = vrsqrt.f32 %v1107_v58  ;;  %vm1127_vm13 = vmor %vm1125_vm12, %vm1126_vm11  ;;  %vm1135_vm15 = vweird.f32 %v1107_v58 }
 0x67f   :  { %v1118_v17 = vsel %vm1117_vm10, %v3273_v48, %v1114_v46  ;;  %v1121_v2 = vmul.f32 %v3275_v57, %v1120_v25  ;;  %v1376_v48 = vld [vmem:[#allocation2 + $0xa8] sm:$0xff] }
 0x680   :  { %v1149_v60 = vmul.f32 %v1118_v17, %v1081_v56  ;;  %1399 = vmatpush.msrb.mxu0 %v1376_v48 }
 0x681   :  { %v1122_v63 = vmul.f32 0.5, %v1121_v2 }
 0x682   :  { %v1154_v1 = vmul.f32 %v1153_v53, %v1149_v60  ;;  %1400 = vmatpush.msrb.mxu0 %v1375_v11  ;;  %v1371_v60 = vld [vmem:[#allocation2 + $0x80] sm:$0xff] }
 0x683   :  { %v1123_v42 = vsub.f32 1.5, %v1122_v63 }
 0x684   :  { %v3277_v26 = vpop.eup %3276  ;;  %v3928_v19 = vadd.f32 %v1158_v27, %v1154_v1  ;;  %1401 = vmatpush.msrb.mxu0 %v1374_v30 }
 0x685   :  { %v1124_v4 = vmul.f32 %v3275_v57, %v1123_v42  ;;  %v1130_v28 = vmul.f32 %v3277_v26, %v1107_v58  ;;  %vm1136_vm14 = vweird.f32 %v3277_v26 }
 0x686   :  { %3049 = vmatmul.msk.f32.vlgmr.msrb.gmra.mxu3 %vm105_vm1, %v3928_v19  ;;  %vm1137_vm0 = vmor %vm1135_vm15, %vm1136_vm14  ;;  %1402 = vmatpush.msrb.mxu0 %v1373_v9 }
 0x687   :  { %v1128_v8 = vsel %vm1127_vm13, %v3275_v57, %v1124_v4  ;;  %v1131_v7 = vmul.f32 %v3277_v26, %v1130_v28 }
 0x688   :  { %v1150_v61 = vmul.f32 %v1128_v8, %v3906_v15  ;;  %v1369_v8 = vld [vmem:[#allocation2 + $0x70] sm:$0xff] }
 0x689   :  { %v1132_v21 = vmul.f32 0.5, %v1131_v7 }
 0x68a   :  { %v1155_v22 = vmul.f32 %v1153_v53, %v1150_v61 }
 0x68b   :  { %v1133_v32 = vsub.f32 1.5, %v1132_v21 }
 0x68c   :  { %v3933_v33 = vadd.f32 %v1158_v27, %v1155_v22 }
 0x68d   :  { %v1134_v56 = vmul.f32 %v3277_v26, %v1133_v32 }
 0x68e   :  { %3050 = vmatmul.msk.f32.gmra.mxu3 %vm105_vm1, %v3933_v33 }
 0x68f   :  { %v1138_v10 = vsel %vm1137_vm0, %v3277_v26, %v1134_v56  ;;  %v1370_v26 = vld [vmem:[#allocation2 + $0x78] sm:$0xff] }
 0x690   :  { %v1151_v23 = vmul.f32 %v1138_v10, %v3912_v38 }
 0x692   :  { %v1156_v13 = vmul.f32 %v1153_v53, %v1151_v23 }
 0x694   :  { %v3938_v14 = vadd.f32 %v1158_v27, %v1156_v13 }
 0x696   :  { %3051 = vmatmul.msk.f32.gmra.mxu3 %vm105_vm1, %v3938_v14 }
 0x69e   :  { %v1100_v15 = vpop.xlane.xlu2 %1099 }
 0x69f   :  { %v1104_v18 = vmul.f32 %v1100_v15, %v3901_v5 }
 0x6a1   :  { %v1108_v24 = vadd.f32 1e-05, %v1104_v18 }
 0x6a3   :  { %3278 = vrsqrt.f32 %v1108_v24  ;;  %vm1145_vm4 = vweird.f32 %v1108_v24 }
 0x6a9   :  { %v3279_v55 = vpop.eup %3278 }
 0x6aa   :  { %v1140_v31 = vmul.f32 %v3279_v55, %v1108_v24  ;;  %vm1146_vm3 = vweird.f32 %v3279_v55 }
 0x6ab   :  { %vm1147_vm5 = vmor %vm1145_vm4, %vm1146_vm3 }
 0x6ac   :  { %v1141_v35 = vmul.f32 %v3279_v55, %v1140_v31 }
 0x6ae   :  { %v1142_v59 = vmul.f32 0.5, %v1141_v35 }
 0x6b0   :  { %v1143_v34 = vsub.f32 1.5, %v1142_v59 }
 0x6b2   :  { %v1144_v50 = vmul.f32 %v3279_v55, %v1143_v34 }
 0x6b4   :  { %v1148_v38 = vsel %vm1147_vm5, %v3279_v55, %v1144_v50  ;;  %vm1378_vm5 = vcmask 523264  }
 0x6b5   :  { %v1152_v36 = vmul.f32 %v1148_v38, %v3918_v29 }
 0x6b7   :  { %v1157_v45 = vmul.f32 %v1153_v53, %v1152_v36  ;;  %v1372_v53 = vld [vmem:[#allocation2 + $0x88] sm:$0xff] }
 0x6b8   :  { %1403 = vmatpush.msrb.mxu0 %v1372_v53 }
 0x6b9   :  { %v3944_v37 = vadd.f32 %v1158_v27, %v1157_v45 }
 0x6ba   :  { %1404 = vmatpush.msrb.mxu0 %v1371_v60 }
 0x6bb   :  { %3052 = vmatmul.msk.f32.gmra.mxu3 %vm105_vm1, %v3944_v37 }
 0x6bc   :  { %1405 = vmatpush.msrb.mxu0 %v1370_v26 }
 0x6be   :  { %1406 = vmatpush.msrb.mxu0 %v1369_v8 }
 0x709   :  { %v1197_v62 = vpop.f32.mrf.mxu3 }
 0x70a   :  { %v3952_v49 = vadd.f32 %v1197_v62, %v3949_v40 }
 0x70c   :  { %v3955_v16 = vmul.f32 0.70710677, %v3952_v49 }
 0x70e   :  { %v1225_v43 = vand.u32 2147483647, %v3955_v16  ;;  %vm1217_vm4 = vcmp.ge.f32.partialorder %v3955_v16, 0.0 }
 0x710   :  { %v1229_v39 = vmul.f32 0.3275911, %v1225_v43  ;;  %v1333_v56 = vsub.f32 0.0, %v1225_v43 }
 0x711   :  { %v1200_v29 = vpop.f32.mrf.mxu3 }
 0x712   :  { %v1233_v44 = vadd.f32 1.0, %v1229_v39  ;;  %v3959_v47 = vadd.f32 %v1200_v29, %v3949_v40  ;;  %v1337_v24 = vmul.f32 %v1333_v56, %v1225_v43 }
 0x714   :  { %3280 = vrcp.f32 %v1233_v44  ;;  %v3962_v0 = vmul.f32 0.70710677, %v3959_v47  ;;  %v1248_v27 = vand.u32 2147483648, %v1233_v44  ;;  %v1246_v42 = vand.u32 2147483647, %v1233_v44 }
 0x715   :  { %vm1242_vm7 = vweird.f32 %v1233_v44  ;;  %v1341_v45 = vmul.f32 1.442695, %v1337_v24 }
 0x716   :  { %v3965_v51 = vand.u32 2147483647, %v3962_v0  ;;  %v1249_v7 = vor.u32 1.1754944e-38, %v1248_v27  ;;  %vm1247_vm9 = vcmp.eq.f32.partialorder %v1246_v42, 8.507059e+37 }
 0x718   :  { %v1230_v52 = vmul.f32 0.3275911, %v3965_v51  ;;  %v1334_v29 = vsub.f32 0.0, %v3965_v51 }
 0x719   :  { %v1203_v54 = vpop.f32.mrf.mxu3 }
 0x71a   :  { %v3281_v57 = vpop.eup %3280  ;;  %v3969_v58 = vadd.f32 %v1203_v54, %v3949_v40  ;;  %v1234_v25 = vadd.f32 1.0, %v1230_v52 }
 0x71b   :  { %v1238_v46 = vmul.f32 %v3281_v57, %v1233_v44  ;;  %vm1243_vm6 = vweird.f32 %v3281_v57 }
 0x71c   :  { %v3972_v17 = vmul.f32 0.70710677, %v3969_v58  ;;  %3282 = vrcp.f32 %v1234_v25  ;;  %vm1244_vm8 = vmor %vm1242_vm7, %vm1243_vm6  ;;  %v1263_v18 = vand.u32 2147483648, %v1234_v25  ;;  %v1261_v31 = vand.u32 2147483647, %v1234_v25 }
 0x71d   :  { %v1239_v2 = vsub.f32 1.0, %v1238_v46  ;;  %vm1257_vm11 = vweird.f32 %v1234_v25  ;;  %v1338_v46 = vmul.f32 %v1334_v29, %v3965_v51  ;;  %vm1218_vm6 = vcmp.ge.f32.partialorder %v3962_v0, 0.0 }
 0x71e   :  { %v3975_v63 = vand.u32 2147483647, %v3972_v17  ;;  %v1264_v36 = vor.u32 1.1754944e-38, %v1263_v18  ;;  %vm1262_vm13 = vcmp.eq.f32.partialorder %v1261_v31, 8.507059e+37  ;;  %vm1219_vm7 = vcmp.ge.f32.partialorder %v3972_v17, 0.0 }
 0x71f   :  { %v1240_v1 = vmul.f32 %v3281_v57, %v1239_v2 }
 0x720   :  { %v1231_v4 = vmul.f32 0.3275911, %v3975_v63 }
 0x721   :  { %v1241_v28 = vadd.f32 %v3281_v57, %v1240_v1  ;;  %v1335_v1 = vsub.f32 0.0, %v3975_v63 }
 0x722   :  { %v1235_v61 = vadd.f32 1.0, %v1231_v4  ;;  %v3283_v21 = vpop.eup %3282 }
 0x723   :  { %v1245_v22 = vsel %vm1244_vm8, %v3281_v57, %v1241_v28  ;;  %v1253_v10 = vmul.f32 %v3283_v21, %v1234_v25  ;;  %vm1258_vm10 = vweird.f32 %v3283_v21  ;;  %v1343_v28 = vmul.f32 1.442695, %v1338_v46 }
 0x724   :  { %v1250_v32 = vsel %vm1247_vm9, %v1249_v7, %v1245_v22  ;;  %3284 = vrcp.f32 %v1235_v61  ;;  %vm1259_vm12 = vmor %vm1257_vm11, %vm1258_vm10  ;;  %v1278_v43 = vand.u32 2147483648, %v1235_v61  ;;  %v1276_v54 = vand.u32 2147483647, %v1235_v61 }
 0x725   :  { %v1297_v23 = vmul.f32 1.0614054, %v1250_v32  ;;  %v1254_v13 = vsub.f32 1.0, %v1253_v10  ;;  %3286 = vpow2.f32 %v1341_v45  ;;  %vm1272_vm15 = vweird.f32 %v1235_v61 }
 0x726   :  { %v1279_v2 = vor.u32 1.1754944e-38, %v1278_v43  ;;  %vm1277_vm3 = vcmp.eq.f32.partialorder %v1276_v54, 8.507059e+37  ;;  %v1339_v22 = vmul.f32 %v1335_v1, %v3975_v63  ;;  %3288 = vpow2.f32 %v1343_v28 }
 0x727   :  { %v1301_v15 = vadd.f32 -1.4531521, %v1297_v23  ;;  %v1255_v55 = vmul.f32 %v3283_v21, %v1254_v13  ;;  %v3443_v13 = vmov -1.0   ;;  %v1210_v54 = vmul.f32 0.5, %v3959_v47 }
 0x729   :  { %v1305_v35 = vmul.f32 %v1301_v15, %v1250_v32  ;;  %v1256_v34 = vadd.f32 %v3283_v21, %v1255_v55  ;;  %v1221_v15 = vsel %vm1217_vm4, 1.0, %v3443_v13  ;;  %v1345_v55 = vmul.f32 1.442695, %v1339_v22 }
 0x72a   :  { %v3285_v59 = vpop.eup %3284 }
 0x72b   :  { %v1309_v50 = vadd.f32 1.4214138, %v1305_v35  ;;  %v1268_v38 = vmul.f32 %v3285_v59, %v1235_v61  ;;  %v1260_v62 = vsel %vm1259_vm12, %v3283_v21, %v1256_v34  ;;  %vm1273_vm14 = vweird.f32 %v3285_v59  ;;  %v3287_v7 = vpop.eup %3286 }
 0x72c   :  { %v1265_v48 = vsel %vm1262_vm13, %v1264_v36, %v1260_v62  ;;  %vm1274_vm0 = vmor %vm1272_vm15, %vm1273_vm14  ;;  %v1209_v35 = vmul.f32 0.5, %v3952_v49  ;;  %v3289_v63 = vpop.eup %3288  ;;  %3290 = vpow2.f32 %v1345_v55 }
 0x72d   :  { %v1313_v39 = vmul.f32 %v1309_v50, %v1250_v32  ;;  %v1269_v44 = vsub.f32 1.0, %v1268_v38  ;;  %v1298_v11 = vmul.f32 1.0614054, %v1265_v48 }
 0x72f   :  { %v1317_v30 = vadd.f32 -0.28449672, %v1313_v39  ;;  %v1270_v52 = vmul.f32 %v3285_v59, %v1269_v44  ;;  %v1302_v9 = vadd.f32 -1.4531521, %v1298_v11  ;;  %v1222_v44 = vsel %vm1218_vm6, 1.0, %v3443_v13 }
 0x731   :  { %v1321_v57 = vmul.f32 %v1317_v30, %v1250_v32  ;;  %v1271_v25 = vadd.f32 %v3285_v59, %v1270_v52  ;;  %v1306_v53 = vmul.f32 %v1302_v9, %v1265_v48 }
 0x733   :  { %v1325_v60 = vadd.f32 0.2548296, %v1321_v57  ;;  %v1275_v27 = vsel %vm1274_vm0, %v3285_v59, %v1271_v25  ;;  %v1310_v42 = vadd.f32 1.4214138, %v1306_v53  ;;  %v1223_v53 = vsel %vm1219_vm7, 1.0, %v3443_v13 }
 0x734   :  { %v1280_v26 = vsel %vm1277_vm3, %v1279_v2, %v1275_v27 }
 0x735   :  { %v1329_v4 = vmul.f32 %v1325_v60, %v1250_v32  ;;  %v1299_v8 = vmul.f32 1.0614054, %v1280_v26  ;;  %v1314_v21 = vmul.f32 %v1310_v42, %v1265_v48  ;;  %v1211_v60 = vmul.f32 0.5, %v3969_v58 }
 0x737   :  { %v1349_v51 = vmul.f32 %v3287_v7, %v1329_v4  ;;  %v1303_v61 = vadd.f32 -1.4531521, %v1299_v8  ;;  %v1318_v56 = vadd.f32 -0.28449672, %v1314_v21 }
 0x739   :  { %v1353_v10 = vsub.f32 1.0, %v1349_v51  ;;  %v1307_v23 = vmul.f32 %v1303_v61, %v1280_v26  ;;  %v1322_v18 = vmul.f32 %v1318_v56, %v1265_v48 }
 0x73b   :  { %v1357_v24 = vmul.f32 %v1353_v10, %v1221_v15  ;;  %v1311_v32 = vadd.f32 1.4214138, %v1307_v23  ;;  %v1326_v31 = vadd.f32 0.2548296, %v1322_v18 }
 0x73d   :  { %v1361_v59 = vadd.f32 1.0, %v1357_v24  ;;  %v1315_v16 = vmul.f32 %v1311_v32, %v1280_v26  ;;  %v1330_v50 = vmul.f32 %v1326_v31, %v1265_v48 }
 0x73e   :  { %v1206_v34 = vpop.f32.mrf.mxu3 }
 0x73f   :  { %v1365_v38 = vmul.f32 %v1361_v59, %v1209_v35  ;;  %v3986_v36 = vadd.f32 %v1206_v34, %v3949_v40  ;;  %v1319_v45 = vadd.f32 -0.28449672, %v1315_v16  ;;  %v1350_v62 = vmul.f32 %v3289_v63, %v1330_v50  ;;  %v3291_v40 = vpop.eup %3290 }
 0x741   :  { %v1216_v39 = vmul.f32 0.70710677, %v3986_v36  ;;  %3053 = vmatmul.msk.f32.vlgmr.msrb.gmra.mxu0 %vm1378_vm5, %v1365_v38  ;;  %v1323_v49 = vmul.f32 %v1319_v45, %v1280_v26  ;;  %v1354_v29 = vsub.f32 1.0, %v1350_v62  ;;  %v1212_v63 = vmul.f32 0.5, %v3986_v36 }
 0x742   :  { %v1377_v62 = vperm.slane %v3889_v41, 7 }
 0x743   :  { %v1228_v43 = vand.u32 2147483647, %v1216_v39  ;;  %v1327_v48 = vadd.f32 0.2548296, %v1323_v49  ;;  %v1358_v11 = vmul.f32 %v1354_v29, %v1222_v44  ;;  %vm1220_vm12 = vcmp.ge.f32.partialorder %v1216_v39, 0.0 }
 0x744   :  { %v1224_v34 = vsel %vm1220_vm12, 1.0, %v3443_v13 }
 0x745   :  { %v1232_v30 = vmul.f32 0.3275911, %v1228_v43  ;;  %v1331_v52 = vmul.f32 %v1327_v48, %v1280_v26  ;;  %v1362_v9 = vadd.f32 1.0, %v1358_v11  ;;  %v1336_v51 = vsub.f32 0.0, %v1228_v43 }
 0x747   :  { %v1236_v0 = vadd.f32 1.0, %v1232_v30  ;;  %v1351_v57 = vmul.f32 %v3291_v40, %v1331_v52  ;;  %v1366_v46 = vmul.f32 %v1362_v9, %v1210_v54  ;;  %v1340_v56 = vmul.f32 %v1336_v51, %v1228_v43  ;;  %v1525_v51 = vld [vmem:[#allocation2 + $0xe8] sm:$0xff] }
 0x748   :  { %1551 = vmatpush.msrb.mxu1 %v1525_v51 }
 0x749   :  { %3292 = vrcp.f32 %v1236_v0  ;;  %3054 = vmatmul.msk.f32.gmra.mxu0 %vm1378_vm5, %v1366_v46  ;;  %v1355_v25 = vsub.f32 1.0, %v1351_v57  ;;  %v1293_v4 = vand.u32 2147483648, %v1236_v0  ;;  %v1291_v17 = vand.u32 2147483647, %v1236_v0 }
 0x74a   :  { %vm1287_vm9 = vweird.f32 %v1236_v0  ;;  %v1347_v15 = vmul.f32 1.442695, %v1340_v56  ;;  %v1523_v56 = vld [vmem:[#allocation2 + $0xd8] sm:$0xff] }
 0x74b   :  { %v1359_v2 = vmul.f32 %v1355_v25, %v1223_v53  ;;  %v1294_v7 = vor.u32 1.1754944e-38, %v1293_v4  ;;  %vm1292_vm11 = vcmp.eq.f32.partialorder %v1291_v17, 8.507059e+37 }
 0x74c   :  { %3294 = vpow2.f32 %v1347_v15  ;;  %v1568_v15 = vld [vmem:[#allocation2 + $0x150] sm:$0xff] }
 0x74d   :  { %v1363_v27 = vadd.f32 1.0, %v1359_v2 }
 0x74f   :  { %v3293_v1 = vpop.eup %3292  ;;  %v1367_v26 = vmul.f32 %v1363_v27, %v1211_v60 }
 0x750   :  { %v1283_v42 = vmul.f32 %v3293_v1, %v1236_v0  ;;  %vm1288_vm8 = vweird.f32 %v3293_v1 }
 0x751   :  { %3055 = vmatmul.msk.f32.gmra.mxu0 %vm1378_vm5, %v1367_v26  ;;  %vm1289_vm10 = vmor %vm1287_vm9, %vm1288_vm8 }
 0x752   :  { %v1284_v47 = vsub.f32 1.0, %v1283_v42  ;;  %v3295_v35 = vpop.eup %3294 }
 0x754   :  { %v1285_v28 = vmul.f32 %v3293_v1, %v1284_v47 }
 0x756   :  { %v1286_v8 = vadd.f32 %v3293_v1, %v1285_v28 }
 0x758   :  { %v1290_v21 = vsel %vm1289_vm10, %v3293_v1, %v1286_v8 }
 0x759   :  { %v1295_v61 = vsel %vm1292_vm11, %v1294_v7, %v1290_v21 }
 0x75a   :  { %v1300_v58 = vmul.f32 1.0614054, %v1295_v61 }
 0x75c   :  { %v1304_v22 = vadd.f32 -1.4531521, %v1300_v58  ;;  %v1524_v58 = vld [vmem:[#allocation2 + $0xe0] sm:$0xff] }
 0x75d   :  { %1552 = vmatpush.msrb.mxu1 %v1524_v58 }
 0x75e   :  { %v1308_v10 = vmul.f32 %v1304_v22, %v1295_v61  ;;  %v1570_v22 = vld [vmem:[#allocation2 + $0x160] sm:$0xff] }
 0x75f   :  { %1553 = vmatpush.msrb.mxu1 %v1523_v56 }
 0x760   :  { %v1312_v23 = vadd.f32 1.4214138, %v1308_v10  ;;  %v1569_v10 = vld [vmem:[#allocation2 + $0x158] sm:$0xff] }
 0x762   :  { %v1316_v18 = vmul.f32 %v1312_v23, %v1295_v61  ;;  %v1522_v23 = vld [vmem:[#allocation2 + $0xd0] sm:$0xff] }
 0x763   :  { %1554 = vmatpush.msrb.mxu1 %v1522_v23 }
 0x764   :  { %v1320_v24 = vadd.f32 -0.28449672, %v1316_v18 }
 0x766   :  { %v1324_v32 = vmul.f32 %v1320_v24, %v1295_v61 }
 0x768   :  { %v1328_v55 = vadd.f32 0.2548296, %v1324_v32 }
 0x76a   :  { %v1332_v31 = vmul.f32 %v1328_v55, %v1295_v61  ;;  %v1571_v61 = vld [vmem:[#allocation2 + $0x168] sm:$0xff] }
 0x76b   :  { %1584 = vmatpush.msra.mxu2 %v1571_v61 }
 0x76c   :  { %v1352_v59 = vmul.f32 %v3295_v35, %v1332_v31 }
 0x76d   :  { %1585 = vmatpush.msra.mxu2 %v1570_v22 }
 0x76e   :  { %v1356_v16 = vsub.f32 1.0, %v1352_v59 }
 0x76f   :  { %1586 = vmatpush.msra.mxu2 %v1569_v10 }
 0x770   :  { %v1360_v50 = vmul.f32 %v1356_v16, %v1224_v34 }
 0x771   :  { %1587 = vmatpush.msra.mxu2 %v1568_v15 }
 0x772   :  { %v1364_v38 = vadd.f32 1.0, %v1360_v50 }
 0x774   :  { %v1368_v45 = vmul.f32 %v1364_v38, %v1212_v63  ;;  %v4039_v38 = vld [vmem:[%s4623_s2 + $0x8] sm:$0xff] }
 0x776   :  { %3056 = vmatmul.msk.f32.gmra.mxu0 %vm1378_vm5, %v1368_v45 }
 0x7be   :  { %v1408_v49 = vpop.f32.mrf.mxu0 }
 0x7bf   :  { %v1409_v29 = vadd.f32 %v1408_v49, %v1377_v62 }
 0x7c1   :  { %v1420_v44 = vadd.f32 %v1409_v29, %v3928_v19 }
 0x7c3   :  { %v1424_v43 = vsel %vm105_vm1, %v1420_v44, 0.0 }
 0x7c4   :  { %1425 = vadd.xlane.f32.xlu0 %v1424_v43  ;;  %v1512_v43 = vperm.slane %v4039_v38, 0 }
 0x7c6   :  { %v1411_v39 = vpop.f32.mrf.mxu0 }
 0x7c7   :  { %v1412_v48 = vadd.f32 %v1411_v39, %v1377_v62 }
 0x7c9   :  { %v1421_v11 = vadd.f32 %v1412_v48, %v3933_v33 }
 0x7cb   :  { %v1427_v30 = vsel %vm105_vm1, %v1421_v11, 0.0 }
 0x7cc   :  { %1428 = vadd.xlane.f32.xlu1 %v1427_v30 }
 0x7ce   :  { %v1414_v36 = vpop.f32.mrf.mxu0 }
 0x7cf   :  { %v1415_v52 = vadd.f32 %v1414_v36, %v1377_v62  ;;  %v1517_v36 = vperm.slane %v4039_v38, 1 }
 0x7d1   :  { %v1422_v40 = vadd.f32 %v1415_v52, %v3938_v14 }
 0x7d3   :  { %v1430_v41 = vsel %vm105_vm1, %v1422_v40, 0.0 }
 0x7d4   :  { %1431 = vadd.xlane.f32.xlu2 %v1430_v41 }
 0x7f3   :  { %v1417_v54 = vpop.f32.mrf.mxu0 }
 0x7f4   :  { %v1418_v9 = vadd.f32 %v1417_v54, %v1377_v62 }
 0x7f6   :  { %v1423_v19 = vadd.f32 %v1418_v9, %v3944_v37 }
 0x7f8   :  { %v1433_v0 = vsel %vm105_vm1, %v1423_v19, 0.0 }
 0x7f9   :  { %1434 = vadd.xlane.f32.xlu0 %v1433_v0 }
 0x837   :  { %v1426_v57 = vpop.xlane.xlu0 %1425 }
 0x838   :  { %v1436_v33 = vmul.f32 %v1426_v57, %v3901_v5 }
 0x83a   :  { %v4011_v46 = vsub.f32 %v1420_v44, %v1436_v33 }
 0x83c   :  { %v1444_v25 = vmul.f32 %v4011_v46, %v4011_v46 }
 0x83e   :  { %v1448_v14 = vsel %vm105_vm1, %v1444_v25, 0.0 }
 0x83f   :  { %1449 = vadd.xlane.f32.xlu1 %v1448_v14  ;;  %v1429_v53 = vpop.xlane.xlu1 %1428 }
 0x840   :  { %v1437_v2 = vmul.f32 %v1429_v53, %v3901_v5 }
 0x842   :  { %v4017_v60 = vsub.f32 %v1421_v11, %v1437_v2 }
 0x844   :  { %v1445_v37 = vmul.f32 %v4017_v60, %v4017_v60 }
 0x846   :  { %v1451_v27 = vsel %vm105_vm1, %v1445_v37, 0.0 }
 0x847   :  { %v1432_v1 = vpop.xlane.xlu2 %1431  ;;  %1452 = vadd.xlane.f32.xlu2 %v1451_v27 }
 0x848   :  { %v1438_v42 = vmul.f32 %v1432_v1, %v3901_v5 }
 0x84a   :  { %v4023_v26 = vsub.f32 %v1422_v40, %v1438_v42 }
 0x84c   :  { %v1446_v47 = vmul.f32 %v4023_v26, %v4023_v26 }
 0x84e   :  { %v1454_v4 = vsel %vm105_vm1, %v1446_v47, 0.0 }
 0x84f   :  { %1455 = vadd.xlane.f32.xlu0 %v1454_v4 }
 0x86c   :  { %v1435_v28 = vpop.xlane.xlu0 %1434 }
 0x86d   :  { %v1439_v17 = vmul.f32 %v1435_v28, %v3901_v5 }
 0x86f   :  { %v4029_v8 = vsub.f32 %v1423_v19, %v1439_v17 }
 0x871   :  { %v1447_v7 = vmul.f32 %v4029_v8, %v4029_v8 }
 0x873   :  { %v1457_v21 = vsel %vm105_vm1, %v1447_v7, 0.0 }
 0x874   :  { %1458 = vadd.xlane.f32.xlu1 %v1457_v21 }
 0x8b2   :  { %v1450_v18 = vpop.xlane.xlu1 %1449 }
 0x8b3   :  { %v1460_v24 = vmul.f32 %v1450_v18, %v3901_v5  ;;  %v1526_v18 = vperm.slane %v4039_v38, 2 }
 0x8b5   :  { %v1464_v32 = vadd.f32 1e-05, %v1460_v24 }
 0x8b7   :  { %3296 = vrsqrt.f32 %v1464_v32  ;;  %vm1474_vm14 = vweird.f32 %v1464_v32 }
 0x8ba   :  { %v1453_v55 = vpop.xlane.xlu2 %1452 }
 0x8bb   :  { %v1461_v31 = vmul.f32 %v1453_v55, %v3901_v5 }
 0x8bd   :  { %v3297_v35 = vpop.eup %3296  ;;  %v1465_v16 = vadd.f32 1e-05, %v1461_v31 }
 0x8be   :  { %v1469_v59 = vmul.f32 %v3297_v35, %v1464_v32  ;;  %vm1475_vm13 = vweird.f32 %v3297_v35 }
 0x8bf   :  { %3298 = vrsqrt.f32 %v1465_v16  ;;  %vm1476_vm15 = vmor %vm1474_vm14, %vm1475_vm13  ;;  %vm1484_vm3 = vweird.f32 %v1465_v16 }
 0x8c0   :  { %v1470_v34 = vmul.f32 %v3297_v35, %v1469_v59 }
 0x8c2   :  { %v1471_v50 = vmul.f32 0.5, %v1470_v34  ;;  %v1456_v63 = vpop.xlane.xlu0 %1455 }
 0x8c3   :  { %v1462_v62 = vmul.f32 %v1456_v63, %v3901_v5 }
 0x8c4   :  { %v1472_v45 = vsub.f32 1.5, %v1471_v50 }
 0x8c5   :  { %v3299_v49 = vpop.eup %3298  ;;  %v1466_v44 = vadd.f32 1e-05, %v1462_v62 }
 0x8c6   :  { %v1473_v29 = vmul.f32 %v3297_v35, %v1472_v45  ;;  %v1479_v39 = vmul.f32 %v3299_v49, %v1465_v16  ;;  %vm1485_vm0 = vweird.f32 %v3299_v49 }
 0x8c7   :  { %3300 = vrsqrt.f32 %v1466_v44  ;;  %vm1486_vm4 = vmor %vm1484_vm3, %vm1485_vm0  ;;  %vm1494_vm7 = vweird.f32 %v1466_v44 }
 0x8c8   :  { %v1477_v48 = vsel %vm1476_vm15, %v3297_v35, %v1473_v29  ;;  %v1480_v30 = vmul.f32 %v3299_v49, %v1479_v39 }
 0x8c9   :  { %v1508_v11 = vmul.f32 %v1477_v48, %v4011_v46 }
 0x8ca   :  { %v1481_v40 = vmul.f32 0.5, %v1480_v30 }
 0x8cb   :  { %v1513_v52 = vmul.f32 %v1512_v43, %v1508_v11 }
 0x8cc   :  { %v1482_v41 = vsub.f32 1.5, %v1481_v40 }
 0x8cd   :  { %v4045_v54 = vadd.f32 %v1517_v36, %v1513_v52  ;;  %v3301_v9 = vpop.eup %3300 }
 0x8ce   :  { %v1483_v19 = vmul.f32 %v3299_v49, %v1482_v41  ;;  %v1489_v0 = vmul.f32 %v3301_v9, %v1466_v44  ;;  %vm1495_vm6 = vweird.f32 %v3301_v9 }
 0x8cf   :  { %3057 = vmatmul.msk.f32.vlgmr.msrb.gmra.mxu1 %vm105_vm1, %v4045_v54  ;;  %3061 = vmatmul.msk.f32.vlgmr.msra.gmra.mxu2 %vm105_vm1, %v4045_v54  ;;  %vm1496_vm8 = vmor %vm1494_vm7, %vm1495_vm6 }
 0x8d0   :  { %v1487_v57 = vsel %vm1486_vm4, %v3299_v49, %v1483_v19  ;;  %v1490_v33 = vmul.f32 %v3301_v9, %v1489_v0 }
 0x8d1   :  { %v1509_v46 = vmul.f32 %v1487_v57, %v4017_v60 }
 0x8d2   :  { %v1491_v25 = vmul.f32 0.5, %v1490_v33 }
 0x8d3   :  { %v1514_v14 = vmul.f32 %v1512_v43, %v1509_v46 }
 0x8d4   :  { %v1492_v53 = vsub.f32 1.5, %v1491_v25 }
 0x8d5   :  { %v4052_v2 = vadd.f32 %v1517_v36, %v1514_v14 }
 0x8d6   :  { %v1493_v37 = vmul.f32 %v3301_v9, %v1492_v53 }
 0x8d7   :  { %3058 = vmatmul.msk.f32.gmra.mxu1 %vm105_vm1, %v4052_v2  ;;  %3062 = vmatmul.msk.f32.gmra.mxu2 %vm105_vm1, %v4052_v2 }
 0x8d8   :  { %v1497_v27 = vsel %vm1496_vm8, %v3301_v9, %v1493_v37 }
 0x8d9   :  { %v1510_v1 = vmul.f32 %v1497_v27, %v4023_v26 }
 0x8db   :  { %v1515_v42 = vmul.f32 %v1512_v43, %v1510_v1 }
 0x8dd   :  { %v4059_v60 = vadd.f32 %v1517_v36, %v1515_v42 }
 0x8df   :  { %3059 = vmatmul.msk.f32.gmra.mxu1 %vm105_vm1, %v4059_v60  ;;  %3063 = vmatmul.msk.f32.gmra.mxu2 %vm105_vm1, %v4059_v60 }
 0x8e7   :  { %v1459_v47 = vpop.xlane.xlu1 %1458 }
 0x8e8   :  { %v1463_v4 = vmul.f32 %v1459_v47, %v3901_v5 }
 0x8ea   :  { %v1467_v28 = vadd.f32 1e-05, %v1463_v4 }
 0x8ec   :  { %3302 = vrsqrt.f32 %v1467_v28  ;;  %vm1504_vm10 = vweird.f32 %v1467_v28 }
 0x8f2   :  { %v3303_v17 = vpop.eup %3302 }
 0x8f3   :  { %v1499_v7 = vmul.f32 %v3303_v17, %v1467_v28  ;;  %vm1505_vm9 = vweird.f32 %v3303_v17 }
 0x8f4   :  { %vm1506_vm11 = vmor %vm1504_vm10, %vm1505_vm9 }
 0x8f5   :  { %v1500_v21 = vmul.f32 %v3303_v17, %v1499_v7 }
 0x8f7   :  { %v1501_v51 = vmul.f32 0.5, %v1500_v21 }
 0x8f9   :  { %v1502_v61 = vsub.f32 1.5, %v1501_v51 }
 0x8fb   :  { %v1503_v26 = vmul.f32 %v3303_v17, %v1502_v61 }
 0x8fd   :  { %v1507_v58 = vsel %vm1506_vm11, %v3303_v17, %v1503_v26 }
 0x8fe   :  { %v1511_v22 = vmul.f32 %v1507_v58, %v4029_v8 }
 0x900   :  { %v1516_v56 = vmul.f32 %v1512_v43, %v1511_v22 }
 0x902   :  { %v4067_v10 = vadd.f32 %v1517_v36, %v1516_v56 }
 0x904   :  { %3060 = vmatmul.msk.f32.gmra.mxu1 %vm105_vm1, %v4067_v10  ;;  %3064 = vmatmul.msk.f32.gmra.mxu2 %vm105_vm1, %v4067_v10 }
 0x94c   :  { %v1556_v23 = vpop.f32.mrf.mxu1 }
 0x94d   :  { %v4086_v59 = vadd.f32 %v1556_v23, %v1526_v18 }
 0x952   :  { %v1589_v15 = vpop.f32.mrf.mxu2 }
 0x954   :  { %v1559_v24 = vpop.f32.mrf.mxu1 }
 0x955   :  { %v4074_v32 = vadd.f32 %v1559_v24, %v1526_v18 }
 0x957   :  { %1772 = vrot.lane.b32.xlu1 %v4074_v32, %s3433_s28 }
 0x95a   :  { %v1592_v8 = vpop.f32.mrf.mxu2 }
 0x95b   :  { %v4078_v55 = vpack.i.bf16 %v1589_v15, %v1592_v8 }
 0x95c   :  { %v1562_v31 = vpop.f32.mrf.mxu1 }
 0x95d   :  { %v4080_v35 = vadd.f32 %v1562_v31, %v1526_v18 }
 0x95f   :  { %1774 = vrot.lane.b32.xlu0 %v4080_v35, %s3433_s28  ;;  %1764 = vrot.lane.b32.xlu1 %v4074_v32, %s3432_s0 }
 0x962   :  { %v1595_v16 = vpop.f32.mrf.mxu2 }
 0x967   :  { %1609 = vrot.lane.b32.xlu1 %v4080_v35, %s3434_s29  ;;  %1770 = vrot.lane.b32.xlu0 %v4086_v59, %s3433_s28 }
 0x96f   :  { %3177 = vrot.lane.b32.xlu1 %v4078_v55, %s3434_s29  ;;  %1766 = vrot.lane.b32.xlu0 %v4080_v35, %s3432_s0 }
 0x977   :  { %1607 = vrot.lane.b32.xlu0 %v4074_v32, %s3434_s29 }
 0x97f   :  { %1605 = vrot.lane.b32.xlu0 %v4086_v59, %s3434_s29 }
 0x981   :  { %v1565_v34 = vpop.f32.mrf.mxu1 }
 0x982   :  { %v4100_v50 = vadd.f32 %v1565_v34, %v1526_v18 }
 0x984   :  { %1776 = vrot.lane.b32.xlu2 %v4100_v50, %s3433_s28 }
 0x987   :  { %v1598_v63 = vpop.f32.mrf.mxu2  ;;  %2261 = vrot.lane.b32.xlu0 %v4100_v50, %s3436_s4 }
 0x988   :  { %2008 = vmatpush.msrb.mxu2 %v1598_v63  ;;  %v4106_v38 = vpack.i.bf16 %v1595_v16, %v1598_v63 }
 0x98a   :  { %3182 = vrot.lane.b32.xlu1 %v4106_v38, %s3434_s29  ;;  %2009 = vmatpush.msrb.mxu2 %v1595_v16 }
 0x98c   :  { %2010 = vmatpush.msrb.mxu2 %v1592_v8  ;;  %1762 = vrot.lane.b32.xlu2 %v4086_v59, %s3432_s0 }
 0x98e   :  { %2011 = vmatpush.msrb.mxu2 %v1589_v15 }
 0x994   :  { %1768 = vrot.lane.b32.xlu2 %v4100_v50, %s3432_s0 }
 0x99c   :  { %2037 = vrot.lane.b32.xlu2 %v4080_v35, %s3435_s30 }
 0x9a4   :  { %1611 = vrot.lane.b32.xlu2 %v4100_v50, %s3434_s29 }
 0x9ac   :  { %2039 = vrot.lane.b32.xlu2 %v4100_v50, %s3435_s30 }
 0x9c9   :  { %v1773_v62 = vpop.permute.xlu1 %1772 }
 0x9d1   :  { %v1775_v45 = vpop.permute.xlu0 %1774  ;;  %v1765_v44 = vpop.permute.xlu1 %1764 }
 0x9d9   :  { %v1771_v49 = vpop.permute.xlu0 %1770  ;;  %v1610_v48 = vpop.permute.xlu1 %1609 }
 0x9de   :  { %v1777_v29 = vpop.permute.xlu2 %1776 }
 0x9df   :  { %3073 = vmatpush.xpose.msk.msra.mxu0 %vm192_vm2, %v1777_v29 }
 0x9e1   :  { %v1767_v39 = vpop.permute.xlu0 %1766  ;;  %v3178_v36 = vpop.permute.xlu1 %3177 }
 0x9e2   :  { %v3179_v57 = vunpack.i.l.bf16 %v3178_v36  ;;  %v3180_v33 = vunpack.i.h.bf16 %v3178_v36 }
 0x9e3   :  { %3074 = vmatpush.xpose.msk.msra.mxu0 %vm192_vm2, %v1775_v45 }
 0x9e6   :  { %v1763_v43 = vpop.permute.xlu2 %1762 }
 0x9e7   :  { %3075 = vmatpush.xpose.msk.msra.mxu0 %vm192_vm2, %v1773_v62 }
 0x9e9   :  { %v1608_v30 = vpop.permute.xlu0 %1607 }
 0x9eb   :  { %3076 = vmatpush.xpose.msk.msra.mxu0 %vm192_vm2, %v1771_v49 }
 0x9ee   :  { %v1769_v11 = vpop.permute.xlu2 %1768  ;;  %3077 = vmatmul.msk.f32.vlgmr.msra.gmra.mxu0 %vm192_vm2, %v1763_v43 }
 0x9f1   :  { %v1606_v40 = vpop.permute.xlu0 %1605 }
 0x9f6   :  { %v2038_v52 = vpop.permute.xlu2 %2037  ;;  %3078 = vmatmul.msk.f32.gmra.mxu0 %vm192_vm2, %v1765_v44 }
 0x9f9   :  { %v2262_v46 = vpop.permute.xlu0 %2261 }
 0x9fc   :  { %v3183_v41 = vpop.permute.xlu1 %3182 }
 0x9fd   :  { %v3184_v9 = vunpack.i.l.bf16 %v3183_v41  ;;  %v3185_v0 = vunpack.i.h.bf16 %v3183_v41 }
 0x9fe   :  { %v1612_v19 = vpop.permute.xlu2 %1611  ;;  %3079 = vmatmul.msk.f32.gmra.mxu0 %vm192_vm2, %v1767_v39 }
 0x9ff   :  { %3065 = vmatpush.xpose.msk.msra.mxu3 %vm192_vm2, %v1612_v19  ;;  %1967 = vmatpush.msra.mxu1 %v3184_v9 }
 0xa01   :  { %1968 = vmatpush.msra.mxu1 %v3185_v0 }
 0xa03   :  { %3066 = vmatpush.xpose.msk.msra.mxu3 %vm192_vm2, %v1610_v48  ;;  %1969 = vmatpush.msra.mxu1 %v3179_v57 }
 0xa05   :  { %1970 = vmatpush.msra.mxu1 %v3180_v33 }
 0xa06   :  { %3080 = vmatmul.msk.f32.gmra.mxu0 %vm192_vm2, %v1769_v11  ;;  %v2040_v25 = vpop.permute.xlu2 %2039 }
 0xa07   :  { %3101 = vmatpush.xpose.msk.msrb.mxu1 %vm192_vm2, %v2262_v46  ;;  %3067 = vmatpush.xpose.msk.msra.mxu3 %vm192_vm2, %v1608_v30 }
 0xa0b   :  { %3068 = vmatpush.xpose.msk.msra.mxu3 %vm192_vm2, %v1606_v40 }
 0xa0e   :  { %3069 = vmatmul.msk.f32.vlgmr.msra.gmra.mxu3 %vm192_vm2, %v4086_v59 }
 0xa0f   :  { %3089 = vmatpush.xpose.msk.msrb.mxu3 %vm192_vm2, %v2040_v25 }
 0xa13   :  { %3090 = vmatpush.xpose.msk.msrb.mxu3 %vm192_vm2, %v2038_v52 }
 0xa16   :  { %3070 = vmatmul.msk.f32.gmra.mxu3 %vm192_vm2, %v4074_v32 }
 0xa1e   :  { %3071 = vmatmul.msk.f32.gmra.mxu3 %vm192_vm2, %v4080_v35 }
 0xa26   :  { %3072 = vmatmul.msk.f32.gmra.mxu3 %vm192_vm2, %v4100_v50 }
 0xa6b   :  { %v1811_v14 = vpop.f32.mrf.mxu0 }
 0xa6c   :  { %v1823_v53 = vmul.f32 0.35355338, %v1811_v14 }
 0xa6e   :  { %v1827_v37 = vadd.f32 %v1823_v53, %v3605_v6 }
 0xa70   :  { %v1831_v27 = vsel %vm105_vm1, %v1827_v37, -inf }
 0xa71   :  { %1832 = vmax.xlane.f32.xlu1 %v1831_v27 }
 0xa73   :  { %v1814_v1 = vpop.f32.mrf.mxu0 }
 0xa74   :  { %v1824_v42 = vmul.f32 0.35355338, %v1814_v1 }
 0xa76   :  { %v1828_v47 = vadd.f32 %v1824_v42, %v3609_v12 }
 0xa78   :  { %v1834_v4 = vsel %vm105_vm1, %v1828_v47, -inf }
 0xa79   :  { %1835 = vmax.xlane.f32.xlu0 %v1834_v4 }
 0xa7b   :  { %v1817_v28 = vpop.f32.mrf.mxu0 }
 0xa7c   :  { %v1825_v17 = vmul.f32 0.35355338, %v1817_v28 }
 0xa7e   :  { %v1829_v7 = vadd.f32 %v1825_v17, %v3613_v20 }
 0xa80   :  { %v1837_v21 = vsel %vm105_vm1, %v1829_v7, -inf }
 0xa81   :  { %1838 = vmax.xlane.f32.xlu2 %v1837_v21 }
 0xa83   :  { %v1820_v51 = vpop.f32.mrf.mxu0 }
 0xa84   :  { %v1826_v61 = vmul.f32 0.35355338, %v1820_v51 }
 0xa86   :  { %v1830_v26 = vadd.f32 %v1826_v61, %v3603_v3 }
 0xa88   :  { %v1840_v58 = vsel %vm105_vm1, %v1830_v26, -inf }
 0xa89   :  { %1841 = vmax.xlane.f32.xlu1 %v1840_v58 }
 0xa8d   :  { %2257 = vrot.lane.b32.xlu0 %v4074_v32, %s3436_s4 }
 0xa91   :  { %v1646_v40 = vpop.f32.mrf.mxu3 }
 0xa92   :  { %v1658_v19 = vmul.f32 0.35355338, %v1646_v40 }
 0xa94   :  { %v4198_v57 = vadd.f32 %v1658_v19, %v3605_v6 }
 0xa99   :  { %2035 = vrot.lane.b32.xlu2 %v4074_v32, %s3435_s30  ;;  %v1649_v41 = vpop.f32.mrf.mxu3 }
 0xaa1   :  { %v1652_v9 = vpop.f32.mrf.mxu3 }
 0xaa2   :  { %2259 = vrot.lane.b32.xlu1 %v4080_v35, %s3436_s4  ;;  %v1660_v21 = vmul.f32 0.35355338, %v1652_v9 }
 0xaa9   :  { %v1655_v33 = vpop.f32.mrf.mxu3 }
 0xaaa   :  { %v1661_v25 = vmul.f32 0.35355338, %v1655_v33 }
 0xae4   :  { %v1833_v22 = vpop.xlane.xlu1 %1832 }
 0xae5   :  { %v1843_v56 = vsub.f32 %v1827_v37, %v1833_v22 }
 0xae7   :  { %v1847_v23 = vmul.f32 1.442695, %v1843_v56 }
 0xae9   :  { %3304 = vpow2.f32 %v1847_v23 }
 0xaec   :  { %v1836_v15 = vpop.xlane.xlu0 %1835 }
 0xaed   :  { %v1844_v18 = vsub.f32 %v1828_v47, %v1836_v15 }
 0xaef   :  { %v4157_v24 = vpop.eup %3304  ;;  %v1849_v8 = vmul.f32 1.442695, %v1844_v18 }
 0xaf0   :  { %v1855_v31 = vsel %vm105_vm1, %v4157_v24, 0.0 }
 0xaf1   :  { %3306 = vpow2.f32 %v1849_v8  ;;  %1856 = vadd.xlane.f32.xlu0 %v1855_v31  ;;  %v4215_v8 = vadd.f32 %v1660_v21, %v3613_v20 }
 0xaf4   :  { %v1839_v16 = vpop.xlane.xlu2 %1838 }
 0xaf5   :  { %v1845_v11 = vsub.f32 %v1829_v7, %v1839_v16 }
 0xaf7   :  { %v4161_v34 = vpop.eup %3306  ;;  %v1851_v30 = vmul.f32 1.442695, %v1845_v11 }
 0xaf8   :  { %v1858_v63 = vsel %vm105_vm1, %v4161_v34, 0.0 }
 0xaf9   :  { %1859 = vadd.xlane.f32.xlu2 %v1858_v63 }
 0xafc   :  { %v2036_v45 = vpop.permute.xlu2 %2035  ;;  %v1842_v62 = vpop.xlane.xlu1 %1841 }
 0xafd   :  { %v1846_v49 = vsub.f32 %v1830_v26, %v1842_v62  ;;  %3091 = vmatpush.xpose.msk.msrb.mxu3 %vm192_vm2, %v2036_v45 }
 0xaff   :  { %v1853_v29 = vmul.f32 1.442695, %v1846_v49  ;;  %v2258_v48 = vpop.permute.xlu0 %2257 }
 0xb01   :  { %3308 = vpow2.f32 %v1853_v29 }
 0xb02   :  { %3310 = vpow2.f32 %v1851_v30 }
 0xb05   :  { %2255 = vrot.lane.b32.xlu0 %v4086_v59, %s3436_s4 }
 0xb07   :  { %v4168_v44 = vpop.eup %3308 }
 0xb08   :  { %v1864_v43 = vsel %vm105_vm1, %v4168_v44, 0.0  ;;  %v4186_v36 = vpop.eup %3310 }
 0xb09   :  { %1865 = vadd.xlane.f32.xlu1 %v1864_v43  ;;  %v1861_v52 = vsel %vm105_vm1, %v4186_v36, 0.0 }
 0xb11   :  { %2033 = vrot.lane.b32.xlu2 %v4086_v59, %s3435_s30 }
 0xb14   :  { %v2260_v39 = vpop.permute.xlu1 %2259 }
 0xb15   :  { %3102 = vmatpush.xpose.msk.msrb.mxu1 %vm192_vm2, %v2260_v39 }
 0xb19   :  { %2025 = vrot.lane.b32.xlu2 %v4086_v59, %s3437_s5  ;;  %3103 = vmatpush.xpose.msk.msrb.mxu1 %vm192_vm2, %v2258_v48 }
 0xb21   :  { %2249 = vrot.lane.b32.xlu2 %v4074_v32, %s3438_s6 }
 0xb22   :  { %2027 = vrot.lane.b32.xlu1 %v4074_v32, %s3437_s5  ;;  %v1659_v32 = vmul.f32 0.35355338, %v1649_v41 }
 0xb24   :  { %v4195_v0 = vadd.f32 %v1659_v32, %v3609_v12 }
 0xb26   :  { %v1669_v46 = vsel %vm105_vm1, %v4195_v0, -inf }
 0xb29   :  { %2031 = vrot.lane.b32.xlu2 %v4100_v50, %s3437_s5 }
 0xb2a   :  { %2251 = vrot.lane.b32.xlu1 %v4080_v35, %s3438_s6 }
 0xb2f   :  { %1862 = vadd.xlane.f32.xlu0 %v1861_v52 }
 0xb43   :  { %2247 = vrot.lane.b32.xlu0 %v4086_v59, %s3438_s6  ;;  %v1666_v59 = vsel %vm105_vm1, %v4198_v57, -inf }
 0xb4b   :  { %2029 = vrot.lane.b32.xlu0 %v4080_v35, %s3437_s5  ;;  %v4207_v35 = vadd.f32 %v1661_v25, %v3603_v3 }
 0xb4d   :  { %v1675_v14 = vsel %vm105_vm1, %v4207_v35, -inf }
 0xb52   :  { %1670 = vmax.xlane.f32.xlu2 %v1669_v46 }
 0xb53   :  { %2253 = vrot.lane.b32.xlu0 %v4100_v50, %s3438_s6 }
 0xb54   :  { %1667 = vmax.xlane.f32.xlu1 %v1666_v59 }
 0xb5c   :  { %1676 = vmax.xlane.f32.xlu1 %v1675_v14 }
 0xb64   :  { %v1857_v53 = vpop.xlane.xlu0 %1856 }
 0xb65   :  { %3312 = vrcp.f32 %v1857_v53  ;;  %v1878_v47 = vand.u32 2147483648, %v1857_v53  ;;  %v1876_v4 = vand.u32 2147483647, %v1857_v53  ;;  %vm1872_vm13 = vweird.f32 %v1857_v53 }
 0xb67   :  { %v1879_v7 = vor.u32 1.1754944e-38, %v1878_v47  ;;  %vm1877_vm15 = vcmp.eq.f32.partialorder %v1876_v4, 8.507059e+37 }
 0xb6b   :  { %v3313_v37 = vpop.eup %3312 }
 0xb6c   :  { %v1868_v27 = vmul.f32 %v3313_v37, %v1857_v53  ;;  %v1860_v1 = vpop.xlane.xlu2 %1859  ;;  %vm1873_vm12 = vweird.f32 %v3313_v37 }
 0xb6d   :  { %3314 = vrcp.f32 %v1860_v1  ;;  %vm1874_vm14 = vmor %vm1872_vm13, %vm1873_vm12  ;;  %v1893_v23 = vand.u32 2147483648, %v1860_v1  ;;  %v1891_v31 = vand.u32 2147483647, %v1860_v1  ;;  %vm1887_vm3 = vweird.f32 %v1860_v1 }
 0xb6e   :  { %v1869_v42 = vsub.f32 1.0, %v1868_v27 }
 0xb6f   :  { %v1894_v63 = vor.u32 1.1754944e-38, %v1893_v23  ;;  %vm1892_vm6 = vcmp.eq.f32.partialorder %v1891_v31, 8.507059e+37 }
 0xb70   :  { %v1870_v50 = vmul.f32 %v3313_v37, %v1869_v42 }
 0xb72   :  { %v1871_v28 = vadd.f32 %v3313_v37, %v1870_v50 }
 0xb73   :  { %v3315_v17 = vpop.eup %3314 }
 0xb74   :  { %v1875_v51 = vsel %vm1874_vm14, %v3313_v37, %v1871_v28  ;;  %v1883_v61 = vmul.f32 %v3315_v17, %v1860_v1  ;;  %v2034_v26 = vpop.permute.xlu2 %2033  ;;  %vm1888_vm0 = vweird.f32 %v3315_v17 }
 0xb75   :  { %v1880_v58 = vsel %vm1877_vm15, %v1879_v7, %v1875_v51  ;;  %3092 = vmatpush.xpose.msk.msrb.mxu3 %vm192_vm2, %v2034_v26  ;;  %vm1889_vm4 = vmor %vm1887_vm3, %vm1888_vm0 }
 0xb76   :  { %v1884_v22 = vsub.f32 1.0, %v1883_v61  ;;  %v1881_v56 = vmul.f32 %v4157_v24, %v1880_v58  ;;  %v1672_v24 = vsel %vm105_vm1, %v4215_v8, -inf }
 0xb77   :  { %v2256_v15 = vpop.permute.xlu0 %2255 }
 0xb78   :  { %v1885_v18 = vmul.f32 %v3315_v17, %v1884_v22  ;;  %3081 = vmatmul.msk.f32.vlgmr.msra.gmra.mxu1 %vm105_vm1, %v1881_v56 }
 0xb79   :  { %3104 = vmatpush.xpose.msk.msrb.mxu1 %vm192_vm2, %v2256_v15 }
 0xb7a   :  { %v1886_v16 = vadd.f32 %v3315_v17, %v1885_v18 }
 0xb7c   :  { %v2026_v45 = vpop.permute.xlu2 %2025  ;;  %v1890_v62 = vsel %vm1889_vm4, %v3315_v17, %v1886_v16  ;;  %v1866_v43 = vpop.xlane.xlu1 %1865 }
 0xb7d   :  { %3093 = vmatmul.msk.f32.vlgmr.msrb.gmra.mxu3 %vm192_vm2, %v2026_v45  ;;  %1673 = vmax.xlane.f32.xlu0 %v1672_v24  ;;  %v1895_v49 = vsel %vm1892_vm6, %v1894_v63, %v1890_v62  ;;  %3316 = vrcp.f32 %v1866_v43  ;;  %v1923_v53 = vand.u32 2147483648, %v1866_v43  ;;  %vm1917_vm12 = vweird.f32 %v1866_v43 }
 0xb7e   :  { %v1896_v29 = vmul.f32 %v4161_v34, %v1895_v49  ;;  %v1921_v1 = vand.u32 2147483647, %v1866_v43 }
 0xb7f   :  { %v1924_v4 = vor.u32 1.1754944e-38, %v1923_v53 }
 0xb80   :  { %3082 = vmatmul.msk.f32.gmra.mxu1 %vm105_vm1, %v1896_v29  ;;  %vm1922_vm14 = vcmp.eq.f32.partialorder %v1921_v1, 8.507059e+37 }
 0xb83   :  { %v3317_v11 = vpop.eup %3316 }
 0xb84   :  { %v1913_v30 = vmul.f32 %v3317_v11, %v1866_v43  ;;  %vm1918_vm11 = vweird.f32 %v3317_v11  ;;  %v2250_v42 = vpop.permute.xlu2 %2249 }
 0xb85   :  { %vm1919_vm13 = vmor %vm1917_vm12, %vm1918_vm11 }
 0xb86   :  { %v1914_v40 = vsub.f32 1.0, %v1913_v30 }
 0xb88   :  { %v1915_v19 = vmul.f32 %v3317_v11, %v1914_v40 }
 0xb8a   :  { %v1916_v14 = vadd.f32 %v3317_v11, %v1915_v19 }
 0xb8c   :  { %v1920_v50 = vsel %vm1919_vm13, %v3317_v11, %v1916_v14  ;;  %v2032_v21 = vpop.permute.xlu2 %2031 }
 0xb8d   :  { %v1925_v28 = vsel %vm1922_vm14, %v1924_v4, %v1920_v50 }
 0xb8e   :  { %v1926_v17 = vmul.f32 %v4168_v44, %v1925_v28 }
 0xb94   :  { %v2028_v39 = vpop.permute.xlu1 %2027 }
 0xb95   :  { %3094 = vmatmul.msk.f32.gmra.mxu3 %vm192_vm2, %v2028_v39 }
 0xb9c   :  { %v2252_v51 = vpop.permute.xlu1 %2251 }
 0xba2   :  { %v1863_v48 = vpop.xlane.xlu0 %1862 }
 0xba3   :  { %3318 = vrcp.f32 %v1863_v48  ;;  %v1908_v32 = vand.u32 2147483648, %v1863_v48  ;;  %v1906_v34 = vand.u32 2147483647, %v1863_v48  ;;  %vm1902_vm8 = vweird.f32 %v1863_v48 }
 0xba5   :  { %v1909_v25 = vor.u32 1.1754944e-38, %v1908_v32  ;;  %vm1907_vm10 = vcmp.eq.f32.partialorder %v1906_v34, 8.507059e+37 }
 0xba9   :  { %v3319_v52 = vpop.eup %3318 }
 0xbaa   :  { %v1898_v41 = vmul.f32 %v3319_v52, %v1863_v48  ;;  %vm1903_vm7 = vweird.f32 %v3319_v52 }
 0xbab   :  { %vm1904_vm9 = vmor %vm1902_vm8, %vm1903_vm7 }
 0xbac   :  { %v1899_v9 = vsub.f32 1.0, %v1898_v41 }
 0xbae   :  { %v1900_v33 = vmul.f32 %v3319_v52, %v1899_v9 }
 0xbb0   :  { %v1901_v46 = vadd.f32 %v3319_v52, %v1900_v33 }
 0xbb2   :  { %v1905_v59 = vsel %vm1904_vm9, %v3319_v52, %v1901_v46 }
 0xbb3   :  { %v1910_v37 = vsel %vm1907_vm10, %v1909_v25, %v1905_v59 }
 0xbb4   :  { %v1911_v27 = vmul.f32 %v4186_v36, %v1910_v37 }
 0xbb5   :  { %v2248_v47 = vpop.permute.xlu0 %2247 }
 0xbb6   :  { %3083 = vmatmul.msk.f32.gmra.mxu1 %vm105_vm1, %v1911_v27 }
 0xbbd   :  { %v2030_v7 = vpop.permute.xlu0 %2029 }
 0xbbe   :  { %3084 = vmatmul.msk.f32.gmra.mxu1 %vm105_vm1, %v1926_v17  ;;  %3095 = vmatmul.msk.f32.gmra.mxu3 %vm192_vm2, %v2030_v7 }
 0xbc5   :  { %v1671_v36 = vpop.xlane.xlu2 %1670  ;;  %v2254_v16 = vpop.permute.xlu0 %2253 }
 0xbc6   :  { %3096 = vmatmul.msk.f32.gmra.mxu3 %vm192_vm2, %v2032_v21  ;;  %3105 = vmatmul.msk.f32.vlgmr.msrb.gmra.mxu1 %vm192_vm2, %v2248_v47  ;;  %v1679_v58 = vsub.f32 %v4195_v0, %v1671_v36 }
 0xbc7   :  { %v1668_v61 = vpop.xlane.xlu1 %1667 }
 0xbc8   :  { %v1678_v26 = vsub.f32 %v4198_v57, %v1668_v61  ;;  %v1684_v44 = vmul.f32 1.442695, %v1679_v58 }
 0xbca   :  { %v1682_v22 = vmul.f32 1.442695, %v1678_v26 }
 0xbcc   :  { %3320 = vpow2.f32 %v1682_v22 }
 0xbcd   :  { %3322 = vpow2.f32 %v1684_v44 }
 0xbce   :  { %3106 = vmatmul.msk.f32.gmra.mxu1 %vm192_vm2, %v2250_v42 }
 0xbcf   :  { %v1677_v56 = vpop.xlane.xlu1 %1676 }
 0xbd0   :  { %v1681_v15 = vsub.f32 %v4207_v35, %v1677_v56 }
 0xbd2   :  { %v4234_v23 = vpop.eup %3320  ;;  %v1688_v31 = vmul.f32 1.442695, %v1681_v15 }
 0xbd3   :  { %v1690_v18 = vsel %vm105_vm1, %v4234_v23, 0.0  ;;  %v4240_v57 = vpop.eup %3322 }
 0xbd4   :  { %1691 = vadd.xlane.f32.xlu1 %v1690_v18  ;;  %3324 = vpow2.f32 %v1688_v31  ;;  %v1693_v0 = vsel %vm105_vm1, %v4240_v57, 0.0 }
 0xbd6   :  { %3107 = vmatmul.msk.f32.gmra.mxu1 %vm192_vm2, %v2252_v51 }
 0xbda   :  { %v4245_v63 = vpop.eup %3324 }
 0xbdb   :  { %v1699_v35 = vsel %vm105_vm1, %v4245_v63, 0.0 }
 0xbdc   :  { %1694 = vadd.xlane.f32.xlu1 %v1693_v0 }
 0xbde   :  { %3108 = vmatmul.msk.f32.gmra.mxu1 %vm192_vm2, %v2254_v16 }
 0xbe4   :  { %1700 = vadd.xlane.f32.xlu1 %v1699_v35 }
 0xbf0   :  { %v1674_v45 = vpop.xlane.xlu0 %1673 }
 0xbf1   :  { %v1680_v24 = vsub.f32 %v4215_v8, %v1674_v45 }
 0xbf3   :  { %v1686_v62 = vmul.f32 1.442695, %v1680_v24 }
 0xbf5   :  { %3326 = vpow2.f32 %v1686_v62  ;;  %v4264_v41 = vpop.f32.mrf.mxu1 }
 0xbfb   :  { %v4255_v48 = vpop.eup %3326 }
 0xbfc   :  { %v1696_v11 = vsel %vm105_vm1, %v4255_v48, 0.0 }
 0xbfd   :  { %v4266_v9 = vpop.f32.mrf.mxu1 }
 0xc00   :  { %v2074_v49 = vpop.f32.mrf.mxu3 }
 0xc01   :  { %v2086_v29 = vmul.f32 0.35355338, %v2074_v49 }
 0xc03   :  { %v4251_v43 = vadd.f32 %v2086_v29, %v3605_v6 }
 0xc05   :  { %v2094_v39 = vsel %vm105_vm1, %v4251_v43, -inf }
 0xc06   :  { %2095 = vmax.xlane.f32.xlu0 %v2094_v39 }
 0xc0e   :  { %1697 = vadd.xlane.f32.xlu0 %v1696_v11 }
 0xc18   :  { %v2077_v30 = vpop.f32.mrf.mxu3 }
 0xc19   :  { %v2087_v52 = vmul.f32 0.35355338, %v2077_v30 }
 0xc1b   :  { %v4260_v8 = vadd.f32 %v2087_v52, %v3609_v12 }
 0xc1d   :  { %v2097_v40 = vsel %vm105_vm1, %v4260_v8, -inf }
 0xc1e   :  { %2098 = vmax.xlane.f32.xlu2 %v2097_v40 }
 0xc33   :  { %v4268_v32 = vpop.f32.mrf.mxu1 }
 0xc3b   :  { %v4270_v19 = vpop.f32.mrf.mxu1 }
 0xc41   :  { %v2080_v33 = vpop.f32.mrf.mxu3 }
 0xc42   :  { %v2088_v34 = vmul.f32 0.35355338, %v2080_v33 }
 0xc43   :  { %v4272_v46 = vpop.f32.mrf.mxu1 }
 0xc44   :  { %v4275_v25 = vadd.f32 %v2088_v34, %v3613_v20 }
 0xc46   :  { %v2100_v59 = vsel %vm105_vm1, %v4275_v25, -inf }
 0xc47   :  { %2101 = vmax.xlane.f32.xlu2 %v2100_v59  ;;  %v1692_v14 = vpop.xlane.xlu1 %1691 }
 0xc48   :  { %3328 = vrcp.f32 %v1692_v14  ;;  %v1713_v51 = vand.u32 2147483648, %v1692_v14  ;;  %v1711_v61 = vand.u32 2147483647, %v1692_v14  ;;  %vm1707_vm15 = vweird.f32 %v1692_v14 }
 0xc49   :  { %v2083_v53 = vpop.f32.mrf.mxu3 }
 0xc4a   :  { %v2089_v37 = vmul.f32 0.35355338, %v2083_v53  ;;  %v1714_v22 = vor.u32 1.1754944e-38, %v1713_v51  ;;  %vm1712_vm3 = vcmp.eq.f32.partialorder %v1711_v61, 8.507059e+37 }
 0xc4b   :  { %v2299_v27 = vpop.f32.mrf.mxu1 }
 0xc4c   :  { %v2309_v1 = vmul.f32 0.35355338, %v2299_v27  ;;  %v4280_v42 = vadd.f32 %v2089_v37, %v3603_v3 }
 0xc4e   :  { %v3329_v47 = vpop.eup %3328  ;;  %v2103_v50 = vsel %vm105_vm1, %v4280_v42, -inf  ;;  %v4285_v4 = vadd.f32 %v2309_v1, %v3609_v12 }
 0xc4f   :  { %v1703_v28 = vmul.f32 %v3329_v47, %v1692_v14  ;;  %2104 = vmax.xlane.f32.xlu2 %v2103_v50  ;;  %v1695_v17 = vpop.xlane.xlu1 %1694  ;;  %vm1708_vm2 = vweird.f32 %v3329_v47 }
 0xc50   :  { %3330 = vrcp.f32 %v1695_v17  ;;  %v2319_v7 = vsel %vm105_vm1, %v4285_v4, -inf  ;;  %vm1709_vm0 = vmor %vm1707_vm15, %vm1708_vm2  ;;  %v1728_v31 = vand.u32 2147483648, %v1695_v17  ;;  %v1726_v16 = vand.u32 2147483647, %v1695_v17 }
 0xc51   :  { %v1704_v21 = vsub.f32 1.0, %v1703_v28  ;;  %2320 = vmax.xlane.f32.xlu1 %v2319_v7  ;;  %vm1722_vm6 = vweird.f32 %v1695_v17 }
 0xc52   :  { %v1729_v45 = vor.u32 1.1754944e-38, %v1728_v31  ;;  %vm1727_vm8 = vcmp.eq.f32.partialorder %v1726_v16, 8.507059e+37 }
 0xc53   :  { %v1705_v36 = vmul.f32 %v3329_v47, %v1704_v21  ;;  %v2302_v30 = vpop.f32.mrf.mxu1 }
 0xc54   :  { %v2310_v34 = vmul.f32 0.35355338, %v2302_v30 }
 0xc55   :  { %v1706_v26 = vadd.f32 %v3329_v47, %v1705_v36 }
 0xc56   :  { %v3331_v58 = vpop.eup %3330  ;;  %v4301_v53 = vadd.f32 %v2310_v34, %v3613_v20 }
 0xc57   :  { %v1710_v12 = vsel %vm1709_vm0, %v3329_v47, %v1706_v26  ;;  %v1718_v44 = vmul.f32 %v3331_v58, %v1695_v17  ;;  %vm1723_vm4 = vweird.f32 %v3331_v58 }
 0xc58   :  { %v1715_v56 = vsel %vm1712_vm3, %v1714_v22, %v1710_v12  ;;  %vm1724_vm7 = vmor %vm1722_vm6, %vm1723_vm4  ;;  %v2322_v28 = vsel %vm105_vm1, %v4301_v53, -inf }
 0xc59   :  { %v1719_v15 = vsub.f32 1.0, %v1718_v44  ;;  %v1716_v18 = vmul.f32 %v4234_v23, %v1715_v56  ;;  %v1701_v23 = vpop.xlane.xlu1 %1700 }
 0xc5a   :  { %3332 = vrcp.f32 %v1701_v23  ;;  %v1758_v22 = vand.u32 2147483648, %v1701_v23  ;;  %vm1752_vm14 = vweird.f32 %v1701_v23 }
 0xc5b   :  { %v1720_v0 = vmul.f32 %v3331_v58, %v1719_v15  ;;  %3085 = vmatmul.msk.f32.vlgmr.msrb.gmra.mxu2 %vm105_vm1, %v1716_v18  ;;  %v2305_v37 = vpop.f32.mrf.mxu1  ;;  %v1756_v15 = vand.u32 2147483647, %v1701_v23 }
 0xc5c   :  { %v2311_v47 = vmul.f32 0.35355338, %v2305_v37 }
 0xc5d   :  { %v1721_v35 = vadd.f32 %v3331_v58, %v1720_v0  ;;  %v1759_v0 = vor.u32 1.1754944e-38, %v1758_v22  ;;  %vm1757_vm15 = vcmp.eq.f32.partialorder %v1756_v15, 8.507059e+37 }
 0xc5e   :  { %v2315_v20 = vadd.f32 %v2311_v47, %v3603_v3 }
 0xc5f   :  { %v1725_v24 = vsel %vm1724_vm7, %v3331_v58, %v1721_v35 }
 0xc60   :  { %v1730_v62 = vsel %vm1727_vm8, %v1729_v45, %v1725_v24  ;;  %v3333_v40 = vpop.eup %3332  ;;  %v2325_v31 = vsel %vm105_vm1, %v2315_v20, -inf  ;;  %v2308_v45 = vmul.f32 0.35355338, %v4272_v46 }
 0xc61   :  { %v1731_v49 = vmul.f32 %v4240_v57, %v1730_v62  ;;  %v1748_v57 = vmul.f32 %v3333_v40, %v1701_v23  ;;  %vm1753_vm13 = vweird.f32 %v3333_v40 }
 0xc62   :  { %vm1754_vm2 = vmor %vm1752_vm14, %vm1753_vm13  ;;  %v2312_v24 = vadd.f32 %v2308_v45, %v3605_v6 }
 0xc63   :  { %3086 = vmatmul.msk.f32.gmra.mxu2 %vm105_vm1, %v1731_v49 }
 0xc64   :  { %v2316_v62 = vsel %vm105_vm1, %v2312_v24, -inf }
 0xc6a   :  { %3197 = vrot.lane.b32.xlu1 %v4078_v55, %s3441_s8 }
 0xc79   :  { %v2096_v29 = vpop.xlane.xlu0 %2095 }
 0xc7a   :  { %v2106_v39 = vsub.f32 %v4251_v43, %v2096_v29  ;;  %v1749_v43 = vsub.f32 1.0, %v1748_v57 }
 0xc7c   :  { %v2110_v11 = vmul.f32 1.442695, %v2106_v39  ;;  %v1750_v17 = vmul.f32 %v3333_v40, %v1749_v43 }
 0xc7e   :  { %3334 = vpow2.f32 %v2110_v11  ;;  %v1751_v58 = vadd.f32 %v3333_v40, %v1750_v17 }
 0xc80   :  { %v1755_v3 = vsel %vm1754_vm2, %v3333_v40, %v1751_v58 }
 0xc81   :  { %v1698_v52 = vpop.xlane.xlu0 %1697  ;;  %v1760_v16 = vsel %vm1757_vm15, %v1759_v0, %v1755_v3 }
 0xc82   :  { %3336 = vrcp.f32 %v1698_v52  ;;  %v1743_v50 = vand.u32 2147483648, %v1698_v52  ;;  %v1741_v21 = vand.u32 2147483647, %v1698_v52  ;;  %vm1737_vm10 = vweird.f32 %v1698_v52 }
 0xc83   :  { %v1761_v35 = vmul.f32 %v4245_v63, %v1760_v16 }
 0xc84   :  { %v4296_v33 = vpop.eup %3334  ;;  %v1744_v36 = vor.u32 1.1754944e-38, %v1743_v50  ;;  %vm1742_vm12 = vcmp.eq.f32.partialorder %v1741_v21, 8.507059e+37 }
 0xc85   :  { %v2118_v59 = vsel %vm105_vm1, %v4296_v33, 0.0 }
 0xc86   :  { %2119 = vadd.xlane.f32.xlu0 %v2118_v59 }
 0xc88   :  { %v3337_v14 = vpop.eup %3336 }
 0xc89   :  { %v1733_v27 = vmul.f32 %v3337_v14, %v1698_v52  ;;  %vm1738_vm9 = vweird.f32 %v3337_v14 }
 0xc8a   :  { %vm1739_vm11 = vmor %vm1737_vm10, %vm1738_vm9 }
 0xc8b   :  { %v1734_v1 = vsub.f32 1.0, %v1733_v27 }
 0xc8d   :  { %v1735_v7 = vmul.f32 %v3337_v14, %v1734_v1 }
 0xc8e   :  { %2323 = vmax.xlane.f32.xlu0 %v2322_v28 }
 0xc8f   :  { %v1736_v51 = vadd.f32 %v3337_v14, %v1735_v7 }
 0xc91   :  { %v2099_v61 = vpop.xlane.xlu2 %2098  ;;  %v1740_v26 = vsel %vm1739_vm11, %v3337_v14, %v1736_v51 }
 0xc92   :  { %v2107_v12 = vsub.f32 %v4260_v8, %v2099_v61  ;;  %v1745_v44 = vsel %vm1742_vm12, %v1744_v36, %v1740_v26 }
 0xc93   :  { %v1746_v56 = vmul.f32 %v4255_v48, %v1745_v44 }
 0xc94   :  { %v2112_v18 = vmul.f32 1.442695, %v2107_v12 }
 0xc95   :  { %3087 = vmatmul.msk.f32.gmra.mxu2 %vm105_vm1, %v1746_v56 }
 0xc96   :  { %3338 = vpow2.f32 %v2112_v18  ;;  %2326 = vmax.xlane.f32.xlu0 %v2325_v31 }
 0xc9c   :  { %v4311_v8 = vpop.eup %3338 }
 0xc9d   :  { %3088 = vmatmul.msk.f32.gmra.mxu2 %vm105_vm1, %v1761_v35  ;;  %v2121_v48 = vsel %vm105_vm1, %v4311_v8, 0.0 }
 0xc9e   :  { %2122 = vadd.xlane.f32.xlu2 %v2121_v48 }
 0xca6   :  { %2317 = vmax.xlane.f32.xlu2 %v2316_v62 }
 0xcaa   :  { %3187 = vrot.lane.b32.xlu0 %v4106_v38, %s3441_s8 }
 0xcba   :  { %v2102_v63 = vpop.xlane.xlu2 %2101 }
 0xcbb   :  { %v2108_v46 = vsub.f32 %v4275_v25, %v2102_v63 }
 0xcbd   :  { %v2114_v29 = vmul.f32 1.442695, %v2108_v46 }
 0xcbe   :  { %3192 = vrot.lane.b32.xlu2 %v4106_v38, %s3440_s7 }
 0xcc2   :  { %v2105_v34 = vpop.xlane.xlu2 %2104 }
 0xcc3   :  { %v2109_v44 = vsub.f32 %v4280_v42, %v2105_v34 }
 0xcc4   :  { %v2321_v49 = vpop.xlane.xlu1 %2320 }
 0xcc5   :  { %v2329_v23 = vsub.f32 %v4285_v4, %v2321_v49  ;;  %v2116_v56 = vmul.f32 1.442695, %v2109_v44 }
 0xcc7   :  { %v2334_v39 = vmul.f32 1.442695, %v2329_v23 }
 0xcc9   :  { %3340 = vpow2.f32 %v2334_v39 }
 0xcca   :  { %3342 = vpow2.f32 %v2114_v29 }
 0xccf   :  { %v4325_v6 = vpop.eup %3340 }
 0xcd0   :  { %v4327_v11 = vpop.eup %3342  ;;  %v2343_v30 = vsel %vm105_vm1, %v4325_v6, 0.0 }
 0xcd1   :  { %2344 = vadd.xlane.f32.xlu1 %v2343_v30  ;;  %v2124_v38 = vsel %vm105_vm1, %v4327_v11, 0.0 }
 0xcd4   :  { %2125 = vadd.xlane.f32.xlu0 %v2124_v38 }
 0xcdc   :  { %v3198_v21 = vpop.permute.xlu1 %3197 }
 0xcdd   :  { %v3199_v36 = vunpack.i.l.bf16 %v3198_v21  ;;  %v3200_v26 = vunpack.i.h.bf16 %v3198_v21 }
 0xcf9   :  { %v4333_v25 = vpop.xlane.xlu0 %2119 }
 0xcfa   :  { %v2141_v46 = vand.u32 2147483648, %v4333_v25  ;;  %vm2135_vm3 = vweird.f32 %v4333_v25  ;;  %v2139_v23 = vand.u32 2147483647, %v4333_v25 }
 0xcfc   :  { %vm2140_vm6 = vcmp.eq.f32.partialorder %v2139_v23, 8.507059e+37 }
 0xd01   :  { %v2324_v52 = vpop.xlane.xlu0 %2323 }
 0xd02   :  { %v2330_v4 = vsub.f32 %v4301_v53, %v2324_v52  ;;  %v2142_v52 = vor.u32 1.1754944e-38, %v2141_v46 }
 0xd04   :  { %v2336_v40 = vmul.f32 1.442695, %v2330_v4 }
 0xd06   :  { %3344 = vpow2.f32 %v2336_v40 }
 0xd09   :  { %v2327_v57 = vpop.xlane.xlu0 %2326 }
 0xd0a   :  { %v2331_v59 = vsub.f32 %v2315_v20, %v2327_v57 }
 0xd0c   :  { %v4336_v14 = vpop.eup %3344  ;;  %v2338_v43 = vmul.f32 1.442695, %v2331_v59 }
 0xd0d   :  { %v2346_v37 = vsel %vm105_vm1, %v4336_v14, 0.0 }
 0xd0e   :  { %3346 = vpow2.f32 %v2338_v43  ;;  %2347 = vadd.xlane.f32.xlu1 %v2346_v37 }
 0xd11   :  { %v4340_v27 = vpop.xlane.xlu2 %2122 }
 0xd12   :  { %vm2150_vm8 = vweird.f32 %v4340_v27 }
 0xd14   :  { %v4342_v1 = vpop.eup %3346 }
 0xd15   :  { %v2349_v53 = vsel %vm105_vm1, %v4342_v1, 0.0 }
 0xd16   :  { %2350 = vadd.xlane.f32.xlu1 %v2349_v53 }
 0xd19   :  { %v2318_v47 = vpop.xlane.xlu2 %2317 }
 0xd1a   :  { %v2328_v50 = vsub.f32 %v2312_v24, %v2318_v47  ;;  %v2156_v47 = vand.u32 2147483648, %v4340_v27 }
 0xd1c   :  { %v2332_v28 = vmul.f32 1.442695, %v2328_v50  ;;  %v3188_v17 = vpop.permute.xlu0 %3187  ;;  %v2157_v44 = vor.u32 1.1754944e-38, %v2156_v47 }
 0xd1d   :  { %v3189_v7 = vunpack.i.l.bf16 %v3188_v17  ;;  %v3190_v51 = vunpack.i.h.bf16 %v3188_v17 }
 0xd1e   :  { %3348 = vpow2.f32 %v2332_v28 }
 0xd1f   :  { %2448 = vmatpush.msra.mxu2 %v3189_v7  ;;  %3350 = vpow2.f32 %v2116_v56 }
 0xd20   :  { %3352 = vrcp.f32 %v4333_v25 }
 0xd21   :  { %v3193_v20 = vpop.permute.xlu2 %3192  ;;  %2449 = vmatpush.msra.mxu2 %v3190_v51  ;;  %3354 = vrcp.f32 %v4340_v27 }
 0xd22   :  { %v3194_v61 = vunpack.i.l.bf16 %v3193_v20  ;;  %v3195_v22 = vunpack.i.h.bf16 %v3193_v20 }
 0xd23   :  { %2450 = vmatpush.msra.mxu2 %v3199_v36  ;;  %v2154_v36 = vand.u32 2147483647, %v4340_v27 }
 0xd24   :  { %v4346_v58 = vpop.eup %3348  ;;  %2226 = vmatpush.msrb.mxu0 %v3194_v61 }
 0xd25   :  { %2451 = vmatpush.msra.mxu2 %v3200_v26  ;;  %v2340_v12 = vsel %vm105_vm1, %v4346_v58, 0.0  ;;  %v4353_v15 = vpop.eup %3350  ;;  %vm2155_vm12 = vcmp.eq.f32.partialorder %v2154_v36, 8.507059e+37 }
 0xd26   :  { %2341 = vadd.xlane.f32.xlu2 %v2340_v12  ;;  %2227 = vmatpush.msrb.mxu0 %v3195_v22  ;;  %v2127_v18 = vsel %vm105_vm1, %v4353_v15, 0.0  ;;  %v3353_v31 = vpop.eup %3352 }
 0xd27   :  { %v2131_v3 = vmul.f32 %v3353_v31, %v4333_v25  ;;  %vm2136_vm0 = vweird.f32 %v3353_v31 }
 0xd28   :  { %vm2137_vm4 = vmor %vm2135_vm3, %vm2136_vm0 }
 0xd29   :  { %v2132_v42 = vsub.f32 1.0, %v2131_v3 }
 0xd2b   :  { %v2133_v45 = vmul.f32 %v3353_v31, %v2132_v42 }
 0xd2d   :  { %v2134_v62 = vadd.f32 %v3353_v31, %v2133_v45 }
 0xd2f   :  { %v2138_v30 = vsel %vm2137_vm4, %v3353_v31, %v2134_v62 }
 0xd30   :  { %v2143_v4 = vsel %vm2140_vm6, %v2142_v52, %v2138_v30 }
 0xd31   :  { %v2144_v28 = vmul.f32 %v4296_v33, %v2143_v4 }
 0xd3e   :  { %3202 = vrot.lane.b32.xlu2 %v4078_v55, %s3440_s7  ;;  %v4362_v55 = vpop.eup %3354 }
 0xd3f   :  { %v2146_v16 = vmul.f32 %v4362_v55, %v4340_v27  ;;  %vm2151_vm7 = vweird.f32 %v4362_v55 }
 0xd40   :  { %vm4394_vm9 = vmor %vm2150_vm8, %vm2151_vm7 }
 0xd41   :  { %v2147_v48 = vsub.f32 1.0, %v2146_v16 }
 0xd43   :  { %v2148_v29 = vmul.f32 %v4362_v55, %v2147_v48 }
 0xd44   :  { %v4360_v0 = vpop.xlane.xlu1 %2344 }
 0xd45   :  { %3356 = vrcp.f32 %v4360_v0  ;;  %v2149_v25 = vadd.f32 %v4362_v55, %v2148_v29  ;;  %vm2372_vm15 = vweird.f32 %v4360_v0  ;;  %v2378_v45 = vand.u32 2147483648, %v4360_v0 }
 0xd46   :  { %v2376_v46 = vand.u32 2147483647, %v4360_v0 }
 0xd47   :  { %v4367_v35 = vpop.xlane.xlu0 %2125  ;;  %v2153_v51 = vsel %vm4394_vm9, %v4362_v55, %v2149_v25  ;;  %v2379_v52 = vor.u32 1.1754944e-38, %v2378_v45  ;;  %v4451_v45 = vld [vmem:[%s4623_s2 + $0x8] sm:$0xff] }
 0xd48   :  { %3358 = vrcp.f32 %v4367_v35  ;;  %v2158_v31 = vsel %vm2155_vm12, %v2157_v44, %v2153_v51  ;;  %vm2165_vm3 = vweird.f32 %v4367_v35  ;;  %v2171_v23 = vand.u32 2147483648, %v4367_v35 }
 0xd49   :  { %v2159_v29 = vmul.f32 %v4311_v8, %v2158_v31  ;;  %vm2377_vm7 = vcmp.eq.f32.partialorder %v2376_v46, 8.507059e+37 }
 0xd4a   :  { %v2172_v4 = vor.u32 1.1754944e-38, %v2171_v23 }
 0xd4b   :  { %v4372_v63 = vpop.eup %3356 }
 0xd4c   :  { %v2368_v38 = vmul.f32 %v4372_v63, %v4360_v0  ;;  %vm2373_vm14 = vweird.f32 %v4372_v63  ;;  %v2169_v0 = vand.u32 2147483647, %v4367_v35 }
 0xd4d   :  { %vm2374_vm4 = vmor %vm2372_vm15, %vm2373_vm14 }
 0xd4e   :  { %v4378_v39 = vpop.eup %3358  ;;  %v2369_v57 = vsub.f32 1.0, %v2368_v38  ;;  %vm2170_vm9 = vcmp.eq.f32.partialorder %v2169_v0, 8.507059e+37 }
 0xd4f   :  { %v2161_v40 = vmul.f32 %v4378_v39, %v4367_v35  ;;  %vm2166_vm0 = vweird.f32 %v4378_v39 }
 0xd50   :  { %v2370_v20 = vmul.f32 %v4372_v63, %v2369_v57  ;;  %vm2167_vm6 = vmor %vm2165_vm3, %vm2166_vm0 }
 0xd51   :  { %v2162_v7 = vsub.f32 1.0, %v2161_v40 }
 0xd52   :  { %v2371_v42 = vadd.f32 %v4372_v63, %v2370_v20 }
 0xd53   :  { %v2163_v56 = vmul.f32 %v4378_v39, %v2162_v7 }
 0xd67   :  { %2128 = vadd.xlane.f32.xlu2 %v2127_v18 }
 0xd81   :  { %v4370_v24 = vpop.xlane.xlu1 %2347 }
 0xd82   :  { %v2393_v57 = vand.u32 2147483648, %v4370_v24  ;;  %v2391_v35 = vand.u32 2147483647, %v4370_v24 }
 0xd84   :  { %vm2392_vm12 = vcmp.eq.f32.partialorder %v2391_v35, 8.507059e+37 }
 0xd89   :  { %v4388_v59 = vpop.xlane.xlu1 %2350 }
 0xd8a   :  { %v2408_v7 = vand.u32 2147483648, %v4388_v59  ;;  %vm2402_vm14 = vweird.f32 %v4388_v59 }
 0xd99   :  { %v2342_v49 = vpop.xlane.xlu2 %2341 }
 0xd9a   :  { %3360 = vrcp.f32 %v2342_v49  ;;  %v2363_v61 = vand.u32 2147483648, %v2342_v49  ;;  %v2361_v12 = vand.u32 2147483647, %v2342_v49  ;;  %vm2357_vm11 = vweird.f32 %v2342_v49 }
 0xd9b   :  { %3362 = vrcp.f32 %v4370_v24 }
 0xd9c   :  { %3364 = vrcp.f32 %v4388_v59  ;;  %v2364_v27 = vor.u32 1.1754944e-38, %v2363_v61  ;;  %vm2362_vm2 = vcmp.eq.f32.partialorder %v2361_v12, 8.507059e+37 }
 0xda0   :  { %v3361_v34 = vpop.eup %3360 }
 0xda1   :  { %v2353_v43 = vmul.f32 %v3361_v34, %v2342_v49  ;;  %v3203_v37 = vpop.permute.xlu2 %3202  ;;  %v4390_v53 = vpop.eup %3362  ;;  %vm2358_vm10 = vweird.f32 %v3361_v34  ;;  %v2164_v49 = vadd.f32 %v4378_v39, %v2163_v56 }
 0xda2   :  { %v3204_v50 = vunpack.i.l.bf16 %v3203_v37  ;;  %v3205_v26 = vunpack.i.h.bf16 %v3203_v37  ;;  %v2383_v33 = vmul.f32 %v4390_v53, %v4370_v24  ;;  %vm2359_vm13 = vmor %vm2357_vm11, %vm2358_vm10  ;;  %v3365_v16 = vpop.eup %3364  ;;  %vm2388_vm8 = vweird.f32 %v4390_v53 }
 0xda3   :  { %v2354_v21 = vsub.f32 1.0, %v2353_v43  ;;  %v2398_v38 = vmul.f32 %v3365_v16, %v4388_v59  ;;  %v2168_v8 = vsel %vm2167_vm6, %v4378_v39, %v2164_v49  ;;  %vm2387_vm10 = vweird.f32 %v4370_v24 }
 0xda4   :  { %2228 = vmatpush.msrb.mxu0 %v3204_v50  ;;  %v2384_v3 = vsub.f32 1.0, %v2383_v33  ;;  %vm2389_vm11 = vmor %vm2387_vm10, %vm2388_vm8  ;;  %v2394_v50 = vor.u32 1.1754944e-38, %v2393_v57 }
 0xda5   :  { %v2355_v22 = vmul.f32 %v3361_v34, %v2354_v21 }
 0xda6   :  { %2229 = vmatpush.msrb.mxu0 %v3205_v26  ;;  %v2385_v30 = vmul.f32 %v4390_v53, %v2384_v3 }
 0xda7   :  { %v2356_v18 = vadd.f32 %v3361_v34, %v2355_v22  ;;  %3097 = vmatmul.msk.f32.vlgmr.msrb.gmra.mxu0 %vm105_vm1, %v2144_v28 }
 0xda8   :  { %v2386_v25 = vadd.f32 %v4390_v53, %v2385_v30 }
 0xda9   :  { %v2360_v55 = vsel %vm2359_vm13, %v3361_v34, %v2356_v18  ;;  %v2399_v34 = vsub.f32 1.0, %v2398_v38  ;;  %vm2403_vm13 = vweird.f32 %v3365_v16  ;;  %v2013_v18 = vpop.f32.mrf.mxu2 }
 0xdaa   :  { %v2365_v48 = vsel %vm2362_vm2, %v2364_v27, %v2360_v55  ;;  %v2390_v47 = vsel %vm2389_vm11, %v4390_v53, %v2386_v25  ;;  %vm2404_vm2 = vmor %vm2402_vm14, %vm2403_vm13  ;;  %v2409_v53 = vor.u32 1.1754944e-38, %v2408_v7 }
 0xdab   :  { %v2366_v62 = vmul.f32 %v4346_v58, %v2365_v48  ;;  %v2375_v58 = vsel %vm2374_vm4, %v4372_v63, %v2371_v42  ;;  %v2173_v63 = vsel %vm2170_vm9, %v2172_v4, %v2168_v8  ;;  %v2400_v37 = vmul.f32 %v3365_v16, %v2399_v34 }
 0xdac   :  { %v2380_v40 = vsel %vm2377_vm7, %v2379_v52, %v2375_v58  ;;  %v2174_v39 = vmul.f32 %v4327_v11, %v2173_v63  ;;  %v2395_v28 = vsel %vm2392_vm12, %v2394_v50, %v2390_v47  ;;  %v2014_v42 = vadd.f32 %v2013_v18, %v4264_v41 }
 0xdad   :  { %3109 = vmatmul.msk.f32.vlgmr.msra.gmra.mxu2 %vm105_vm1, %v2366_v62  ;;  %v2381_v43 = vmul.f32 %v4325_v6, %v2380_v40  ;;  %v2401_v17 = vadd.f32 %v3365_v16, %v2400_v37  ;;  %v2406_v6 = vand.u32 2147483647, %v4388_v59  ;;  %v2396_v24 = vmul.f32 %v4336_v14, %v2395_v28 }
 0xdae   :  { %v2469_v48 = vperm.slane %v4451_v45, 3 }
 0xdaf   :  { %3098 = vmatmul.msk.f32.gmra.mxu0 %vm105_vm1, %v2159_v29  ;;  %v2405_v11 = vsel %vm2404_vm2, %v3365_v16, %v2401_v17  ;;  %vm2407_vm15 = vcmp.eq.f32.partialorder %v2406_v6, 8.507059e+37 }
 0xdb0   :  { %v2410_v21 = vsel %vm2407_vm15, %v2409_v53, %v2405_v11 }
 0xdb1   :  { %v2411_v51 = vmul.f32 %v4342_v1, %v2410_v21  ;;  %v2016_v27 = vpop.f32.mrf.mxu2 }
 0xdb2   :  { %v2017_v23 = vadd.f32 %v2016_v27, %v4266_v9 }
 0xdb5   :  { %3110 = vmatmul.msk.f32.gmra.mxu2 %vm105_vm1, %v2381_v43 }
 0xdb7   :  { %3099 = vmatmul.msk.f32.gmra.mxu0 %vm105_vm1, %v2174_v39 }
 0xdb9   :  { %v2019_v31 = vpop.f32.mrf.mxu2 }
 0xdba   :  { %v2020_v8 = vadd.f32 %v2019_v31, %v4268_v32 }
 0xdbd   :  { %3111 = vmatmul.msk.f32.gmra.mxu2 %vm105_vm1, %v2396_v24 }
 0xdc1   :  { %v2022_v3 = vpop.f32.mrf.mxu2 }
 0xdc2   :  { %v2023_v35 = vadd.f32 %v2022_v3, %v4270_v19 }
 0xdc5   :  { %3112 = vmatmul.msk.f32.gmra.mxu2 %vm105_vm1, %v2411_v51 }
 0xdda   :  { %v2129_v36 = vpop.xlane.xlu2 %2128 }
 0xddb   :  { %3366 = vrcp.f32 %v2129_v36  ;;  %v2186_v33 = vand.u32 2147483648, %v2129_v36  ;;  %v2184_v14 = vand.u32 2147483647, %v2129_v36  ;;  %vm2180_vm3 = vweird.f32 %v2129_v36 }
 0xddd   :  { %v2187_v12 = vor.u32 1.1754944e-38, %v2186_v33  ;;  %vm2185_vm6 = vcmp.eq.f32.partialorder %v2184_v14, 8.507059e+37 }
 0xde1   :  { %v3367_v20 = vpop.eup %3366 }
 0xde2   :  { %v2176_v61 = vmul.f32 %v3367_v20, %v2129_v36  ;;  %vm2181_vm0 = vweird.f32 %v3367_v20 }
 0xde3   :  { %vm2182_vm4 = vmor %vm2180_vm3, %vm2181_vm0 }
 0xde4   :  { %v2177_v26 = vsub.f32 1.0, %v2176_v61 }
 0xde6   :  { %v2178_v59 = vmul.f32 %v3367_v20, %v2177_v26 }
 0xde8   :  { %v2179_v22 = vadd.f32 %v3367_v20, %v2178_v59 }
 0xdea   :  { %v2183_v44 = vsel %vm2182_vm4, %v3367_v20, %v2179_v22 }
 0xdeb   :  { %v2188_v56 = vsel %vm2185_vm6, %v2187_v12, %v2183_v44  ;;  %v2579_v12 = vld [vmem:[#allocation2 + $0x108] sm:$0xff]  ;;  %v2578_v44 = vld [vmem:[#allocation2 + $0x100] sm:$0xff] }
 0xdec   :  { %v2189_v1 = vmul.f32 %v4353_v15, %v2188_v56  ;;  %2605 = vmatpush.msra.mxu3 %v2579_v12  ;;  %v2577_v56 = vld [vmem:[#allocation2 + $0xf8] sm:$0xff] }
 0xdee   :  { %3100 = vmatmul.msk.f32.gmra.mxu0 %vm105_vm1, %v2189_v1  ;;  %2606 = vmatpush.msra.mxu3 %v2578_v44  ;;  %v2576_v1 = vld [vmem:[#allocation2 + $0xf0] sm:$0xff] }
 0xdf0   :  { %2607 = vmatpush.msra.mxu3 %v2577_v56 }
 0xdf2   :  { %2608 = vmatpush.msra.mxu3 %v2576_v1 }
 0xe24   :  { %v2231_v55 = vpop.f32.mrf.mxu0 }
 0xe25   :  { %v2243_v16 = vadd.f32 %v2231_v55, %v2014_v42 }
 0xe2c   :  { %v2234_v15 = vpop.f32.mrf.mxu0 }
 0xe2d   :  { %v2244_v30 = vadd.f32 %v2234_v15, %v2017_v23 }
 0xe30   :  { %v2453_v62 = vpop.f32.mrf.mxu2 }
 0xe31   :  { %v2465_v46 = vadd.f32 %v2453_v62, %v2243_v16 }
 0xe33   :  { %v2470_v49 = vadd.f32 %v2469_v48, %v2465_v46 }
 0xe34   :  { %v2237_v52 = vpop.f32.mrf.mxu0 }
 0xe35   :  { %v2474_v29 = vadd.f32 %v2470_v49, %v4045_v54  ;;  %v2245_v40 = vadd.f32 %v2237_v52, %v2020_v8 }
 0xe37   :  { %v2478_v38 = vsel %vm105_vm1, %v2474_v29, 0.0 }
 0xe38   :  { %2479 = vadd.xlane.f32.xlu0 %v2478_v38  ;;  %v2456_v41 = vpop.f32.mrf.mxu2 }
 0xe39   :  { %v2466_v58 = vadd.f32 %v2456_v41, %v2244_v30 }
 0xe3b   :  { %v2471_v0 = vadd.f32 %v2469_v48, %v2466_v58  ;;  %v2566_v58 = vperm.slane %v4451_v45, 4 }
 0xe3d   :  { %v2475_v4 = vadd.f32 %v2471_v0, %v4052_v2 }
 0xe3f   :  { %v2481_v25 = vsel %vm105_vm1, %v2475_v4, 0.0 }
 0xe40   :  { %2482 = vadd.xlane.f32.xlu0 %v2481_v25  ;;  %v2459_v34 = vpop.f32.mrf.mxu2 }
 0xe41   :  { %v2467_v9 = vadd.f32 %v2459_v34, %v2245_v40 }
 0xe43   :  { %v2472_v57 = vadd.f32 %v2469_v48, %v2467_v9 }
 0xe45   :  { %v2476_v54 = vadd.f32 %v2472_v57, %v4059_v60 }
 0xe47   :  { %v2484_v63 = vsel %vm105_vm1, %v2476_v54, 0.0 }
 0xe48   :  { %2485 = vadd.xlane.f32.xlu1 %v2484_v63  ;;  %v2462_v39 = vpop.f32.mrf.mxu2 }
 0xe6b   :  { %v2240_v43 = vpop.f32.mrf.mxu0 }
 0xe6c   :  { %v2246_v37 = vadd.f32 %v2240_v43, %v2023_v35 }
 0xe6e   :  { %v2468_v32 = vadd.f32 %v2462_v39, %v2246_v37 }
 0xe70   :  { %v2473_v47 = vadd.f32 %v2469_v48, %v2468_v32 }
 0xe72   :  { %v2477_v2 = vadd.f32 %v2473_v47, %v4067_v10 }
 0xe74   :  { %v2487_v50 = vsel %vm105_vm1, %v2477_v2, 0.0 }
 0xe75   :  { %2488 = vadd.xlane.f32.xlu0 %v2487_v50 }
 0xeab   :  { %v2480_v28 = vpop.xlane.xlu0 %2479 }
 0xeac   :  { %v2490_v17 = vmul.f32 %v2480_v28, %v3901_v5 }
 0xeae   :  { %v2494_v7 = vsub.f32 %v2474_v29, %v2490_v17 }
 0xeb0   :  { %v2498_v60 = vmul.f32 %v2494_v7, %v2494_v7 }
 0xeb2   :  { %v2502_v6 = vsel %vm105_vm1, %v2498_v60, 0.0 }
 0xeb3   :  { %2503 = vadd.xlane.f32.xlu2 %v2502_v6  ;;  %v2483_v24 = vpop.xlane.xlu0 %2482 }
 0xeb4   :  { %v2491_v19 = vmul.f32 %v2483_v24, %v3901_v5 }
 0xeb6   :  { %v4468_v11 = vsub.f32 %v2475_v4, %v2491_v19  ;;  %v2571_v4 = vperm.slane %v4451_v45, 5 }
 0xeb8   :  { %v2499_v53 = vmul.f32 %v4468_v11, %v4468_v11 }
 0xeba   :  { %v2505_v10 = vsel %vm105_vm1, %v2499_v53, 0.0 }
 0xebb   :  { %2506 = vadd.xlane.f32.xlu1 %v2505_v10  ;;  %v2486_v21 = vpop.xlane.xlu1 %2485 }
 0xebc   :  { %v2492_v51 = vmul.f32 %v2486_v21, %v3901_v5 }
 0xebe   :  { %v4474_v36 = vsub.f32 %v2476_v54, %v2492_v51 }
 0xec0   :  { %v2500_v20 = vmul.f32 %v4474_v36, %v4474_v36 }
 0xec2   :  { %v2508_v61 = vsel %vm105_vm1, %v2500_v20, 0.0 }
 0xec3   :  { %2509 = vadd.xlane.f32.xlu0 %v2508_v61 }
 0xee8   :  { %v2489_v26 = vpop.xlane.xlu0 %2488 }
 0xee9   :  { %v2493_v33 = vmul.f32 %v2489_v26, %v3901_v5 }
 0xeeb   :  { %v4480_v59 = vsub.f32 %v2477_v2, %v2493_v33 }
 0xeed   :  { %v2501_v14 = vmul.f32 %v4480_v59, %v4480_v59 }
 0xeef   :  { %v2511_v22 = vsel %vm105_vm1, %v2501_v14, 0.0  ;;  %v4511_v14 = vperm.slane %v4451_v45, 6 }
 0xef0   :  { %2512 = vadd.xlane.f32.xlu2 %v2511_v22 }
 0xf26   :  { %v2504_v18 = vpop.xlane.xlu2 %2503 }
 0xf27   :  { %v2514_v27 = vmul.f32 %v2504_v18, %v3901_v5 }
 0xf29   :  { %v2518_v31 = vadd.f32 1e-05, %v2514_v27 }
 0xf2b   :  { %3368 = vrsqrt.f32 %v2518_v31  ;;  %vm2528_vm8 = vweird.f32 %v2518_v31 }
 0xf2e   :  { %v2507_v3 = vpop.xlane.xlu1 %2506 }
 0xf2f   :  { %v2515_v55 = vmul.f32 %v2507_v3, %v3901_v5 }
 0xf31   :  { %v3369_v42 = vpop.eup %3368  ;;  %v2519_v16 = vadd.f32 1e-05, %v2515_v55  ;;  %v2788_v55 = vld [vmem:[#allocation2 + $0x140] sm:$0xff] }
 0xf32   :  { %v2523_v48 = vmul.f32 %v3369_v42, %v2518_v31  ;;  %vm2529_vm7 = vweird.f32 %v3369_v42  ;;  %v2789_v31 = vld [vmem:[#allocation2 + $0x148] sm:$0xff] }
 0xf33   :  { %3370 = vrsqrt.f32 %v2519_v16  ;;  %vm2530_vm9 = vmor %vm2528_vm8, %vm2529_vm7  ;;  %vm2538_vm11 = vweird.f32 %v2519_v16  ;;  %2811 = vmatpush.msra.mxu0 %v2789_v31 }
 0xf34   :  { %v2524_v62 = vmul.f32 %v3369_v42, %v2523_v48 }
 0xf35   :  { %2812 = vmatpush.msra.mxu0 %v2788_v55 }
 0xf36   :  { %v2525_v46 = vmul.f32 0.5, %v2524_v62  ;;  %v2510_v15 = vpop.xlane.xlu0 %2509 }
 0xf37   :  { %v2516_v49 = vmul.f32 %v2510_v15, %v3901_v5 }
 0xf38   :  { %v2526_v23 = vsub.f32 1.5, %v2525_v46 }
 0xf39   :  { %v3371_v29 = vpop.eup %3370  ;;  %v2520_v30 = vadd.f32 1e-05, %v2516_v49  ;;  %v2786_v49 = vld [vmem:[#allocation2 + $0x130] sm:$0xff] }
 0xf3a   :  { %v2527_v38 = vmul.f32 %v3369_v42, %v2526_v23  ;;  %v2533_v41 = vmul.f32 %v3371_v29, %v2519_v16  ;;  %vm2539_vm10 = vweird.f32 %v3371_v29  ;;  %v2787_v16 = vld [vmem:[#allocation2 + $0x138] sm:$0xff] }
 0xf3b   :  { %3372 = vrsqrt.f32 %v2520_v30  ;;  %vm2540_vm12 = vmor %vm2538_vm11, %vm2539_vm10  ;;  %vm2548_vm14 = vweird.f32 %v2520_v30  ;;  %2813 = vmatpush.msra.mxu0 %v2787_v16 }
 0xf3c   :  { %v2531_v0 = vsel %vm2530_vm9, %v3369_v42, %v2527_v38  ;;  %v2534_v52 = vmul.f32 %v3371_v29, %v2533_v41  ;;  %v2785_v38 = vld [vmem:[#allocation2 + $0x128] sm:$0xff] }
 0xf3d   :  { %v2562_v8 = vmul.f32 %v2531_v0, %v2494_v7  ;;  %2814 = vmatpush.msra.mxu0 %v2786_v49 }
 0xf3e   :  { %v2535_v40 = vmul.f32 0.5, %v2534_v52  ;;  %v2784_v52 = vld [vmem:[#allocation2 + $0x120] sm:$0xff] }
 0xf3f   :  { %v2567_v25 = vmul.f32 %v2566_v58, %v2562_v8  ;;  %2815 = vmatpush.msra.mxu0 %v2785_v38 }
 0xf40   :  { %v2536_v34 = vsub.f32 1.5, %v2535_v40 }
 0xf41   :  { %v3373_v9 = vpop.eup %3372  ;;  %v4490_v57 = vadd.f32 %v2571_v4, %v2567_v25  ;;  %2816 = vmatpush.msra.mxu0 %v2784_v52  ;;  %v2783_v25 = vld [vmem:[#allocation2 + $0x118] sm:$0xff] }
 0xf42   :  { %v2537_v54 = vmul.f32 %v3371_v29, %v2536_v34  ;;  %v2543_v63 = vmul.f32 %v3373_v9, %v2520_v30  ;;  %vm2549_vm13 = vweird.f32 %v3373_v9 }
 0xf43   :  { %3113 = vmatmul.msk.f32.vlgmr.msra.gmra.mxu3 %vm105_vm1, %v4490_v57  ;;  %vm2550_vm2 = vmor %vm2548_vm14, %vm2549_vm13  ;;  %2817 = vmatpush.msra.mxu0 %v2783_v25 }
 0xf44   :  { %v2541_v35 = vsel %vm2540_vm12, %v3371_v29, %v2537_v54  ;;  %v2544_v43 = vmul.f32 %v3373_v9, %v2543_v63  ;;  %v2782_v63 = vld [vmem:[#allocation2 + $0x110] sm:$0xff] }
 0xf45   :  { %v2563_v37 = vmul.f32 %v2541_v35, %v4468_v11  ;;  %2818 = vmatpush.msra.mxu0 %v2782_v63 }
 0xf46   :  { %v2545_v39 = vmul.f32 0.5, %v2544_v43 }
 0xf47   :  { %v2568_v32 = vmul.f32 %v2566_v58, %v2563_v37 }
 0xf48   :  { %v2546_v47 = vsub.f32 1.5, %v2545_v39 }
 0xf49   :  { %v4495_v2 = vadd.f32 %v2571_v4, %v2568_v32 }
 0xf4a   :  { %v2547_v50 = vmul.f32 %v3373_v9, %v2546_v47 }
 0xf4b   :  { %3114 = vmatmul.msk.f32.gmra.mxu3 %vm105_vm1, %v4495_v2 }
 0xf4c   :  { %v2551_v28 = vsel %vm2550_vm2, %v3373_v9, %v2547_v50 }
 0xf4d   :  { %v2564_v17 = vmul.f32 %v2551_v28, %v4474_v36 }
 0xf4f   :  { %v2569_v7 = vmul.f32 %v2566_v58, %v2564_v17 }
 0xf51   :  { %v4500_v60 = vadd.f32 %v2571_v4, %v2569_v7 }
 0xf53   :  { %3115 = vmatmul.msk.f32.gmra.mxu3 %vm105_vm1, %v4500_v60 }
 0xf63   :  { %v2513_v6 = vpop.xlane.xlu2 %2512 }
 0xf64   :  { %v2517_v24 = vmul.f32 %v2513_v6, %v3901_v5 }
 0xf66   :  { %v2521_v19 = vadd.f32 1e-05, %v2517_v24 }
 0xf68   :  { %3374 = vrsqrt.f32 %v2521_v19  ;;  %vm2558_vm0 = vweird.f32 %v2521_v19 }
 0xf6e   :  { %v3375_v11 = vpop.eup %3374 }
 0xf6f   :  { %v2553_v53 = vmul.f32 %v3375_v11, %v2521_v19  ;;  %vm2559_vm15 = vweird.f32 %v3375_v11 }
 0xf70   :  { %vm2560_vm3 = vmor %vm2558_vm0, %vm2559_vm15 }
 0xf71   :  { %v2554_v10 = vmul.f32 %v3375_v11, %v2553_v53 }
 0xf73   :  { %v2555_v21 = vmul.f32 0.5, %v2554_v10 }
 0xf75   :  { %v2556_v51 = vsub.f32 1.5, %v2555_v21 }
 0xf77   :  { %v2557_v20 = vmul.f32 %v3375_v11, %v2556_v51 }
 0xf79   :  { %v2561_v36 = vsel %vm2560_vm3, %v3375_v11, %v2557_v20 }
 0xf7a   :  { %v2565_v61 = vmul.f32 %v2561_v36, %v4480_v59 }
 0xf7c   :  { %v2570_v26 = vmul.f32 %v2566_v58, %v2565_v61 }
 0xf7e   :  { %v4506_v33 = vadd.f32 %v2571_v4, %v2570_v26 }
 0xf80   :  { %3116 = vmatmul.msk.f32.gmra.mxu3 %vm105_vm1, %v4506_v33 }
 0xfc6   :  { %v2610_v22 = vpop.f32.mrf.mxu3 }
 0xfc7   :  { %v4514_v12 = vadd.f32 %v2610_v22, %v4511_v14 }
 0xfc9   :  { %v4517_v44 = vmul.f32 0.70710677, %v4514_v12 }
 0xfcb   :  { %v2638_v56 = vand.u32 2147483647, %v4517_v44  ;;  %vm2630_vm0 = vcmp.ge.f32.partialorder %v4517_v44, 0.0 }
 0xfcd   :  { %v2642_v1 = vmul.f32 0.3275911, %v2638_v56  ;;  %v2746_v39 = vsub.f32 0.0, %v2638_v56 }
 0xfce   :  { %v2613_v59 = vpop.f32.mrf.mxu3 }
 0xfcf   :  { %v2646_v18 = vadd.f32 1.0, %v2642_v1  ;;  %v4521_v27 = vadd.f32 %v2613_v59, %v4511_v14  ;;  %v2750_v7 = vmul.f32 %v2746_v39, %v2638_v56  ;;  %v2634_v39 = vsel %vm2630_vm0, 1.0, %v3443_v13 }
 0xfd1   :  { %3376 = vrcp.f32 %v2646_v18  ;;  %v4524_v3 = vmul.f32 0.70710677, %v4521_v27  ;;  %v2661_v58 = vand.u32 2147483648, %v2646_v18  ;;  %v2659_v4 = vand.u32 2147483647, %v2646_v18 }
 0xfd2   :  { %vm2655_vm6 = vweird.f32 %v2646_v18  ;;  %v2754_v20 = vmul.f32 1.442695, %v2750_v7 }
 0xfd3   :  { %v4527_v42 = vand.u32 2147483647, %v4524_v3  ;;  %v2662_v9 = vor.u32 1.1754944e-38, %v2661_v58  ;;  %vm2660_vm8 = vcmp.eq.f32.partialorder %v2659_v4, 8.507059e+37  ;;  %vm2631_vm3 = vcmp.ge.f32.partialorder %v4524_v3, 0.0 }
 0xfd5   :  { %v2643_v48 = vmul.f32 0.3275911, %v4527_v42  ;;  %v2747_v26 = vsub.f32 0.0, %v4527_v42 }
 0xfd6   :  { %v2616_v62 = vpop.f32.mrf.mxu3 }
 0xfd7   :  { %v3377_v46 = vpop.eup %3376  ;;  %v4531_v15 = vadd.f32 %v2616_v62, %v4511_v14  ;;  %v2647_v29 = vadd.f32 1.0, %v2643_v48  ;;  %v2751_v62 = vmul.f32 %v2747_v26, %v4527_v42 }
 0xfd8   :  { %v2651_v23 = vmul.f32 %v3377_v46, %v2646_v18  ;;  %vm2656_vm4 = vweird.f32 %v3377_v46 }
 0xfd9   :  { %v4534_v30 = vmul.f32 0.70710677, %v4531_v15  ;;  %3378 = vrcp.f32 %v2647_v29  ;;  %vm2657_vm7 = vmor %vm2655_vm6, %vm2656_vm4  ;;  %v2676_v17 = vand.u32 2147483648, %v2647_v29  ;;  %v2674_v24 = vand.u32 2147483647, %v2647_v29 }
 0xfda   :  { %v2652_v41 = vsub.f32 1.0, %v2651_v23  ;;  %vm2670_vm10 = vweird.f32 %v2647_v29  ;;  %v2756_v4 = vmul.f32 1.442695, %v2751_v62 }
 0xfdb   :  { %v4537_v0 = vand.u32 2147483647, %v4534_v30  ;;  %v2677_v51 = vor.u32 1.1754944e-38, %v2676_v17  ;;  %vm2675_vm12 = vcmp.eq.f32.partialorder %v2674_v24, 8.507059e+37  ;;  %v2622_v17 = vmul.f32 0.5, %v4514_v12 }
 0xfdc   :  { %v2653_v8 = vmul.f32 %v3377_v46, %v2652_v41  ;;  %vm2632_vm4 = vcmp.ge.f32.partialorder %v4534_v30, 0.0 }
 0xfdd   :  { %v2644_v40 = vmul.f32 0.3275911, %v4537_v0  ;;  %v2748_v58 = vsub.f32 0.0, %v4537_v0 }
 0xfde   :  { %v2654_v34 = vadd.f32 %v3377_v46, %v2653_v8 }
 0xfdf   :  { %v2648_v54 = vadd.f32 1.0, %v2644_v40  ;;  %v3379_v35 = vpop.eup %3378 }
 0xfe0   :  { %v2658_v43 = vsel %vm2657_vm7, %v3377_v46, %v2654_v34  ;;  %v2666_v32 = vmul.f32 %v3379_v35, %v2647_v29  ;;  %vm2671_vm9 = vweird.f32 %v3379_v35 }
 0xfe1   :  { %v2663_v37 = vsel %vm2660_vm8, %v2662_v9, %v2658_v43  ;;  %3380 = vrcp.f32 %v2648_v54  ;;  %vm2672_vm11 = vmor %vm2670_vm10, %vm2671_vm9  ;;  %v2691_v56 = vand.u32 2147483648, %v2648_v54  ;;  %v2689_v55 = vand.u32 2147483647, %v2648_v54 }
 0xfe2   :  { %v2710_v47 = vmul.f32 1.0614054, %v2663_v37  ;;  %v2667_v50 = vsub.f32 1.0, %v2666_v32  ;;  %3382 = vpow2.f32 %v2754_v20  ;;  %vm2685_vm14 = vweird.f32 %v2648_v54 }
 0xfe3   :  { %v2692_v49 = vor.u32 1.1754944e-38, %v2691_v56  ;;  %vm2690_vm15 = vcmp.eq.f32.partialorder %v2689_v55, 8.507059e+37  ;;  %3384 = vpow2.f32 %v2756_v4 }
 0xfe4   :  { %v2714_v28 = vadd.f32 -1.4531521, %v2710_v47  ;;  %v2668_v6 = vmul.f32 %v3379_v35, %v2667_v50 }
 0xfe6   :  { %v2718_v19 = vmul.f32 %v2714_v28, %v2663_v37  ;;  %v2669_v53 = vadd.f32 %v3379_v35, %v2668_v6 }
 0xfe7   :  { %v3381_v11 = vpop.eup %3380 }
 0xfe8   :  { %v2722_v10 = vadd.f32 1.4214138, %v2718_v19  ;;  %v2681_v21 = vmul.f32 %v3381_v11, %v2648_v54  ;;  %v2673_v36 = vsel %vm2672_vm11, %v3379_v35, %v2669_v53  ;;  %vm2686_vm13 = vweird.f32 %v3381_v11  ;;  %v3383_v25 = vpop.eup %3382 }
 0xfe9   :  { %v2678_v1 = vsel %vm2675_vm12, %v2677_v51, %v2673_v36  ;;  %vm2687_vm2 = vmor %vm2685_vm14, %vm2686_vm13  ;;  %v2752_v54 = vmul.f32 %v2748_v58, %v4537_v0  ;;  %v3385_v24 = vpop.eup %3384 }
 0xfea   :  { %v2726_v61 = vmul.f32 %v2722_v10, %v2663_v37  ;;  %v2682_v22 = vsub.f32 1.0, %v2681_v21  ;;  %v2711_v59 = vmul.f32 1.0614054, %v2678_v1  ;;  %v2635_v21 = vsel %vm2631_vm3, 1.0, %v3443_v13 }
 0xfec   :  { %v2730_v18 = vadd.f32 -0.28449672, %v2726_v61  ;;  %v2683_v31 = vmul.f32 %v3381_v11, %v2682_v22  ;;  %v2715_v16 = vadd.f32 -1.4531521, %v2711_v59  ;;  %v2623_v61 = vmul.f32 0.5, %v4521_v27 }
 0xfee   :  { %v2734_v48 = vmul.f32 %v2730_v18, %v2663_v37  ;;  %v2684_v46 = vadd.f32 %v3381_v11, %v2683_v31  ;;  %v2719_v23 = vmul.f32 %v2715_v16, %v2678_v1  ;;  %v2636_v31 = vsel %vm2632_vm4, 1.0, %v3443_v13 }
 0xff0   :  { %v2738_v29 = vadd.f32 0.2548296, %v2734_v48  ;;  %v2688_v38 = vsel %vm2687_vm2, %v3381_v11, %v2684_v46  ;;  %v2723_v52 = vadd.f32 1.4214138, %v2719_v23  ;;  %v2624_v48 = vmul.f32 0.5, %v4531_v15 }
 0xff1   :  { %v2693_v41 = vsel %vm2690_vm15, %v2692_v49, %v2688_v38 }
 0xff2   :  { %v2742_v8 = vmul.f32 %v2738_v29, %v2663_v37  ;;  %v2712_v40 = vmul.f32 1.0614054, %v2693_v41  ;;  %v2727_v34 = vmul.f32 %v2723_v52, %v2678_v1  ;;  %v2758_v37 = vmul.f32 1.442695, %v2752_v54 }
 0xff4   :  { %v2762_v42 = vmul.f32 %v3383_v25, %v2742_v8  ;;  %v2716_v9 = vadd.f32 -1.4531521, %v2712_v40  ;;  %v2731_v63 = vadd.f32 -0.28449672, %v2727_v34  ;;  %3386 = vpow2.f32 %v2758_v37 }
 0xff6   :  { %v2766_v35 = vsub.f32 1.0, %v2762_v42  ;;  %v2720_v43 = vmul.f32 %v2716_v9, %v2693_v41  ;;  %v2735_v32 = vmul.f32 %v2731_v63, %v2678_v1 }
 0xff8   :  { %v2770_v47 = vmul.f32 %v2766_v35, %v2634_v39  ;;  %v2724_v50 = vadd.f32 1.4214138, %v2720_v43  ;;  %v2739_v28 = vadd.f32 0.2548296, %v2735_v32 }
 0xffa   :  { %v2774_v7 = vadd.f32 1.0, %v2770_v47  ;;  %v2728_v6 = vmul.f32 %v2724_v50, %v2693_v41  ;;  %v2743_v44 = vmul.f32 %v2739_v28, %v2678_v1  ;;  %v3387_v12 = vpop.eup %3386 }
 0xffc   :  { %v2778_v19 = vmul.f32 %v2774_v7, %v2622_v17  ;;  %v2732_v11 = vadd.f32 -0.28449672, %v2728_v6  ;;  %v2763_v0 = vmul.f32 %v3385_v24, %v2743_v44  ;;  %v2790_v24 = vperm.slane %v4451_v45, 7 }
 0xffe   :  { %v2736_v53 = vmul.f32 %v2732_v11, %v2693_v41  ;;  %3117 = vmatmul.msk.f32.vlgmr.msra.gmra.mxu0 %vm1378_vm5, %v2778_v19  ;;  %v2767_v10 = vsub.f32 1.0, %v2763_v0 }
0x1000   :  { %v2740_v51 = vadd.f32 0.2548296, %v2736_v53  ;;  %v2771_v20 = vmul.f32 %v2767_v10, %v2635_v21 }
0x1002   :  { %v2744_v36 = vmul.f32 %v2740_v51, %v2693_v41  ;;  %v2775_v22 = vadd.f32 1.0, %v2771_v20 }
0x1003   :  { %v2619_v26 = vpop.f32.mrf.mxu3 }
0x1004   :  { %v2764_v1 = vmul.f32 %v3387_v12, %v2744_v36  ;;  %v2620_v3 = vadd.f32 %v2619_v26, %v4511_v14  ;;  %v2779_v56 = vmul.f32 %v2775_v22, %v2623_v61 }
0x1006   :  { %v2768_v59 = vsub.f32 1.0, %v2764_v1  ;;  %v2629_v18 = vmul.f32 0.70710677, %v2620_v3  ;;  %3118 = vmatmul.msk.f32.gmra.mxu0 %vm1378_vm5, %v2779_v56  ;;  %v2625_v7 = vmul.f32 0.5, %v2620_v3 }
0x1008   :  { %v2772_v55 = vmul.f32 %v2768_v59, %v2636_v31  ;;  %v2641_v16 = vand.u32 2147483647, %v2629_v18  ;;  %vm2633_vm10 = vcmp.ge.f32.partialorder %v2629_v18, 0.0 }
0x1009   :  { %v2637_v28 = vsel %vm2633_vm10, 1.0, %v3443_v13 }
0x100a   :  { %v2776_v62 = vadd.f32 1.0, %v2772_v55  ;;  %v2645_v27 = vmul.f32 0.3275911, %v2641_v16  ;;  %v2749_v4 = vsub.f32 0.0, %v2641_v16 }
0x100c   :  { %v2780_v46 = vmul.f32 %v2776_v62, %v2624_v48  ;;  %v2649_v49 = vadd.f32 1.0, %v2645_v27  ;;  %v2753_v34 = vmul.f32 %v2749_v4, %v2641_v16 }
0x100e   :  { %3388 = vrcp.f32 %v2649_v49  ;;  %3119 = vmatmul.msk.f32.gmra.mxu0 %vm1378_vm5, %v2780_v46  ;;  %v2706_v29 = vand.u32 2147483648, %v2649_v49  ;;  %v2704_v41 = vand.u32 2147483647, %v2649_v49  ;;  %vm2700_vm7 = vweird.f32 %v2649_v49 }
0x100f   :  { %v2760_v54 = vmul.f32 1.442695, %v2753_v34 }
0x1010   :  { %v2707_v52 = vor.u32 1.1754944e-38, %v2706_v29  ;;  %vm2705_vm9 = vcmp.eq.f32.partialorder %v2704_v41, 8.507059e+37  ;;  %v2936_v41 = vld [vmem:[#allocation2 + $0x20] sm:$0xff] }
0x1011   :  { %3390 = vpow2.f32 %v2760_v54 }
0x1014   :  { %v3389_v30 = vpop.eup %3388 }
0x1015   :  { %v2696_v14 = vmul.f32 %v3389_v30, %v2649_v49  ;;  %vm2701_vm6 = vweird.f32 %v3389_v30 }
0x1016   :  { %vm2702_vm8 = vmor %vm2700_vm7, %vm2701_vm6 }
0x1017   :  { %v2697_v23 = vsub.f32 1.0, %v2696_v14  ;;  %v3391_v47 = vpop.eup %3390 }
0x1019   :  { %v2698_v38 = vmul.f32 %v3389_v30, %v2697_v23 }
0x101b   :  { %v2699_v58 = vadd.f32 %v3389_v30, %v2698_v38  ;;  %v2937_v38 = vld [vmem:[#allocation2 + $0x28] sm:$0xff] }
0x101c   :  { %2963 = vmatpush.msra.mxu1 %v2937_v38 }
0x101d   :  { %v2703_v8 = vsel %vm2702_vm8, %v3389_v30, %v2699_v58  ;;  %v2935_v58 = vld [vmem:[#allocation2 + $0x18] sm:$0xff] }
0x101e   :  { %v2708_v15 = vsel %vm2705_vm9, %v2707_v52, %v2703_v8  ;;  %2964 = vmatpush.msra.mxu1 %v2936_v41  ;;  %v2934_v52 = vld [vmem:[#allocation2 + $0x10] sm:$0xff] }
0x101f   :  { %v2713_v40 = vmul.f32 1.0614054, %v2708_v15 }
0x1020   :  { %2965 = vmatpush.msra.mxu1 %v2935_v58 }
0x1021   :  { %v2717_v25 = vadd.f32 -1.4531521, %v2713_v40 }
0x1022   :  { %2966 = vmatpush.msra.mxu1 %v2934_v52 }
0x1023   :  { %v2721_v42 = vmul.f32 %v2717_v25, %v2708_v15 }
0x1025   :  { %v2725_v9 = vadd.f32 1.4214138, %v2721_v42 }
0x1027   :  { %v2729_v63 = vmul.f32 %v2725_v9, %v2708_v15 }
0x1029   :  { %v2733_v35 = vadd.f32 -0.28449672, %v2729_v63 }
0x102b   :  { %v2737_v43 = vmul.f32 %v2733_v35, %v2708_v15 }
0x102d   :  { %v2741_v39 = vadd.f32 0.2548296, %v2737_v43  ;;  %v32_v43 = vld [vmem:[%s4623_s2 + $0x10] sm:$0x3] }
0x102f   :  { %v2745_v32 = vmul.f32 %v2741_v39, %v2708_v15 }
0x1031   :  { %v2765_v50 = vmul.f32 %v3391_v47, %v2745_v32 }
0x1033   :  { %v2769_v37 = vsub.f32 1.0, %v2765_v50 }
0x1035   :  { %v2773_v17 = vmul.f32 %v2769_v37, %v2637_v28  ;;  %v2924_v28 = vperm.slane %v32_v43, 0 }
0x1037   :  { %v2777_v6 = vadd.f32 1.0, %v2773_v17 }
0x1039   :  { %v2781_v44 = vmul.f32 %v2777_v6, %v2625_v7 }
0x103b   :  { %3120 = vmatmul.msk.f32.gmra.mxu0 %vm1378_vm5, %v2781_v44 }
0x107b   :  { %v2820_v19 = vpop.f32.mrf.mxu0 }
0x107c   :  { %v2821_v11 = vadd.f32 %v2820_v19, %v2790_v24 }
0x107e   :  { %v2832_v0 = vadd.f32 %v2821_v11, %v4490_v57 }
0x1080   :  { %v2836_v53 = vsel %vm105_vm1, %v2832_v0, 0.0 }
0x1081   :  { %2837 = vadd.xlane.f32.xlu1 %v2836_v53 }
0x1083   :  { %v2823_v10 = vpop.f32.mrf.mxu0 }
0x1084   :  { %v2824_v21 = vadd.f32 %v2823_v10, %v2790_v24 }
0x1086   :  { %v2833_v51 = vadd.f32 %v2824_v21, %v4495_v2 }
0x1088   :  { %v2839_v13 = vsel %vm105_vm1, %v2833_v51, 0.0 }
0x1089   :  { %2840 = vadd.xlane.f32.xlu0 %v2839_v13 }
0x108b   :  { %v2826_v20 = vpop.f32.mrf.mxu0 }
0x108c   :  { %v2827_v36 = vadd.f32 %v2826_v20, %v2790_v24 }
0x108e   :  { %v2834_v12 = vadd.f32 %v2827_v36, %v4500_v60 }
0x1090   :  { %v2842_v45 = vsel %vm105_vm1, %v2834_v12, 0.0 }
0x1091   :  { %2843 = vadd.xlane.f32.xlu2 %v2842_v45 }
0x10b8   :  { %v2829_v61 = vpop.f32.mrf.mxu0 }
0x10b9   :  { %v2830_v26 = vadd.f32 %v2829_v61, %v2790_v24  ;;  %v2929_v24 = vperm.slane %v32_v43, 1 }
0x10bb   :  { %v2835_v57 = vadd.f32 %v2830_v26, %v4506_v33 }
0x10bd   :  { %v2845_v22 = vsel %vm105_vm1, %v2835_v57, 0.0 }
0x10be   :  { %2846 = vadd.xlane.f32.xlu1 %v2845_v22 }
0x10f4   :  { %v2838_v1 = vpop.xlane.xlu1 %2837 }
0x10f5   :  { %v2848_v2 = vmul.f32 %v2838_v1, %v3901_v5 }
0x10f7   :  { %v2852_v3 = vsub.f32 %v2832_v0, %v2848_v2 }
0x10f9   :  { %v2856_v56 = vmul.f32 %v2852_v3, %v2852_v3 }
0x10fb   :  { %v2860_v59 = vsel %vm105_vm1, %v2856_v56, 0.0 }
0x10fc   :  { %2861 = vadd.xlane.f32.xlu0 %v2860_v59  ;;  %v2841_v18 = vpop.xlane.xlu0 %2840 }
0x10fd   :  { %v2849_v60 = vmul.f32 %v2841_v18, %v3901_v5 }
0x10ff   :  { %v4571_v31 = vsub.f32 %v2833_v51, %v2849_v60 }
0x1101   :  { %v2857_v55 = vmul.f32 %v4571_v31, %v4571_v31 }
0x1103   :  { %v2863_v33 = vsel %vm105_vm1, %v2857_v55, 0.0 }
0x1104   :  { %v2844_v16 = vpop.xlane.xlu2 %2843  ;;  %2864 = vadd.xlane.f32.xlu2 %v2863_v33 }
0x1105   :  { %v2850_v48 = vmul.f32 %v2844_v16, %v3901_v5 }
0x1107   :  { %v4577_v62 = vsub.f32 %v2834_v12, %v2850_v48 }
0x1109   :  { %v2858_v27 = vmul.f32 %v4577_v62, %v4577_v62 }
0x110b   :  { %v2866_v46 = vsel %vm105_vm1, %v2858_v27, 0.0 }
0x110c   :  { %2867 = vadd.xlane.f32.xlu1 %v2866_v46 }
0x1131   :  { %v2847_v49 = vpop.xlane.xlu1 %2846 }
0x1132   :  { %v2851_v30 = vmul.f32 %v2847_v49, %v3901_v5 }
0x1134   :  { %v4583_v14 = vsub.f32 %v2835_v57, %v2851_v30 }
0x1136   :  { %v2859_v23 = vmul.f32 %v4583_v14, %v4583_v14 }
0x1138   :  { %v2869_v29 = vsel %vm105_vm1, %v2859_v23, 0.0 }
0x1139   :  { %2870 = vadd.xlane.f32.xlu0 %v2869_v29 }
0x116f   :  { %v2862_v8 = vpop.xlane.xlu0 %2861 }
0x1170   :  { %v2872_v15 = vmul.f32 %v2862_v8, %v3901_v5 }
0x1172   :  { %v2876_v4 = vadd.f32 1e-05, %v2872_v15 }
0x1174   :  { %3392 = vrsqrt.f32 %v2876_v4  ;;  %vm2886_vm11 = vweird.f32 %v2876_v4 }
0x1177   :  { %v2865_v40 = vpop.xlane.xlu2 %2864 }
0x1178   :  { %v2873_v25 = vmul.f32 %v2865_v40, %v3901_v5 }
0x117a   :  { %v3393_v34 = vpop.eup %3392  ;;  %v2877_v9 = vadd.f32 1e-05, %v2873_v25 }
0x117b   :  { %v2881_v42 = vmul.f32 %v3393_v34, %v2876_v4  ;;  %vm2887_vm5 = vweird.f32 %v3393_v34 }
0x117c   :  { %3394 = vrsqrt.f32 %v2877_v9  ;;  %vm2888_vm12 = vmor %vm2886_vm11, %vm2887_vm5  ;;  %vm2896_vm14 = vweird.f32 %v2877_v9 }
0x117d   :  { %v2882_v54 = vmul.f32 %v3393_v34, %v2881_v42 }
0x117f   :  { %v2883_v63 = vmul.f32 0.5, %v2882_v54  ;;  %v2868_v35 = vpop.xlane.xlu1 %2867 }
0x1180   :  { %v2874_v32 = vmul.f32 %v2868_v35, %v3901_v5 }
0x1181   :  { %v2884_v39 = vsub.f32 1.5, %v2883_v63 }
0x1182   :  { %v3395_v47 = vpop.eup %3394  ;;  %v2878_v37 = vadd.f32 1e-05, %v2874_v32 }
0x1183   :  { %v2885_v50 = vmul.f32 %v3393_v34, %v2884_v39  ;;  %v2891_v17 = vmul.f32 %v3395_v47, %v2877_v9  ;;  %vm2897_vm13 = vweird.f32 %v3395_v47 }
0x1184   :  { %3396 = vrsqrt.f32 %v2878_v37  ;;  %vm2898_vm2 = vmor %vm2896_vm14, %vm2897_vm13  ;;  %vm2906_vm0 = vweird.f32 %v2878_v37 }
0x1185   :  { %v2889_v7 = vsel %vm2888_vm12, %v3393_v34, %v2885_v50  ;;  %v2892_v44 = vmul.f32 %v3395_v47, %v2891_v17 }
0x1186   :  { %v2920_v6 = vmul.f32 %v2889_v7, %v2852_v3 }
0x1187   :  { %v2893_v11 = vmul.f32 0.5, %v2892_v44 }
0x1188   :  { %v2925_v19 = vmul.f32 %v2924_v28, %v2920_v6 }
0x1189   :  { %v2894_v0 = vsub.f32 1.5, %v2893_v11 }
0x118a   :  { %v2930_v53 = vadd.f32 %v2929_v24, %v2925_v19  ;;  %v3397_v10 = vpop.eup %3396 }
0x118b   :  { %v2895_v21 = vmul.f32 %v3395_v47, %v2894_v0  ;;  %v2901_v51 = vmul.f32 %v3397_v10, %v2878_v37  ;;  %vm2907_vm15 = vweird.f32 %v3397_v10 }
0x118c   :  { %3121 = vmatmul.msk.f32.vlgmr.msra.gmra.mxu1 %vm105_vm1, %v2930_v53  ;;  %vm2908_vm3 = vmor %vm2906_vm0, %vm2907_vm15 }
0x118d   :  { %v2899_v13 = vsel %vm2898_vm2, %v3395_v47, %v2895_v21  ;;  %v2902_v20 = vmul.f32 %v3397_v10, %v2901_v51 }
0x118e   :  { %v2921_v36 = vmul.f32 %v2899_v13, %v4571_v31 }
0x118f   :  { %v2903_v12 = vmul.f32 0.5, %v2902_v20 }
0x1190   :  { %v2926_v45 = vmul.f32 %v2924_v28, %v2921_v36 }
0x1191   :  { %v2904_v61 = vsub.f32 1.5, %v2903_v12 }
0x1192   :  { %v2931_v26 = vadd.f32 %v2929_v24, %v2926_v45 }
0x1193   :  { %v2905_v57 = vmul.f32 %v3397_v10, %v2904_v61 }
0x1194   :  { %3122 = vmatmul.msk.f32.gmra.mxu1 %vm105_vm1, %v2931_v26 }
0x1195   :  { %v2909_v22 = vsel %vm2908_vm3, %v3397_v10, %v2905_v57 }
0x1196   :  { %v2922_v1 = vmul.f32 %v2909_v22, %v4577_v62 }
0x1198   :  { %v2927_v2 = vmul.f32 %v2924_v28, %v2922_v1 }
0x119a   :  { %v2932_v3 = vadd.f32 %v2929_v24, %v2927_v2 }
0x119c   :  { %3123 = vmatmul.msk.f32.gmra.mxu1 %vm105_vm1, %v2932_v3 }
0x11ac   :  { %v2871_v56 = vpop.xlane.xlu0 %2870 }
0x11ad   :  { %v2875_v59 = vmul.f32 %v2871_v56, %v3901_v5  ;;  %v3402_v5 = vld [vmem:[%s4623_s2] sm:$0xff] }
0x11ae   :  { %v2938_v30 = vperm.slane %v3402_v5, 1 }
0x11af   :  { %v2879_v18 = vadd.f32 1e-05, %v2875_v59 }
0x11b1   :  { %3398 = vrsqrt.f32 %v2879_v18  ;;  %vm2916_vm6 = vweird.f32 %v2879_v18 }
0x11b7   :  { %v3399_v60 = vpop.eup %3398 }
0x11b8   :  { %v2911_v31 = vmul.f32 %v3399_v60, %v2879_v18  ;;  %vm2917_vm4 = vweird.f32 %v3399_v60 }
0x11b9   :  { %vm2918_vm7 = vmor %vm2916_vm6, %vm2917_vm4 }
0x11ba   :  { %v2912_v55 = vmul.f32 %v3399_v60, %v2911_v31 }
0x11bc   :  { %v2913_v33 = vmul.f32 0.5, %v2912_v55 }
0x11be   :  { %v2914_v16 = vsub.f32 1.5, %v2913_v33 }
0x11c0   :  { %v2915_v48 = vmul.f32 %v3399_v60, %v2914_v16 }
0x11c2   :  { %v2919_v27 = vsel %vm2918_vm7, %v3399_v60, %v2915_v48 }
0x11c3   :  { %v2923_v62 = vmul.f32 %v2919_v27, %v4583_v14 }
0x11c5   :  { %v2928_v46 = vmul.f32 %v2924_v28, %v2923_v62 }
0x11c7   :  { %v2933_v49 = vadd.f32 %v2929_v24, %v2928_v46 }
0x11c9   :  { %3124 = vmatmul.msk.f32.gmra.mxu1 %vm105_vm1, %v2933_v49 }
0x1209   :  { %v2968_v23 = vpop.f32.mrf.mxu1 }
0x120a   :  { %v2969_v29 = vadd.f32 %v2968_v23, %v2938_v30 }
0x120c   :  { %2980 = vst.msk [vmem:[%s4624_s3] sm:$0xff] %vm105_vm1, %v2969_v29 }
0x1211   :  { %v2971_v38 = vpop.f32.mrf.mxu1 }
0x1212   :  { %v2972_v41 = vadd.f32 %v2971_v38, %v2938_v30 }
0x1214   :  { %2981 = vst.msk [vmem:[%s4624_s3 + $0x8] sm:$0xff] %vm105_vm1, %v2972_v41 }
0x1219   :  { %v2974_v14 = vpop.f32.mrf.mxu1 }
0x121a   :  { %v2975_v58 = vadd.f32 %v2974_v14, %v2938_v30 }
0x121c   :  { %2982 = vst.msk [vmem:[%s4624_s3 + $0x10] sm:$0xff] %vm105_vm1, %v2975_v58 }
0x1246   :  { %v2977_v52 = vpop.f32.mrf.mxu1 }
0x1247   :  { %v2978_v8 = vadd.f32 %v2977_v52, %v2938_v30 }
0x1249   :  { %2983 = vst.msk [vmem:[%s4624_s3 + $0x18] sm:$0xff] %vm105_vm1, %v2978_v8 }
0x124a   :  { %2988 = vsyncpa [#allocation3], 1 }

</bundles_post_ra>
